<compile_context>
chip_gen: v5e
topology: v5e:2x2
jax: 0.10.0
libtpu: 0.0.40
codegen_flags: <defaults>
</compile_context>

<pallas_src>
import math

import jax
import jax.numpy as jnp
from jax.experimental import pallas as pl
from jax.experimental.pallas import tpu as pltpu


def _round_up(x: int, m: int) -> int:
    return ((x + m - 1) // m) * m


def _ovr_csp_kernel(wt_ref, x_ref, o_ref):
    # wt_ref: (B, M, C)   x_ref: (tn, B, C, T)   o_ref: (tn*B, M)
    tn, B, C, T = x_ref.shape
    M = wt_ref.shape[1]
    I = tn * B  # flattened (trial, band) batch

    # Leading-dim folds only (layout-free): no tiled-dim reshapes inside the kernel.
    x = x_ref[...].reshape(I, C, T)                                        # (I, C, T)
    wt = jnp.broadcast_to(wt_ref[...][None], (tn, B, M, C)).reshape(I, M, C)

    # Per-(trial, band) Gram matrix over time: full K = T contraction on the MXU.
    cov = jnp.einsum(
        "ict,idt->icd", x, x,
        preferred_element_type=jnp.float32,
        precision=jax.lax.Precision.HIGHEST,
    )                                                                      # (I, C, C)

    # p[i,m,d] = sum_c WT[i,m,c] * Cov[i,c,d]
    p = jnp.einsum(
        "imc,icd->imd", wt, cov,
        preferred_element_type=jnp.float32,
        precision=jax.lax.Precision.HIGHEST,
    )                                                                      # (I, M, C)

    # Quadratic form: diag[i,m] = sum_d p[i,m,d] * WT[i,m,d]  (small lane reduce over C)
    diag = jnp.sum(p * wt, axis=-1)                                        # (I, M)

    # Per-(trial, band) normalization: each row holds exactly that band's M filters,
    # so the band-wise denominator is a plain row sum.
    denom = jnp.sum(diag, axis=-1, keepdims=True)                          # (I, 1)

    # 1/sqrt(T) scaling of xfb cancels exactly in this ratio, so it is omitted.
    o_ref[...] = jnp.log(diag / denom).astype(o_ref.dtype)


def ovr_csp_forward(xfb, WT, *, trials_per_block: int = 64):
    """xfb: (N, B, C, T) float32; WT: (B, M, C) float32 -> (N, B, M) float32."""
    N, B, C, T = xfb.shape
    Bw, M, Cw = WT.shape
    assert Bw == B and Cw == C

    # Trials per grid step: multiple of 8 so the (tn*B, M) output block keeps a
    # sublane-aligned leading dim. Tune `trials_per_block` against scoped VMEM
    # (block xfb is double-buffered): 64 is safe for typical OVR-CSP shapes.
    tn = min(trials_per_block, _round_up(N, 8))
    tn = _round_up(tn, 8)
    G = pl.cdiv(N, tn)
    Np = G * tn
    if Np != N:
        # Padded trials produce NaN rows that are sliced off below.
        xfb = jnp.pad(xfb, ((0, Np - N), (0, 0), (0, 0), (0, 0)))

    out_flat = pl.pallas_call(
        _ovr_csp_kernel,
        out_shape=jax.ShapeDtypeStruct((Np * B, M), jnp.float32),
        grid=(G,),
        in_specs=[
            # WT: small, resident across all grid steps.
            pl.BlockSpec((B, M, C), lambda n: (0, 0, 0)),
            # xfb: tn trials per grid step.
            pl.BlockSpec((tn, B, C, T), lambda n: (n, 0, 0, 0)),
        ],
        out_specs=pl.BlockSpec((tn * B, M), lambda n: (n, 0)),
        compiler_params=pltpu.CompilerParams(
            dimension_semantics=("parallel",),
            vmem_limit_bytes=32 * 1024 * 1024,
        ),
    )(WT, xfb)

    return out_flat.reshape(Np, B, M)[:N]


if __name__ == "__main__":
    # Small shapes consistent with the module's __init__:
    nb_classes = 2
    m_filters = 2
    nb_bands = 4           # B
    nb_channels = 8        # C
    M = 2 * m_filters * nb_classes   # 8
    N = 10                 # trials (exercises multiple grid steps + padding)
    T = 128                # time samples

    key = jax.random.PRNGKey(0)
    k_wt, k_x = jax.random.split(key)

    # Deterministic parameter init: normal with std=0.1 (matches torch.nn.init.normal_(std=0.1))
    WT = 0.1 * jax.random.normal(k_wt, (nb_bands, M, nb_channels), dtype=jnp.float32)
    xfb = jax.random.normal(k_x, (N, nb_bands, nb_channels, T), dtype=jnp.float32)

    out = ovr_csp_forward(xfb, WT, trials_per_block=8)   # small blocks to exercise grid > 1
    out = jax.block_until_ready(out)

    # Pure-JAX reference following the PyTorch forward exactly (including the 1/sqrt(T) scale,
    # which demonstrates the in-kernel omission of it is a no-op).
    xs = xfb / math.sqrt(T)
    Z = jnp.einsum("bmc,nbct->nbmt", WT, xs, precision=jax.lax.Precision.HIGHEST)
    diag = jnp.sum(Z * Z, axis=-1)
    ref = jnp.log(diag / jnp.sum(diag, axis=-1, keepdims=True))

    assert out.shape == (N, nb_bands, M), f"bad shape {out.shape}"
    assert jnp.allclose(out, ref, atol=1e-4, rtol=1e-4), "mismatch vs reference"

    # TODO(synk): OVR_CSP.fit (CSP eigendecomposition training) is host-side numpy and is out of
    # scope for this forward-pass kernel.
    print("KERNEL_OK")
</pallas_src>

<mosaic_0001>
module attributes {stable_mosaic.version = 11 : i64} {
  func.func @_ovr_csp_kernel(%arg0: i32, %arg1: memref<4x8x8xf32, #tpu.memory_space<vmem>>, %arg2: memref<8x4x8x128xf32, #tpu.memory_space<vmem>>, %arg3: memref<32x8xf32, #tpu.memory_space<vmem>>) attributes {dimension_semantics = [#tpu.dimension_semantics<parallel>], iteration_bounds = array<i64: 2>, scalar_prefetch = 0 : i64, scratch_operands = 0 : i64, tpu.core_type = #tpu.core_type<tc>, window_params = [{pipeline_mode = #tpu.pipeline_mode<synchronous>, transform_indices = @transform_0, window_bounds = array<i64: 4, 8, 8>}, {transform_indices = @transform_1, window_bounds = array<i64: 8, 4, 8, 128>}, {transform_indices = @transform_2, window_bounds = array<i64: 32, 8>}]} {
    %c0 = arith.constant 0 : index
    %c0_0 = arith.constant 0 : index
    %c0_1 = arith.constant 0 : index
    %c0_2 = arith.constant 0 : index
    %0 = vector.load %arg2[%c0, %c0_0, %c0_1, %c0_2] : memref<8x4x8x128xf32, #tpu.memory_space<vmem>>, vector<8x4x8x128xf32>
    %1 = vector.shape_cast %0 : vector<8x4x8x128xf32> to vector<32x8x128xf32>
    %c0_3 = arith.constant 0 : index
    %c0_4 = arith.constant 0 : index
    %c0_5 = arith.constant 0 : index
    %2 = vector.load %arg1[%c0_3, %c0_4, %c0_5] : memref<4x8x8xf32, #tpu.memory_space<vmem>>, vector<4x8x8xf32>
    %3 = vector.shape_cast %2 : vector<4x8x8xf32> to vector<1x4x8x8xf32>
    %4 = vector.shape_cast %3 : vector<1x4x8x8xf32> to vector<1x4x8x8xf32>
    %5 = vector.broadcast %4 : vector<1x4x8x8xf32> to vector<8x4x8x8xf32>
    %6 = vector.shape_cast %5 : vector<8x4x8x8xf32> to vector<32x8x8xf32>
    "tpu.trace_start"() <{level = 10 : i32, message = "ict,idt->icd"}> : () -> ()
    %cst = arith.constant dense<0.000000e+00> : vector<32x8x8xf32>
    %7 = tpu.matmul %1, %1, %cst {dimension_numbers = #tpu.dot_dimension_numbers<[2], [2], [1], [1], [0, 0, 0, 1, 1, 1], [0], [0]>, precision = #tpu.contract_precision<fp32>} : vector<32x8x128xf32>, vector<32x8x128xf32>, vector<32x8x8xf32> -> vector<32x8x8xf32>
    "tpu.trace_stop"() : () -> ()
    "tpu.trace_start"() <{level = 10 : i32, message = "imc,icd->imd"}> : () -> ()
    %cst_6 = arith.constant dense<0.000000e+00> : vector<32x8x8xf32>
    %8 = tpu.matmul %6, %7, %cst_6 {dimension_numbers = #tpu.dot_dimension_numbers<[2], [1], [1], [2], [0, 0, 0, 1, 1, 2], [0], [0]>, precision = #tpu.contract_precision<fp32>} : vector<32x8x8xf32>, vector<32x8x8xf32>, vector<32x8x8xf32> -> vector<32x8x8xf32>
    "tpu.trace_stop"() : () -> ()
    %9 = arith.mulf %8, %6 : vector<32x8x8xf32>
    %cst_7 = arith.constant dense<0.000000e+00> : vector<32x8xf32>
    %10 = vector.multi_reduction <add>, %9, %cst_7 [2] : vector<32x8x8xf32> to vector<32x8xf32>
    %cst_8 = arith.constant dense<0.000000e+00> : vector<32xf32>
    %11 = vector.multi_reduction <add>, %10, %cst_8 [1] : vector<32x8xf32> to vector<32xf32>
    %12 = vector.shape_cast %11 : vector<32xf32> to vector<32x1xf32>
    %13 = vector.broadcast %12 : vector<32x1xf32> to vector<32x8xf32>
    %14 = arith.divf %10, %13 : vector<32x8xf32>
    %15 = math.log %14 : vector<32x8xf32>
    %c0_9 = arith.constant 0 : index
    %c0_10 = arith.constant 0 : index
    %16 = vector.load %arg3[%c0_9, %c0_10] : memref<32x8xf32, #tpu.memory_space<vmem>>, vector<32x8xf32>
    tpu.vector_store %arg3[%c0_9, %c0_10], %15 {strides = array<i32>} : memref<32x8xf32, #tpu.memory_space<vmem>>, vector<32x8xf32>,
    return
  }
  func.func @transform_0(%arg0: i32) -> (i32, i32, i32) {
    %c0_i32 = arith.constant 0 : i32
    %c0_i32_0 = arith.constant 0 : i32
    %c0_i32_1 = arith.constant 0 : i32
    %c0_i32_2 = arith.constant 0 : i32
    return %c0_i32, %c0_i32_0, %c0_i32_1 : i32, i32, i32
  }
  func.func @transform_1(%arg0: i32) -> (i32, i32, i32, i32) {
    %c0_i32 = arith.constant 0 : i32
    %c0_i32_0 = arith.constant 0 : i32
    %c0_i32_1 = arith.constant 0 : i32
    %c0_i32_2 = arith.constant 0 : i32
    return %arg0, %c0_i32, %c0_i32_0, %c0_i32_1 : i32, i32, i32, i32
  }
  func.func @transform_2(%arg0: i32) -> (i32, i32) {
    %c0_i32 = arith.constant 0 : i32
    %c0_i32_0 = arith.constant 0 : i32
    return %arg0, %c0_i32 : i32, i32
  }
}

</mosaic_0001>

<bundles_post_ra>
// kernel: tpu_custom_call.1
= control target key start
LH: loop header
LB: loop body
LE: loop exit
PB: predicated region body
PF: predicated region fallthrough
CT: control target
= control target key end

     0   :  { %7 = vsyncpa [#allocation3], 0  ;;  %s13128_s0 = inlined_call_operand.hbm [shape: f32[4,8,8], index: 0, kind: input, shape index: {}]   ;;  %s13129_s1 = inlined_call_operand.hbm [shape: f32[16,4,8,128], index: 1, kind: input, shape index: {}]   ;;  %s13130_s2 = inlined_call_operand.vmem [shape: f32[64,8], index: 2, kind: output, shape index: {}]  }
   0x1   :  { %8 = vsyncpa [#allocation5], 0 }
   0x2   :  { %10 = vsyncpa [#allocation5 + $0x1], 0  ;;  %s11040_s9 = smov 0   ;;  %s11042_s10 = smov 0  }
   0x3   :  { %s11044_s11 = smov 0   ;;  %s11046_s12 = smov 0  }
   0x4 LB: > { %s10711_s13 = sadd.s32 4294967295, %s11019_s12   ;;  %p57_p0 = scmp.ne.s32.totalorder %s11011_s10, %s11007_s9  ;;  %s11019_s12 = sphi %s11046_s12, %s13260_s12   ;;  %s11015_s11 = sphi %s11044_s11, %s13259_s11   ;;  %s11011_s10 = sphi %s11042_s10, %s13258_s10   ;;  %s11007_s9 = sphi %s11040_s9, %s13257_s9  }
   0x5   : > { %p11062_p1 = scmp.eq.s32.totalorder %s10711_s13, 0  ;;  %p10713_p2 = scmp.ge.s32.totalorder %s11019_s12, 1 }
   0x6   : > { %p94_p3 = scmp.lt.s32.totalorder %s11019_s12, 3  ;;  %s105_s18 = sshll.u32 %s13128_s0, 4  ;;  %s106_s18 = int_to_ptr.hbm [resolvable:$true] %s105_s18 }
   0x7   : > { %p11070_p4 = por %p11062_p1, %p57_p0  ;;  %s11021_s20 = smov [#allocation2]  }
   0x8   : > { %p11077_p5 = pnand %p10713_p2, %p94_p3  ;;  %s107_s21 = sshll.u32 %s11021_s20, 4  ;;  %s108_s21 = int_to_ptr.vmem [resolvable:$true] %s107_s21 }
   0x9   : > { %s11086_s22 = sadd.s32 1, %s11019_s12   ;;  %s11022_s23 = smov 128  }
   0xa   : > { %p10735_p6 = pneg %p11077_p5  ;;  %s11023_s24 = smov 8  }
   0xb   : > { %s41_s25 = ssub.s32 %s11019_s12, %s11086_s22  ;;  %s44_s26 = sadd.s32 1, %s11015_s11 }
   0xc   : > { %p10736_p7 = pnand %p10735_p6, %p11062_p1  ;;  %p42_p8 = scmp.eq.s32.totalorder %s41_s25, 0 }
   0xd   : > { %p51_p9 = scmp.ne.s32.totalorder %s11015_s11, %s11011_s10  ;;  %p52_p10 = scmp.eq.s32.totalorder %s11019_s12, 0 }
   0xe   : > { %10738 = dma.hbm_to_vmem [thread:$0]  (!%p10736_p7), %s106_s18, 512, %s108_s21, [#allocation3], %s11022_s23, %s11022_s23, %s11023_s24  }
   0xf   : > { %p10744_p11 = scmp.lt.s32.totalorder %s11019_s12, 2  ;;  %p53_p12 = por %p52_p10, %p51_p9 }
  0x10   : > { %s11099_s27 = scalar_select %p42_p8, %s11015_s11, %s44_s26  }
  0x11   : > { %s121_s28 = sand.u32 1, %s11015_s11   ;;  %s10728_s30 = sshll.u32 %s11019_s12, 8 }
  0x12   : > { %s10716_s29 = sshll.u32 %s121_s28, 8  ;;  %s131_s5 = scalar_lea.hbm %s13129_s1, %s10728_s30 }
  0x13   : > { %s125_s6 = scalar_lea.vmem [#allocation4], %s10716_s29  ;;  %s132_s8 = sshll.u32 %s131_s5, 4  ;;  %s133_s8 = int_to_ptr.hbm [resolvable:$true] %s132_s8 }
  0x14   : > { %s134_s7 = sshll.u32 %s125_s6, 4  ;;  %p11106_p13 = pnand %p10744_p11, %p53_p12  ;;  %s135_s7 = int_to_ptr.vmem [resolvable:$true] %s134_s7 }
  0x15   : > { %s122_s16 = scalar_lea.sflag [#allocation5], %s121_s28  ;;  %s10951_s17 = sshra.s32 %s133_s8, 4  ;;  %s10952_s17 = int_to_ptr.hbm [resolvable:$true] %s10951_s17 }
  0x16   : > { %s10953_s18 = scalar_lea.hbm %s10952_s17, 256  ;;  %p10955_p2 = pneg %p11106_p13 }
  0x17   : > { %p10954_p0 = scmp.ne.s32.totalorder %s10952_s17, %s10953_s18  ;;  %s10958_s25 = scalar_lea.hbm %s13129_s1, 512 }
  0x18   : > { %p10959_p7 = scmp.lt.s32.totalorder %s10952_s17, %s13129_s1  ;;  %p10960_p8 = scmp.lt.s32.totalorder %s10958_s25, %s10953_s18 }
  0x19   : > { %p10956_p3 = pnand %p10955_p2, %p10954_p0 }
  0x1a   : > { %p10961_p9 = por %p10960_p8, %p10959_p7 }
  0x1b   : > { %p10957_p6 = pneg %p10956_p3 }
  0x1d   : > { %p10962_p10 = pnand %p10961_p9, %p10957_p6 }
  0x1f   : > { %10965 = shalt.err (!%p10962_p10)
}
  0x20   : > { %10742 = dma.hbm_to_vmem [thread:$0]  (!%p11106_p13), %s133_s8, 4096, %s135_s7, %s122_s16, %s11022_s23, %s11022_s23, %s11023_s24  }
  0x21   : > { %146 = sbr.rel (%p11077_p5) target bundleno = 1425 (0x591), region = 28 }
  0x26   : > { %10998 = dma.done.wait (%p11062_p1), [#allocation3], 512  }
  0x27   : > { %11000 = vsyncadd (%p11062_p1), [#allocation3], 4294966784  ;;  %s153_s28 = sand.u32 1, %s11011_s10  }
  0x28   : > { %s10722_s30 = sshll.u32 %s153_s28, 8  ;;  %s154_s3 = scalar_lea.sflag [#allocation5], %s153_s28 }
  0x29   : > { %s11130_s4 = scalar_lea.vmem [#allocation4], %s10722_s30 }
  0x2a   : > { %11002 = dma.done.wait (%p11070_p4), %s154_s3, 4096  }
  0x2b   : > { %11004 = vsyncadd (%p11070_p4), %s154_s3, 4294963200  ;;  %v186_v0 = vld [vmem:[%s11130_s4] sm:$0xff]  ;;  %v187_v1 = vld [vmem:[%s11130_s4 + $0x8] sm:$0xff]  ;;  %vm13134_vm0 = vcmask 64512   ;;  %vm13141_vm1 = vcmask 1041409   ;;  %vm13140_vm2 = vcmask 1042434  }
  0x2c   : > { %v188_v2 = vld [vmem:[%s11130_s4 + $0x10] sm:$0xff]  ;;  %v237_v3 = vand.u32 4294901760, %v186_v0  ;;  %v383_v4 = vand.u32 4294901760, %v187_v1  ;;  %v189_v5 = vld [vmem:[%s11130_s4 + $0x18] sm:$0xff]  ;;  %v190_v24 = vld [vmem:[%s11130_s4 + $0x20] sm:$0xff]  ;;  %vm13139_vm3 = vcmask 1043459  }
  0x2d   : > { %v11140_v8 = vand.u32 4294901760, %v188_v2  ;;  %v11142_v9 = vand.u32 4294901760, %v189_v5  ;;  %v191_v25 = vld [vmem:[%s11130_s4 + $0x28] sm:$0xff]  ;;  %v821_v26 = vand.u32 4294901760, %v190_v24  ;;  %v192_v36 = vld [vmem:[%s11130_s4 + $0x30] sm:$0xff]  ;;  %v193_v37 = vld [vmem:[%s11130_s4 + $0x38] sm:$0xff] }
  0x2e   : > { %314 = vmatpush.xpose.msra.mxu3 %v237_v3  ;;  %v240_v6 = vsub.f32 %v186_v0, %v237_v3  ;;  %238 = vmatpush.xpose.msra.mxu0 %v237_v3  ;;  %v386_v7 = vsub.f32 %v187_v1, %v383_v4  ;;  %v11155_v27 = vand.u32 4294901760, %v191_v25  ;;  %v1113_v38 = vand.u32 4294901760, %v192_v36  ;;  %v194_v48 = vld [vmem:[%s11130_s4 + $0x40] sm:$0xff]  ;;  %v195_v49 = vld [vmem:[%s11130_s4 + $0x48] sm:$0xff]  ;;  %v196_v60 = vld [vmem:[%s11130_s4 + $0x50] sm:$0xff]  ;;  %s10723_s14 = sshll.u32 %s10711_s13, 2 }
  0x2f   : > { %v532_v14 = vsub.f32 %v188_v2, %v11140_v8  ;;  %v11146_v15 = vsub.f32 %v189_v5, %v11142_v9  ;;  %v824_v28 = vsub.f32 %v190_v24, %v821_v26  ;;  %v11172_v39 = vand.u32 4294901760, %v193_v37  ;;  %v197_v61 = vld [vmem:[%s11130_s4 + $0x58] sm:$0xff]  ;;  %p181_p1 = scmp.lt.s32.totalorder %s10723_s14, 7 }
  0x30   : > { %291 = vmatpush.xpose.msra.mxu2 %v240_v6  ;;  %v241_v10 = vand.u32 4294901760, %v240_v6  ;;  %v387_v11 = vand.u32 4294901760, %v386_v7  ;;  %v970_v29 = vsub.f32 %v191_v25, %v11155_v27  ;;  %v1116_v40 = vsub.f32 %v192_v36, %v1113_v38 }
  0x31   : > { %v533_v18 = vand.u32 4294901760, %v532_v14  ;;  %v679_v19 = vand.u32 4294901760, %v11146_v15  ;;  %v825_v30 = vand.u32 4294901760, %v824_v28  ;;  %v1262_v41 = vsub.f32 %v193_v37, %v11172_v39  ;;  %s13262_s14 = smov (!%p181_p1, %s10723_s14), 7 }
  0x32   : > { %318 = vmatmul.f32.vlgmr.msra.gmra.mxu3 %v241_v10  ;;  %v242_v12 = vsub.f32 %v240_v6, %v241_v10  ;;  %340 = vmatpush.xpose.msrb.mxu0 %v241_v10  ;;  %v388_v13 = vsub.f32 %v386_v7, %v387_v11  ;;  %v971_v31 = vand.u32 4294901760, %v970_v29  ;;  %v1117_v42 = vand.u32 4294901760, %v1116_v40  ;;  %s10724_s12 = sshll.u32 %s13262_s14, 3 }
  0x33   : > { %294 = vmatmul.f32.vlgmr.msra.gmra.mxu2 %v240_v6  ;;  %v534_v20 = vsub.f32 %v532_v14, %v533_v18  ;;  %v680_v21 = vsub.f32 %v11146_v15, %v679_v19  ;;  %v826_v32 = vsub.f32 %v824_v28, %v825_v30  ;;  %v1263_v43 = vand.u32 4294901760, %v1262_v41  ;;  %s12752_s19 = scalar_lea.vmem %s13130_s2, %s10724_s12 }
  0x34   : > { %384 = vmatpush.xpose.msrb.mxu2 %v383_v4  ;;  %v243_v16 = vand.u32 4294901760, %v242_v12  ;;  %v389_v17 = vand.u32 4294901760, %v388_v13  ;;  %v972_v33 = vsub.f32 %v970_v29, %v971_v31  ;;  %v1118_v44 = vsub.f32 %v1116_v40, %v1117_v42 }
  0x35   : > { %v535_v22 = vand.u32 4294901760, %v534_v20  ;;  %v681_v23 = vand.u32 4294901760, %v680_v21  ;;  %v827_v34 = vand.u32 4294901760, %v826_v32  ;;  %v1264_v45 = vsub.f32 %v1262_v41, %v1263_v43 }
  0x36   : > { %244 = vmatmul.f32.vlgmr.msra.gmra.mxu0 %v243_v16  ;;  %268 = vmatpush.xpose.msra.mxu1 %v243_v16  ;;  %v973_v35 = vand.u32 4294901760, %v972_v33  ;;  %v1119_v46 = vand.u32 4294901760, %v1118_v44  ;;  %v1405_v50 = vand.u32 4294901760, %v194_v48  ;;  %v11183_v51 = vand.u32 4294901760, %v195_v49 }
  0x37   : > { %414 = vmatpush.xpose.msrb.mxu3 %v389_v17  ;;  %437 = vmatpush.xpose.msra.mxu0 %v386_v7  ;;  %v1265_v47 = vand.u32 4294901760, %v1264_v45  ;;  %v11194_v62 = vand.u32 4294901760, %v196_v60  ;;  %v11196_v63 = vand.u32 4294901760, %v197_v61  ;;  %vm13138_vm4 = vcmask 1044484  }
  0x38   : > { %486 = vmatpush.xpose.msra.mxu2 %v387_v11  ;;  %v1408_v52 = vsub.f32 %v194_v48, %v1405_v50  ;;  %v1554_v53 = vsub.f32 %v195_v49, %v11183_v51  ;;  %vm13137_vm5 = vcmask 1045509   ;;  %vm13136_vm6 = vcmask 1046534  }
  0x39   : > { %270 = vmatmul.f32.vlgmr.msra.gmra.mxu1 %v237_v3  ;;  %v1700_v0 = vsub.f32 %v196_v60, %v11194_v62  ;;  %v11201_v1 = vsub.f32 %v197_v61, %v11196_v63  ;;  %v202_v60 = vld [vmem:[%s11130_s4 + $0x80] sm:$0xff]  ;;  %v203_v61 = vld [vmem:[%s11130_s4 + $0x88] sm:$0xff]  ;;  %vm13135_vm7 = vcmask 1047559  }
  0x3a   : > { %362 = vmatpush.xpose.msrb.mxu1 %v237_v3  ;;  %416 = vmatmul.f32.vlgmr.msrb.gmra.mxu3 %v383_v4  ;;  %v1409_v54 = vand.u32 4294901760, %v1408_v52  ;;  %v1555_v55 = vand.u32 4294901760, %v1554_v53 }
  0x3b   : > { %508 = vmatpush.xpose.msra.mxu3 %v383_v4  ;;  %390 = vmatmul.f32.vlgmr.msrb.gmra.mxu2 %v389_v17  ;;  %v1701_v2 = vand.u32 4294901760, %v1700_v0 }
  0x3c   : > { %583 = vmatpush.xpose.msrb.mxu2 %v532_v14  ;;  %v1410_v56 = vsub.f32 %v1408_v52, %v1409_v54  ;;  %v1556_v57 = vsub.f32 %v1554_v53, %v1555_v55 }
  0x3e   : > { %460 = vmatpush.xpose.msra.mxu1 %v383_v4  ;;  %342 = vmatmul.f32.vlgmr.msrb.gmra.mxu0 %v237_v3  ;;  %v1411_v58 = vand.u32 4294901760, %v1410_v56  ;;  %v1557_v59 = vand.u32 4294901760, %v1556_v57 }
  0x3f   : > { %606 = vmatpush.xpose.msrb.mxu3 %v11140_v8  ;;  %530 = vmatpush.xpose.msrb.mxu0 %v11140_v8 }
  0x41   : > { %364 = vmatmul.f32.vlgmr.msrb.gmra.mxu1 %v237_v3  ;;  %v11204_v3 = vand.u32 4294901760, %v11201_v1 }
  0x42   : > { %510 = vmatmul.f32.vlgmr.msra.gmra.mxu3 %v383_v4  ;;  %560 = vmatpush.xpose.msrb.mxu1 %v535_v22 }
  0x43   : > { %488 = vmatmul.f32.vlgmr.msra.gmra.mxu2 %v383_v4  ;;  %706 = vmatpush.xpose.msra.mxu3 %v681_v23  ;;  %v1702_v4 = vsub.f32 %v1700_v0, %v1701_v2  ;;  %v1848_v5 = vsub.f32 %v11201_v1, %v11204_v3 }
  0x44   : > { %676 = vmatpush.xpose.msra.mxu2 %v11142_v9 }
  0x45   : > { %v1703_v6 = vand.u32 4294901760, %v1702_v4 }
  0x46   : > { %440 = vmatmul.f32.vlgmr.msra.gmra.mxu0 %v386_v7  ;;  %v1849_v7 = vand.u32 4294901760, %v1848_v5 }
  0x47   : > { %632 = vmatpush.xpose.msra.mxu0 %v533_v18 }
  0x49   : > { %464 = vmatmul.f32.vlgmr.msra.gmra.mxu1 %v387_v11 }
  0x4a   : > { %610 = vmatmul.f32.vlgmr.msrb.gmra.mxu3 %v533_v18  ;;  %654 = vmatpush.xpose.msra.mxu1 %v11140_v8 }
  0x4b   : > { %586 = vmatmul.f32.vlgmr.msrb.gmra.mxu2 %v532_v14  ;;  %800 = vmatpush.xpose.msrb.mxu3 %v11142_v9 }
  0x4c   : > { %778 = vmatpush.xpose.msrb.mxu2 %v679_v19 }
  0x4e   : > { %536 = vmatmul.f32.vlgmr.msrb.gmra.mxu0 %v535_v22 }
  0x4f   : > { %729 = vmatpush.xpose.msrb.mxu0 %v11146_v15 }
  0x51   : > { %562 = vmatmul.f32.vlgmr.msrb.gmra.mxu1 %v11140_v8 }
  0x52   : > { %708 = vmatmul.f32.vlgmr.msra.gmra.mxu3 %v11142_v9  ;;  %752 = vmatpush.xpose.msrb.mxu1 %v11142_v9 }
  0x53   : > { %682 = vmatmul.f32.vlgmr.msra.gmra.mxu2 %v681_v23  ;;  %898 = vmatpush.xpose.msra.mxu3 %v821_v26 }
  0x54   : > { %875 = vmatpush.xpose.msra.mxu2 %v824_v28 }
  0x56   : > { %634 = vmatmul.f32.vlgmr.msra.gmra.mxu0 %v11140_v8 }
  0x57   : > { %822 = vmatpush.xpose.msra.mxu0 %v821_v26 }
  0x59   : > { %656 = vmatmul.f32.vlgmr.msra.gmra.mxu1 %v11140_v8  ;;  %v198_v8 = vld [vmem:[%s11130_s4 + $0x60] sm:$0xff] }
  0x5a   : > { %802 = vmatmul.f32.vlgmr.msrb.gmra.mxu3 %v11142_v9  ;;  %852 = vmatpush.xpose.msra.mxu1 %v827_v34  ;;  %v11217_v10 = vand.u32 4294901760, %v198_v8 }
  0x5b   : > { %780 = vmatmul.f32.vlgmr.msrb.gmra.mxu2 %v11142_v9  ;;  %998 = vmatpush.xpose.msrb.mxu3 %v973_v35  ;;  %v199_v9 = vld [vmem:[%s11130_s4 + $0x68] sm:$0xff] }
  0x5c   : > { %968 = vmatpush.xpose.msrb.mxu2 %v11155_v27  ;;  %v11219_v11 = vand.u32 4294901760, %v199_v9  ;;  %v1992_v12 = vsub.f32 %v198_v8, %v11217_v10 }
  0x5e   : > { %732 = vmatmul.f32.vlgmr.msrb.gmra.mxu0 %v11146_v15  ;;  %v11225_v13 = vsub.f32 %v199_v9, %v11219_v11  ;;  %v1993_v14 = vand.u32 4294901760, %v1992_v12 }
  0x5f   : > { %924 = vmatpush.xpose.msrb.mxu0 %v825_v30 }
  0x60   : > { %v11230_v15 = vand.u32 4294901760, %v11225_v13  ;;  %v1994_v16 = vsub.f32 %v1992_v12, %v1993_v14 }
  0x61   : > { %756 = vmatmul.f32.vlgmr.msrb.gmra.mxu1 %v679_v19 }
  0x62   : > { %902 = vmatmul.f32.vlgmr.msra.gmra.mxu3 %v825_v30  ;;  %946 = vmatpush.xpose.msrb.mxu1 %v821_v26  ;;  %v2140_v18 = vsub.f32 %v11225_v13, %v11230_v15  ;;  %v1995_v22 = vand.u32 4294901760, %v1994_v16 }
  0x63   : > { %878 = vmatmul.f32.vlgmr.msra.gmra.mxu2 %v824_v28  ;;  %1092 = vmatpush.xpose.msra.mxu3 %v11155_v27  ;;  %v200_v28 = vld [vmem:[%s11130_s4 + $0x70] sm:$0xff] }
  0x64   : > { %1070 = vmatpush.xpose.msra.mxu2 %v971_v31  ;;  %v2141_v24 = vand.u32 4294901760, %v2140_v18  ;;  %v11253_v33 = vand.u32 4294901760, %v200_v28 }
  0x66   : > { %828 = vmatmul.f32.vlgmr.msra.gmra.mxu0 %v827_v34  ;;  %v2284_v36 = vsub.f32 %v200_v28, %v11253_v33 }
  0x67   : > { %1021 = vmatpush.xpose.msra.mxu0 %v970_v29 }
  0x69   : > { %854 = vmatmul.f32.vlgmr.msra.gmra.mxu1 %v821_v26 }
  0x6a   : > { %1000 = vmatmul.f32.vlgmr.msrb.gmra.mxu3 %v11155_v27  ;;  %1044 = vmatpush.xpose.msra.mxu1 %v11155_v27 }
  0x6b   : > { %974 = vmatmul.f32.vlgmr.msrb.gmra.mxu2 %v973_v35  ;;  %1190 = vmatpush.xpose.msrb.mxu3 %v1113_v38 }
  0x6c   : > { %1167 = vmatpush.xpose.msrb.mxu2 %v1116_v40 }
  0x6e   : > { %926 = vmatmul.f32.vlgmr.msrb.gmra.mxu0 %v821_v26 }
  0x6f   : > { %1114 = vmatpush.xpose.msrb.mxu0 %v1113_v38 }
  0x71   : > { %948 = vmatmul.f32.vlgmr.msrb.gmra.mxu1 %v821_v26 }
  0x72   : > { %1094 = vmatmul.f32.vlgmr.msra.gmra.mxu3 %v11155_v27  ;;  %1144 = vmatpush.xpose.msrb.mxu1 %v1119_v46 }
  0x73   : > { %1072 = vmatmul.f32.vlgmr.msra.gmra.mxu2 %v11155_v27  ;;  %1290 = vmatpush.xpose.msra.mxu3 %v1265_v47 }
  0x74   : > { %1260 = vmatpush.xpose.msra.mxu2 %v11172_v39 }
  0x76   : > { %1024 = vmatmul.f32.vlgmr.msra.gmra.mxu0 %v970_v29  ;;  %v201_v29 = vld [vmem:[%s11130_s4 + $0x78] sm:$0xff] }
  0x77   : > { %1216 = vmatpush.xpose.msra.mxu0 %v1117_v42  ;;  %v11255_v35 = vand.u32 4294901760, %v201_v29 }
  0x79   : > { %1048 = vmatmul.f32.vlgmr.msra.gmra.mxu1 %v971_v31 }
  0x7a   : > { %1194 = vmatmul.f32.vlgmr.msrb.gmra.mxu3 %v1117_v42  ;;  %1238 = vmatpush.xpose.msra.mxu1 %v1113_v38 }
  0x7b   : > { %1170 = vmatmul.f32.vlgmr.msrb.gmra.mxu2 %v1116_v40  ;;  %1384 = vmatpush.xpose.msrb.mxu3 %v11172_v39 }
  0x7c   : > { %1362 = vmatpush.xpose.msrb.mxu2 %v1263_v43 }
  0x7e   : > { %1120 = vmatmul.f32.vlgmr.msrb.gmra.mxu0 %v1119_v46 }
  0x7f   : > { %1313 = vmatpush.xpose.msrb.mxu0 %v1262_v41 }
  0x81   : > { %1146 = vmatmul.f32.vlgmr.msrb.gmra.mxu1 %v1113_v38 }
  0x82   : > { %1292 = vmatmul.f32.vlgmr.msra.gmra.mxu3 %v11172_v39  ;;  %1336 = vmatpush.xpose.msrb.mxu1 %v11172_v39 }
  0x83   : > { %1266 = vmatmul.f32.vlgmr.msra.gmra.mxu2 %v1265_v47  ;;  %1482 = vmatpush.xpose.msra.mxu3 %v1405_v50 }
  0x84   : > { %1459 = vmatpush.xpose.msra.mxu2 %v1408_v52 }
  0x86   : > { %1218 = vmatmul.f32.vlgmr.msra.gmra.mxu0 %v1113_v38 }
  0x87   : > { %1406 = vmatpush.xpose.msra.mxu0 %v1405_v50 }
  0x89   : > { %1240 = vmatmul.f32.vlgmr.msra.gmra.mxu1 %v1113_v38  ;;  %v11262_v38 = vsub.f32 %v201_v29, %v11255_v35 }
  0x8a   : > { %1386 = vmatmul.f32.vlgmr.msrb.gmra.mxu3 %v11172_v39  ;;  %1436 = vmatpush.xpose.msra.mxu1 %v1411_v58 }
  0x8b   : > { %1364 = vmatmul.f32.vlgmr.msrb.gmra.mxu2 %v11172_v39  ;;  %1582 = vmatpush.xpose.msrb.mxu3 %v1557_v59  ;;  %v11267_v45 = vand.u32 4294901760, %v11262_v38 }
  0x8c   : > { %1552 = vmatpush.xpose.msrb.mxu2 %v11183_v51 }
  0x8e   : > { %1316 = vmatmul.f32.vlgmr.msrb.gmra.mxu0 %v1262_v41 }
  0x8f   : > { %1508 = vmatpush.xpose.msrb.mxu0 %v1409_v54 }
  0x91   : > { %1340 = vmatmul.f32.vlgmr.msrb.gmra.mxu1 %v1263_v43  ;;  %v2285_v43 = vand.u32 4294901760, %v2284_v36 }
  0x92   : > { %1486 = vmatmul.f32.vlgmr.msra.gmra.mxu3 %v1409_v54  ;;  %1530 = vmatpush.xpose.msrb.mxu1 %v1405_v50 }
  0x93   : > { %1462 = vmatmul.f32.vlgmr.msra.gmra.mxu2 %v1408_v52  ;;  %1676 = vmatpush.xpose.msra.mxu3 %v11183_v51  ;;  %v2286_v47 = vsub.f32 %v2284_v36, %v2285_v43 }
  0x94   : > { %1654 = vmatpush.xpose.msra.mxu2 %v1555_v55 }
  0x95   : > { %v2287_v54 = vand.u32 4294901760, %v2286_v47 }
  0x96   : > { %1412 = vmatmul.f32.vlgmr.msra.gmra.mxu0 %v1411_v58 }
  0x97   : > { %1605 = vmatpush.xpose.msra.mxu0 %v1554_v53 }
  0x99   : > { %1438 = vmatmul.f32.vlgmr.msra.gmra.mxu1 %v1405_v50 }
  0x9a   : > { %1584 = vmatmul.f32.vlgmr.msrb.gmra.mxu3 %v11183_v51  ;;  %1628 = vmatpush.xpose.msra.mxu1 %v11183_v51 }
  0x9b   : > { %1558 = vmatmul.f32.vlgmr.msrb.gmra.mxu2 %v1557_v59  ;;  %1774 = vmatpush.xpose.msrb.mxu3 %v11194_v62 }
  0x9c   : > { %1751 = vmatpush.xpose.msrb.mxu2 %v1700_v0 }
  0x9e   : > { %1510 = vmatmul.f32.vlgmr.msrb.gmra.mxu0 %v1405_v50 }
  0x9f   : > { %1698 = vmatpush.xpose.msrb.mxu0 %v11194_v62 }
  0xa1   : > { %1532 = vmatmul.f32.vlgmr.msrb.gmra.mxu1 %v1405_v50  ;;  %v2432_v50 = vsub.f32 %v11262_v38, %v11267_v45 }
  0xa2   : > { %1678 = vmatmul.f32.vlgmr.msra.gmra.mxu3 %v11183_v51  ;;  %1728 = vmatpush.xpose.msrb.mxu1 %v1703_v6 }
  0xa3   : > { %1656 = vmatmul.f32.vlgmr.msra.gmra.mxu2 %v11183_v51  ;;  %1874 = vmatpush.xpose.msra.mxu3 %v1849_v7  ;;  %v2433_v56 = vand.u32 4294901760, %v2432_v50 }
  0xa4   : > { %1844 = vmatpush.xpose.msra.mxu2 %v11196_v63 }
  0xa6   : > { %1608 = vmatmul.f32.vlgmr.msra.gmra.mxu0 %v1554_v53 }
  0xa7   : > { %1800 = vmatpush.xpose.msra.mxu0 %v1701_v2 }
  0xa9   : > { %1632 = vmatmul.f32.vlgmr.msra.gmra.mxu1 %v1555_v55 }
  0xaa   : > { %1778 = vmatmul.f32.vlgmr.msrb.gmra.mxu3 %v1701_v2  ;;  %1822 = vmatpush.xpose.msra.mxu1 %v11194_v62 }
  0xab   : > { %1754 = vmatmul.f32.vlgmr.msrb.gmra.mxu2 %v1700_v0  ;;  %1968 = vmatpush.xpose.msrb.mxu3 %v11196_v63 }
  0xac   : > { %1946 = vmatpush.xpose.msrb.mxu2 %v11204_v3 }
  0xae   : > { %1704 = vmatmul.f32.vlgmr.msrb.gmra.mxu0 %v1703_v6 }
  0xaf   : > { %1897 = vmatpush.xpose.msrb.mxu0 %v11201_v1 }
  0xb1   : > { %1730 = vmatmul.f32.vlgmr.msrb.gmra.mxu1 %v11194_v62 }
  0xb2   : > { %1876 = vmatmul.f32.vlgmr.msra.gmra.mxu3 %v11196_v63  ;;  %1920 = vmatpush.xpose.msrb.mxu1 %v11196_v63 }
  0xb3   : > { %v245_v17 = vpop.f32.mrf.mxu0  ;;  %1850 = vmatmul.f32.vlgmr.msra.gmra.mxu2 %v1849_v7  ;;  %2066 = vmatpush.xpose.msra.mxu3 %v11217_v10 }
  0xb4   : > { %2043 = vmatpush.xpose.msra.mxu2 %v1992_v12 }
  0xb5   : > { %v319_v19 = vpop.f32.mrf.mxu3 }
  0xb6   : > { %v271_v20 = vpop.f32.mrf.mxu1  ;;  %1802 = vmatmul.f32.vlgmr.msra.gmra.mxu0 %v11194_v62  ;;  %v295_v21 = vpop.f32.mrf.mxu2 }
  0xb7   : > { %v272_v23 = vadd.f32 %v271_v20, %v245_v17  ;;  %1990 = vmatpush.xpose.msra.mxu0 %v11217_v10 }
  0xb9   : > { %v296_v25 = vadd.f32 %v295_v21, %v272_v23  ;;  %1824 = vmatmul.f32.vlgmr.msra.gmra.mxu1 %v11194_v62 }
  0xba   : > { %1970 = vmatmul.f32.vlgmr.msrb.gmra.mxu3 %v11196_v63  ;;  %2020 = vmatpush.xpose.msra.mxu1 %v1995_v22 }
  0xbb   : > { %v11242_v26 = vadd.f32 %v319_v19, %v296_v25  ;;  %v11244_v27 = vpop.f32.mrf.mxu0  ;;  %1948 = vmatmul.f32.vlgmr.msrb.gmra.mxu2 %v11196_v63  ;;  %2166 = vmatpush.xpose.msrb.mxu3 %v2141_v24 }
  0xbc   : > { %2136 = vmatpush.xpose.msrb.mxu2 %v11219_v11 }
  0xbd   : > { %v417_v30 = vpop.f32.mrf.mxu3 }
  0xbe   : > { %v11250_v31 = vpop.f32.mrf.mxu1  ;;  %1900 = vmatmul.f32.vlgmr.msrb.gmra.mxu0 %v11201_v1  ;;  %v391_v32 = vpop.f32.mrf.mxu2  ;;  %v11292_v1 = vand.u32 4294901760, %v202_v60 }
  0xbf   : > { %v418_v34 = vadd.f32 %v417_v30, %v391_v32  ;;  %2092 = vmatpush.xpose.msrb.mxu0 %v1993_v14  ;;  %v204_v30 = vld [vmem:[%s11130_s4 + $0x90] sm:$0xff]  ;;  %v205_v32 = vld [vmem:[%s11130_s4 + $0x98] sm:$0xff] }
  0xc0   : > { %v2576_v4 = vsub.f32 %v202_v60, %v11292_v1 }
  0xc1   : > { %1924 = vmatmul.f32.vlgmr.msrb.gmra.mxu1 %v11204_v3  ;;  %v11294_v3 = vand.u32 4294901760, %v203_v61 }
  0xc2   : > { %2070 = vmatmul.f32.vlgmr.msra.gmra.mxu3 %v1993_v14  ;;  %2114 = vmatpush.xpose.msrb.mxu1 %v11217_v10 }
  0xc3   : > { %v441_v37 = vpop.f32.mrf.mxu0  ;;  %2046 = vmatmul.f32.vlgmr.msra.gmra.mxu2 %v1992_v12  ;;  %2260 = vmatpush.xpose.msra.mxu3 %v11219_v11  ;;  %v11301_v6 = vsub.f32 %v203_v61, %v11294_v3 }
  0xc4   : > { %v442_v39 = vadd.f32 %v441_v37, %v418_v34  ;;  %2238 = vmatpush.xpose.msra.mxu2 %v11230_v15  ;;  %v11331_v37 = vand.u32 4294901760, %v204_v30 }
  0xc5   : > { %v511_v40 = vpop.f32.mrf.mxu3 }
  0xc6   : > { %v465_v41 = vpop.f32.mrf.mxu1  ;;  %1996 = vmatmul.f32.vlgmr.msra.gmra.mxu0 %v1995_v22  ;;  %v489_v42 = vpop.f32.mrf.mxu2 }
  0xc7   : > { %v466_v44 = vadd.f32 %v465_v41, %v442_v39  ;;  %2189 = vmatpush.xpose.msra.mxu0 %v11225_v13 }
  0xc9   : > { %v490_v46 = vadd.f32 %v489_v42, %v466_v44  ;;  %2022 = vmatmul.f32.vlgmr.msra.gmra.mxu1 %v11217_v10 }
  0xca   : > { %2168 = vmatmul.f32.vlgmr.msrb.gmra.mxu3 %v11219_v11  ;;  %2212 = vmatpush.xpose.msra.mxu1 %v11219_v11 }
  0xcb   : > { %v11272_v48 = vadd.f32 %v511_v40, %v490_v46  ;;  %v537_v49 = vpop.f32.mrf.mxu0  ;;  %2142 = vmatmul.f32.vlgmr.msrb.gmra.mxu2 %v2141_v24  ;;  %2358 = vmatpush.xpose.msrb.mxu3 %v11253_v33  ;;  %v11333_v40 = vand.u32 4294901760, %v205_v32 }
  0xcc   : > { %2335 = vmatpush.xpose.msrb.mxu2 %v2284_v36 }
  0xcd   : > { %v611_v51 = vpop.f32.mrf.mxu3 }
  0xce   : > { %v563_v52 = vpop.f32.mrf.mxu1  ;;  %2094 = vmatmul.f32.vlgmr.msrb.gmra.mxu0 %v11217_v10  ;;  %v587_v53 = vpop.f32.mrf.mxu2 }
  0xcf   : > { %v564_v55 = vadd.f32 %v563_v52, %v537_v49  ;;  %2282 = vmatpush.xpose.msrb.mxu0 %v11253_v33 }
  0xd1   : > { %v588_v57 = vadd.f32 %v587_v53, %v564_v55  ;;  %2116 = vmatmul.f32.vlgmr.msrb.gmra.mxu1 %v11217_v10 }
  0xd2   : > { %2262 = vmatmul.f32.vlgmr.msra.gmra.mxu3 %v11219_v11  ;;  %2312 = vmatpush.xpose.msrb.mxu1 %v2287_v54 }
  0xd3   : > { %v11281_v58 = vadd.f32 %v611_v51, %v588_v57  ;;  %v11283_v59 = vpop.f32.mrf.mxu0  ;;  %2240 = vmatmul.f32.vlgmr.msra.gmra.mxu2 %v11219_v11  ;;  %2458 = vmatpush.xpose.msra.mxu3 %v2433_v56  ;;  %v2577_v11 = vand.u32 4294901760, %v2576_v4 }
  0xd4   : > { %2428 = vmatpush.xpose.msra.mxu2 %v11255_v35 }
  0xd5   : > { %v709_v62 = vpop.f32.mrf.mxu3 }
  0xd6   : > { %v11289_v63 = vpop.f32.mrf.mxu1  ;;  %2192 = vmatmul.f32.vlgmr.msra.gmra.mxu0 %v11225_v13  ;;  %v683_v0 = vpop.f32.mrf.mxu2  ;;  %v11306_v13 = vand.u32 4294901760, %v11301_v6 }
  0xd7   : > { %v710_v2 = vadd.f32 %v709_v62, %v683_v0  ;;  %2384 = vmatpush.xpose.msra.mxu0 %v2285_v43 }
  0xd8   : > { %v2724_v18 = vsub.f32 %v11301_v6, %v11306_v13 }
  0xd9   : > { %2216 = vmatmul.f32.vlgmr.msra.gmra.mxu1 %v11230_v15  ;;  %v2578_v15 = vsub.f32 %v2576_v4, %v2577_v11 }
  0xda   : > { %2362 = vmatmul.f32.vlgmr.msrb.gmra.mxu3 %v2285_v43  ;;  %2406 = vmatpush.xpose.msra.mxu1 %v11253_v33  ;;  %v2725_v24 = vand.u32 4294901760, %v2724_v18 }
  0xdb   : > { %v733_v5 = vpop.f32.mrf.mxu0  ;;  %2338 = vmatmul.f32.vlgmr.msrb.gmra.mxu2 %v2284_v36  ;;  %2552 = vmatpush.xpose.msrb.mxu3 %v11255_v35  ;;  %v2579_v22 = vand.u32 4294901760, %v2578_v15 }
  0xdc   : > { %v734_v7 = vadd.f32 %v733_v5, %v710_v2  ;;  %2530 = vmatpush.xpose.msrb.mxu2 %v11267_v45  ;;  %v206_v5 = vld [vmem:[%s11130_s4 + $0xa0] sm:$0xff] }
  0xdd   : > { %v803_v8 = vpop.f32.mrf.mxu3 }
  0xde   : > { %v757_v9 = vpop.f32.mrf.mxu1  ;;  %2288 = vmatmul.f32.vlgmr.msrb.gmra.mxu0 %v2287_v54  ;;  %v781_v10 = vpop.f32.mrf.mxu2 }
  0xdf   : > { %v758_v12 = vadd.f32 %v757_v9, %v734_v7  ;;  %2481 = vmatpush.xpose.msrb.mxu0 %v11262_v38  ;;  %v207_v7 = vld [vmem:[%s11130_s4 + $0xa8] sm:$0xff] }
  0xe1   : > { %v782_v14 = vadd.f32 %v781_v10, %v758_v12  ;;  %2314 = vmatmul.f32.vlgmr.msrb.gmra.mxu1 %v11253_v33  ;;  %v11370_v10 = vand.u32 4294901760, %v206_v5  ;;  %v11372_v12 = vand.u32 4294901760, %v207_v7 }
  0xe2   : > { %2460 = vmatmul.f32.vlgmr.msra.gmra.mxu3 %v11255_v35  ;;  %2504 = vmatpush.xpose.msrb.mxu1 %v11255_v35 }
  0xe3   : > { %v11311_v16 = vadd.f32 %v803_v8, %v782_v14  ;;  %v829_v17 = vpop.f32.mrf.mxu0  ;;  %2434 = vmatmul.f32.vlgmr.msra.gmra.mxu2 %v2433_v56  ;;  %2650 = vmatpush.xpose.msra.mxu3 %v11292_v1 }
  0xe4   : > { %2627 = vmatpush.xpose.msra.mxu2 %v2576_v4 }
  0xe5   : > { %v903_v19 = vpop.f32.mrf.mxu3 }
  0xe6   : > { %v855_v20 = vpop.f32.mrf.mxu1  ;;  %2386 = vmatmul.f32.vlgmr.msra.gmra.mxu0 %v11253_v33  ;;  %v879_v21 = vpop.f32.mrf.mxu2 }
  0xe7   : > { %v856_v23 = vadd.f32 %v855_v20, %v829_v17  ;;  %2574 = vmatpush.xpose.msra.mxu0 %v11292_v1 }
  0xe9   : > { %v880_v25 = vadd.f32 %v879_v21, %v856_v23  ;;  %2408 = vmatmul.f32.vlgmr.msra.gmra.mxu1 %v11253_v33 }
  0xea   : > { %2554 = vmatmul.f32.vlgmr.msrb.gmra.mxu3 %v11255_v35  ;;  %2604 = vmatpush.xpose.msra.mxu1 %v2579_v22 }
  0xeb   : > { %v11320_v28 = vadd.f32 %v903_v19, %v880_v25  ;;  %v11322_v29 = vpop.f32.mrf.mxu0  ;;  %2532 = vmatmul.f32.vlgmr.msrb.gmra.mxu2 %v11255_v35  ;;  %2750 = vmatpush.xpose.msrb.mxu3 %v2725_v24  ;;  %v2868_v35 = vsub.f32 %v204_v30, %v11331_v37 }
  0xec   : > { %2720 = vmatpush.xpose.msrb.mxu2 %v11294_v3 }
  0xed   : > { %v1001_v34 = vpop.f32.mrf.mxu3 }
  0xee   : > { %v11328_v36 = vpop.f32.mrf.mxu1  ;;  %2484 = vmatmul.f32.vlgmr.msrb.gmra.mxu0 %v11262_v38  ;;  %v975_v33 = vpop.f32.mrf.mxu2  ;;  %v11340_v38 = vsub.f32 %v205_v32, %v11333_v40 }
  0xef   : > { %v1002_v39 = vadd.f32 %v1001_v34, %v975_v33  ;;  %2676 = vmatpush.xpose.msrb.mxu0 %v2577_v11 }
  0xf0   : > { %v11345_v49 = vand.u32 4294901760, %v11340_v38 }
  0xf1   : > { %2508 = vmatmul.f32.vlgmr.msrb.gmra.mxu1 %v11267_v45  ;;  %v2869_v45 = vand.u32 4294901760, %v2868_v35 }
  0xf2   : > { %2654 = vmatmul.f32.vlgmr.msra.gmra.mxu3 %v2577_v11  ;;  %2698 = vmatpush.xpose.msrb.mxu1 %v11292_v1  ;;  %v3016_v54 = vsub.f32 %v11340_v38, %v11345_v49 }
  0xf3   : > { %v1025_v41 = vpop.f32.mrf.mxu0  ;;  %2630 = vmatmul.f32.vlgmr.msra.gmra.mxu2 %v2576_v4  ;;  %2844 = vmatpush.xpose.msra.mxu3 %v11294_v3  ;;  %v2870_v51 = vsub.f32 %v2868_v35, %v2869_v45 }
  0xf4   : > { %v1026_v42 = vadd.f32 %v1025_v41, %v1002_v39  ;;  %2822 = vmatpush.xpose.msra.mxu2 %v11306_v13  ;;  %v3017_v62 = vand.u32 4294901760, %v3016_v54 }
  0xf5   : > { %v1095_v43 = vpop.f32.mrf.mxu3  ;;  %v2871_v60 = vand.u32 4294901760, %v2870_v51 }
  0xf6   : > { %v1049_v44 = vpop.f32.mrf.mxu1  ;;  %2580 = vmatmul.f32.vlgmr.msra.gmra.mxu0 %v2579_v22  ;;  %v1073_v46 = vpop.f32.mrf.mxu2 }
  0xf7   : > { %v1050_v47 = vadd.f32 %v1049_v44, %v1026_v42  ;;  %2773 = vmatpush.xpose.msra.mxu0 %v11301_v6 }
  0xf9   : > { %v1074_v50 = vadd.f32 %v1073_v46, %v1050_v47  ;;  %2606 = vmatmul.f32.vlgmr.msra.gmra.mxu1 %v11292_v1  ;;  %v208_v46 = vld [vmem:[%s11130_s4 + $0xb0] sm:$0xff] }
  0xfa   : > { %2752 = vmatmul.f32.vlgmr.msrb.gmra.mxu3 %v11294_v3  ;;  %2796 = vmatpush.xpose.msra.mxu1 %v11294_v3  ;;  %v11409_v51 = vand.u32 4294901760, %v208_v46 }
  0xfb   : > { %v11350_v52 = vadd.f32 %v1095_v43, %v1074_v50  ;;  %v1121_v53 = vpop.f32.mrf.mxu0  ;;  %2726 = vmatmul.f32.vlgmr.msrb.gmra.mxu2 %v2725_v24  ;;  %2942 = vmatpush.xpose.msrb.mxu3 %v11331_v37 }
  0xfc   : > { %2919 = vmatpush.xpose.msrb.mxu2 %v2868_v35 }
  0xfd   : > { %v1195_v55 = vpop.f32.mrf.mxu3 }
  0xfe   : > { %v1147_v56 = vpop.f32.mrf.mxu1  ;;  %2678 = vmatmul.f32.vlgmr.msrb.gmra.mxu0 %v11292_v1  ;;  %v1171_v57 = vpop.f32.mrf.mxu2 }
  0xff   : > { %v1148_v61 = vadd.f32 %v1147_v56, %v1121_v53  ;;  %2866 = vmatpush.xpose.msrb.mxu0 %v11331_v37 }
 0x101   : > { %v1172_v0 = vadd.f32 %v1171_v57, %v1148_v61  ;;  %2700 = vmatmul.f32.vlgmr.msrb.gmra.mxu1 %v11292_v1 }
 0x102   : > { %2846 = vmatmul.f32.vlgmr.msra.gmra.mxu3 %v11294_v3  ;;  %2896 = vmatpush.xpose.msrb.mxu1 %v2871_v60 }
 0x103   : > { %v11359_v2 = vadd.f32 %v1195_v55, %v1172_v0  ;;  %v11361_v4 = vpop.f32.mrf.mxu0  ;;  %2824 = vmatmul.f32.vlgmr.msra.gmra.mxu2 %v11294_v3  ;;  %3042 = vmatpush.xpose.msra.mxu3 %v3017_v62  ;;  %v3160_v3 = vsub.f32 %v206_v5, %v11370_v10 }
 0x104   : > { %3012 = vmatpush.xpose.msra.mxu2 %v11333_v40 }
 0x105   : > { %v1293_v8 = vpop.f32.mrf.mxu3 }
 0x106   : > { %v11367_v9 = vpop.f32.mrf.mxu1  ;;  %2776 = vmatmul.f32.vlgmr.msra.gmra.mxu0 %v11301_v6  ;;  %v1267_v1 = vpop.f32.mrf.mxu2  ;;  %v11379_v6 = vsub.f32 %v207_v7, %v11372_v12 }
 0x107   : > { %v1294_v11 = vadd.f32 %v1293_v8, %v1267_v1  ;;  %2968 = vmatpush.xpose.msra.mxu0 %v2869_v45 }
 0x108   : > { %v11384_v21 = vand.u32 4294901760, %v11379_v6 }
 0x109   : > { %2800 = vmatmul.f32.vlgmr.msra.gmra.mxu1 %v11306_v13  ;;  %v3161_v13 = vand.u32 4294901760, %v3160_v3 }
 0x10a   : > { %2946 = vmatmul.f32.vlgmr.msrb.gmra.mxu3 %v2869_v45  ;;  %2990 = vmatpush.xpose.msra.mxu1 %v11331_v37  ;;  %v3308_v30 = vsub.f32 %v11379_v6, %v11384_v21  ;;  %v209_v45 = vld [vmem:[%s11130_s4 + $0xb8] sm:$0xff] }
 0x10b   : > { %v1317_v14 = vpop.f32.mrf.mxu0  ;;  %2922 = vmatmul.f32.vlgmr.msrb.gmra.mxu2 %v2868_v35  ;;  %3136 = vmatpush.xpose.msrb.mxu3 %v11333_v40  ;;  %v3162_v23 = vsub.f32 %v3160_v3, %v3161_v13  ;;  %v11411_v54 = vand.u32 4294901760, %v209_v45 }
 0x10c   : > { %v1318_v15 = vadd.f32 %v1317_v14, %v1294_v11  ;;  %3114 = vmatpush.xpose.msrb.mxu2 %v11345_v49  ;;  %v3309_v41 = vand.u32 4294901760, %v3308_v30 }
 0x10d   : > { %v1387_v17 = vpop.f32.mrf.mxu3  ;;  %v3163_v39 = vand.u32 4294901760, %v3162_v23  ;;  %v210_v23 = vld [vmem:[%s11130_s4 + $0xc0] sm:$0xff] }
 0x10e   : > { %v1341_v18 = vpop.f32.mrf.mxu1  ;;  %2872 = vmatmul.f32.vlgmr.msrb.gmra.mxu0 %v2871_v60  ;;  %v1365_v19 = vpop.f32.mrf.mxu2 }
 0x10f   : > { %v1342_v20 = vadd.f32 %v1341_v18, %v1318_v15  ;;  %3065 = vmatpush.xpose.msrb.mxu0 %v11340_v38 }
 0x111   : > { %v1366_v22 = vadd.f32 %v1365_v19, %v1342_v20  ;;  %2898 = vmatmul.f32.vlgmr.msrb.gmra.mxu1 %v11331_v37 }
 0x112   : > { %3044 = vmatmul.f32.vlgmr.msra.gmra.mxu3 %v11333_v40  ;;  %3088 = vmatpush.xpose.msrb.mxu1 %v11333_v40 }
 0x113   : > { %v11389_v24 = vadd.f32 %v1387_v17, %v1366_v22  ;;  %v1413_v25 = vpop.f32.mrf.mxu0  ;;  %3018 = vmatmul.f32.vlgmr.msra.gmra.mxu2 %v3017_v62  ;;  %3234 = vmatpush.xpose.msra.mxu3 %v11370_v10 }
 0x114   : > { %3211 = vmatpush.xpose.msra.mxu2 %v3160_v3 }
 0x115   : > { %v1487_v32 = vpop.f32.mrf.mxu3 }
 0x116   : > { %v1439_v34 = vpop.f32.mrf.mxu1  ;;  %2970 = vmatmul.f32.vlgmr.msra.gmra.mxu0 %v11331_v37  ;;  %v1463_v33 = vpop.f32.mrf.mxu2 }
 0x117   : > { %v1440_v35 = vadd.f32 %v1439_v34, %v1413_v25  ;;  %3158 = vmatpush.xpose.msra.mxu0 %v11370_v10  ;;  %v211_v25 = vld [vmem:[%s11130_s4 + $0xc8] sm:$0xff]  ;;  %v11448_v34 = vand.u32 4294901760, %v210_v23 }
 0x119   : > { %v1464_v42 = vadd.f32 %v1463_v33, %v1440_v35  ;;  %2992 = vmatmul.f32.vlgmr.msra.gmra.mxu1 %v11331_v37 }
 0x11a   : > { %3138 = vmatmul.f32.vlgmr.msrb.gmra.mxu3 %v11333_v40  ;;  %3188 = vmatpush.xpose.msra.mxu1 %v3163_v39 }
 0x11b   : > { %v11398_v43 = vadd.f32 %v1487_v32, %v1464_v42  ;;  %v11400_v44 = vpop.f32.mrf.mxu0  ;;  %3116 = vmatmul.f32.vlgmr.msrb.gmra.mxu2 %v11333_v40  ;;  %3334 = vmatpush.xpose.msrb.mxu3 %v3309_v41  ;;  %v3452_v40 = vsub.f32 %v208_v46, %v11409_v51 }
 0x11c   : > { %3304 = vmatpush.xpose.msrb.mxu2 %v11372_v12 }
 0x11d   : > { %v1585_v47 = vpop.f32.mrf.mxu3 }
 0x11e   : > { %v11406_v50 = vpop.f32.mrf.mxu1  ;;  %3068 = vmatmul.f32.vlgmr.msrb.gmra.mxu0 %v11340_v38  ;;  %v1559_v37 = vpop.f32.mrf.mxu2  ;;  %v11418_v38 = vsub.f32 %v209_v45, %v11411_v54 }
 0x11f   : > { %v1586_v53 = vadd.f32 %v1585_v47, %v1559_v37  ;;  %3260 = vmatpush.xpose.msrb.mxu0 %v3161_v13 }
 0x120   : > { %v11423_v0 = vand.u32 4294901760, %v11418_v38 }
 0x121   : > { %3092 = vmatmul.f32.vlgmr.msrb.gmra.mxu1 %v11345_v49  ;;  %v3453_v49 = vand.u32 4294901760, %v3452_v40 }
 0x122   : > { %3238 = vmatmul.f32.vlgmr.msra.gmra.mxu3 %v3161_v13  ;;  %3282 = vmatpush.xpose.msrb.mxu1 %v11370_v10  ;;  %v3600_v11 = vsub.f32 %v11418_v38, %v11423_v0 }
 0x123   : > { %v1609_v55 = vpop.f32.mrf.mxu0  ;;  %3214 = vmatmul.f32.vlgmr.msra.gmra.mxu2 %v3160_v3  ;;  %3428 = vmatpush.xpose.msra.mxu3 %v11372_v12  ;;  %v3454_v7 = vsub.f32 %v3452_v40, %v3453_v49 }
 0x124   : > { %v1610_v56 = vadd.f32 %v1609_v55, %v1586_v53  ;;  %3406 = vmatpush.xpose.msra.mxu2 %v11384_v21  ;;  %v3601_v19 = vand.u32 4294901760, %v3600_v11 }
 0x125   : > { %v1679_v57 = vpop.f32.mrf.mxu3  ;;  %v3455_v17 = vand.u32 4294901760, %v3454_v7 }
 0x126   : > { %v1633_v60 = vpop.f32.mrf.mxu1  ;;  %3164 = vmatmul.f32.vlgmr.msra.gmra.mxu0 %v3163_v39  ;;  %v1657_v61 = vpop.f32.mrf.mxu2  ;;  %v11450_v39 = vand.u32 4294901760, %v211_v25 }
 0x127   : > { %v1634_v62 = vadd.f32 %v1633_v60, %v1610_v56  ;;  %3357 = vmatpush.xpose.msra.mxu0 %v11379_v6 }
 0x129   : > { %v1658_v5 = vadd.f32 %v1657_v61, %v1634_v62  ;;  %3190 = vmatmul.f32.vlgmr.msra.gmra.mxu1 %v11370_v10 }
 0x12a   : > { %3336 = vmatmul.f32.vlgmr.msrb.gmra.mxu3 %v11372_v12  ;;  %3380 = vmatpush.xpose.msra.mxu1 %v11372_v12 }
 0x12b   : > { %v11428_v8 = vadd.f32 %v1679_v57, %v1658_v5  ;;  %v1705_v1 = vpop.f32.mrf.mxu0  ;;  %3310 = vmatmul.f32.vlgmr.msrb.gmra.mxu2 %v3309_v41  ;;  %3526 = vmatpush.xpose.msrb.mxu3 %v11409_v51 }
 0x12c   : > { %3503 = vmatpush.xpose.msrb.mxu2 %v3452_v40 }
 0x12d   : > { %v1779_v3 = vpop.f32.mrf.mxu3 }
 0x12e   : > { %v1731_v14 = vpop.f32.mrf.mxu1  ;;  %3262 = vmatmul.f32.vlgmr.msrb.gmra.mxu0 %v11370_v10  ;;  %v1755_v15 = vpop.f32.mrf.mxu2 }
 0x12f   : > { %v1732_v18 = vadd.f32 %v1731_v14, %v1705_v1  ;;  %3450 = vmatpush.xpose.msrb.mxu0 %v11409_v51  ;;  %v212_v14 = vld [vmem:[%s11130_s4 + $0xd0] sm:$0xff] }
 0x131   : > { %v1756_v13 = vadd.f32 %v1755_v15, %v1732_v18  ;;  %3284 = vmatmul.f32.vlgmr.msrb.gmra.mxu1 %v11370_v10  ;;  %v213_v15 = vld [vmem:[%s11130_s4 + $0xd8] sm:$0xff] }
 0x132   : > { %3430 = vmatmul.f32.vlgmr.msra.gmra.mxu3 %v11372_v12  ;;  %3480 = vmatpush.xpose.msrb.mxu1 %v3455_v17 }
 0x133   : > { %v11437_v20 = vadd.f32 %v1779_v3, %v1756_v13  ;;  %v11439_v22 = vpop.f32.mrf.mxu0  ;;  %3408 = vmatmul.f32.vlgmr.msra.gmra.mxu2 %v11372_v12  ;;  %3626 = vmatpush.xpose.msra.mxu3 %v3601_v19  ;;  %v3744_v12 = vsub.f32 %v210_v23, %v11448_v34  ;;  %v11489_v23 = vand.u32 4294901760, %v213_v15 }
 0x134   : > { %3596 = vmatpush.xpose.msra.mxu2 %v11411_v54 }
 0x135   : > { %v1877_v30 = vpop.f32.mrf.mxu3 }
 0x136   : > { %v11445_v32 = vpop.f32.mrf.mxu1  ;;  %3360 = vmatmul.f32.vlgmr.msra.gmra.mxu0 %v11379_v6  ;;  %v1851_v10 = vpop.f32.mrf.mxu2  ;;  %v11457_v6 = vsub.f32 %v211_v25, %v11450_v39 }
 0x137   : > { %v1878_v33 = vadd.f32 %v1877_v30, %v1851_v10  ;;  %3552 = vmatpush.xpose.msra.mxu0 %v3453_v49 }
 0x138   : > { %v11462_v37 = vand.u32 4294901760, %v11457_v6 }
 0x139   : > { %3384 = vmatmul.f32.vlgmr.msra.gmra.mxu1 %v11384_v21  ;;  %v3745_v21 = vand.u32 4294901760, %v3744_v12 }
 0x13a   : > { %3530 = vmatmul.f32.vlgmr.msrb.gmra.mxu3 %v3453_v49  ;;  %3574 = vmatpush.xpose.msra.mxu1 %v11409_v51  ;;  %v3892_v57 = vsub.f32 %v11457_v6, %v11462_v37 }
 0x13b   : > { %v1901_v35 = vpop.f32.mrf.mxu0  ;;  %3506 = vmatmul.f32.vlgmr.msrb.gmra.mxu2 %v3452_v40  ;;  %3720 = vmatpush.xpose.msrb.mxu3 %v11411_v54  ;;  %v3746_v40 = vsub.f32 %v3744_v12, %v3745_v21 }
 0x13c   : > { %v1902_v41 = vadd.f32 %v1901_v35, %v1878_v33  ;;  %3698 = vmatpush.xpose.msrb.mxu2 %v11423_v0  ;;  %v3893_v7 = vand.u32 4294901760, %v3892_v57 }
 0x13d   : > { %v1971_v42 = vpop.f32.mrf.mxu3  ;;  %v3747_v62 = vand.u32 4294901760, %v3746_v40 }
 0x13e   : > { %v1925_v46 = vpop.f32.mrf.mxu1  ;;  %3456 = vmatmul.f32.vlgmr.msrb.gmra.mxu0 %v3455_v17  ;;  %v1949_v45 = vpop.f32.mrf.mxu2 }
 0x13f   : > { %v1926_v47 = vadd.f32 %v1925_v46, %v1902_v41  ;;  %3649 = vmatpush.xpose.msrb.mxu0 %v11418_v38 }
 0x141   : > { %v1950_v53 = vadd.f32 %v1949_v45, %v1926_v47  ;;  %3482 = vmatmul.f32.vlgmr.msrb.gmra.mxu1 %v11409_v51 }
 0x142   : > { %3628 = vmatmul.f32.vlgmr.msra.gmra.mxu3 %v11411_v54  ;;  %3672 = vmatpush.xpose.msrb.mxu1 %v11411_v54 }
 0x143   : > { %v11467_v55 = vadd.f32 %v1971_v42, %v1950_v53  ;;  %v1997_v56 = vpop.f32.mrf.mxu0  ;;  %3602 = vmatmul.f32.vlgmr.msra.gmra.mxu2 %v3601_v19  ;;  %3818 = vmatpush.xpose.msra.mxu3 %v11448_v34  ;;  %v11487_v19 = vand.u32 4294901760, %v212_v14 }
 0x144   : > { %3795 = vmatpush.xpose.msra.mxu2 %v3744_v12 }
 0x145   : > { %v2071_v60 = vpop.f32.mrf.mxu3 }
 0x146   : > { %v2023_v61 = vpop.f32.mrf.mxu1  ;;  %3554 = vmatmul.f32.vlgmr.msra.gmra.mxu0 %v11409_v51  ;;  %v2047_v49 = vpop.f32.mrf.mxu2 }
 0x147   : > { %v2024_v5 = vadd.f32 %v2023_v61, %v1997_v56  ;;  %3742 = vmatpush.xpose.msra.mxu0 %v11448_v34 }
 0x149   : > { %v2048_v1 = vadd.f32 %v2047_v49, %v2024_v5  ;;  %3576 = vmatmul.f32.vlgmr.msra.gmra.mxu1 %v11409_v51 }
 0x14a   : > { %3722 = vmatmul.f32.vlgmr.msrb.gmra.mxu3 %v11411_v54  ;;  %3772 = vmatpush.xpose.msra.mxu1 %v3747_v62 }
 0x14b   : > { %v11476_v11 = vadd.f32 %v2071_v60, %v2048_v1  ;;  %v11478_v3 = vpop.f32.mrf.mxu0  ;;  %3700 = vmatmul.f32.vlgmr.msrb.gmra.mxu2 %v11411_v54  ;;  %3918 = vmatpush.xpose.msrb.mxu3 %v3893_v7  ;;  %v4036_v54 = vsub.f32 %v212_v14, %v11487_v19  ;;  %v215_v1 = vld [vmem:[%s11130_s4 + $0xe8] sm:$0xff] }
 0x14c   : > { %3888 = vmatpush.xpose.msrb.mxu2 %v11450_v39 }
 0x14d   : > { %v2169_v17 = vpop.f32.mrf.mxu3 }
 0x14e   : > { %v11484_v18 = vpop.f32.mrf.mxu1  ;;  %3652 = vmatmul.f32.vlgmr.msrb.gmra.mxu0 %v11418_v38  ;;  %v2143_v51 = vpop.f32.mrf.mxu2  ;;  %v11496_v38 = vsub.f32 %v213_v15, %v11489_v23 }
 0x14f   : > { %v2170_v13 = vadd.f32 %v2169_v17, %v2143_v51  ;;  %3844 = vmatpush.xpose.msrb.mxu0 %v3745_v21 }
 0x150   : > { %v11501_v42 = vand.u32 4294901760, %v11496_v38 }
 0x151   : > { %3676 = vmatmul.f32.vlgmr.msrb.gmra.mxu1 %v11423_v0  ;;  %v4037_v0 = vand.u32 4294901760, %v4036_v54 }
 0x152   : > { %3822 = vmatmul.f32.vlgmr.msra.gmra.mxu3 %v3745_v21  ;;  %3866 = vmatpush.xpose.msrb.mxu1 %v11448_v34  ;;  %v4184_v47 = vsub.f32 %v11496_v38, %v11501_v42 }
 0x153   : > { %v2193_v25 = vpop.f32.mrf.mxu0  ;;  %3798 = vmatmul.f32.vlgmr.msra.gmra.mxu2 %v3744_v12  ;;  %4012 = vmatpush.xpose.msra.mxu3 %v11450_v39  ;;  %v4038_v46 = vsub.f32 %v4036_v54, %v4037_v0 }
 0x154   : > { %v2194_v30 = vadd.f32 %v2193_v25, %v2170_v13  ;;  %3990 = vmatpush.xpose.msra.mxu2 %v11462_v37  ;;  %v4185_v61 = vand.u32 4294901760, %v4184_v47  ;;  %v11528_v13 = vand.u32 4294901760, %v215_v1 }
 0x155   : > { %v2263_v10 = vpop.f32.mrf.mxu3  ;;  %v4039_v57 = vand.u32 4294901760, %v4038_v46 }
 0x156   : > { %v2217_v33 = vpop.f32.mrf.mxu1  ;;  %3748 = vmatmul.f32.vlgmr.msra.gmra.mxu0 %v3747_v62  ;;  %v2241_v35 = vpop.f32.mrf.mxu2 }
 0x157   : > { %v2218_v41 = vadd.f32 %v2217_v33, %v2194_v30  ;;  %3941 = vmatpush.xpose.msra.mxu0 %v11457_v6 }
 0x159   : > { %v2242_v12 = vadd.f32 %v2241_v35, %v2218_v41  ;;  %3774 = vmatmul.f32.vlgmr.msra.gmra.mxu1 %v11448_v34 }
 0x15a   : > { %3920 = vmatmul.f32.vlgmr.msrb.gmra.mxu3 %v11450_v39  ;;  %3964 = vmatpush.xpose.msra.mxu1 %v11450_v39 }
 0x15b   : > { %v11506_v45 = vadd.f32 %v2263_v10, %v2242_v12  ;;  %v2289_v21 = vpop.f32.mrf.mxu0  ;;  %3894 = vmatmul.f32.vlgmr.msrb.gmra.mxu2 %v3893_v7  ;;  %4110 = vmatpush.xpose.msrb.mxu3 %v11487_v19  ;;  %v214_v7 = vld [vmem:[%s11130_s4 + $0xe0] sm:$0xff] }
 0x15c   : > { %4087 = vmatpush.xpose.msrb.mxu2 %v4036_v54  ;;  %v11526_v17 = vand.u32 4294901760, %v214_v7 }
 0x15d   : > { %v2363_v53 = vpop.f32.mrf.mxu3 }
 0x15e   : > { %v2315_v40 = vpop.f32.mrf.mxu1  ;;  %3846 = vmatmul.f32.vlgmr.msrb.gmra.mxu0 %v11448_v34  ;;  %v2339_v56 = vpop.f32.mrf.mxu2 }
 0x15f   : > { %v2316_v60 = vadd.f32 %v2315_v40, %v2289_v21  ;;  %4034 = vmatpush.xpose.msrb.mxu0 %v11487_v19 }
 0x161   : > { %v2340_v49 = vadd.f32 %v2339_v56, %v2316_v60  ;;  %3868 = vmatmul.f32.vlgmr.msrb.gmra.mxu1 %v11448_v34 }
 0x162   : > { %4014 = vmatmul.f32.vlgmr.msra.gmra.mxu3 %v11450_v39  ;;  %4064 = vmatpush.xpose.msrb.mxu1 %v4039_v57 }
 0x163   : > { %v11515_v62 = vadd.f32 %v2363_v53, %v2340_v49  ;;  %v11517_v5 = vpop.f32.mrf.mxu0  ;;  %3992 = vmatmul.f32.vlgmr.msra.gmra.mxu2 %v11450_v39  ;;  %4210 = vmatpush.xpose.msra.mxu3 %v4185_v61  ;;  %v4328_v39 = vsub.f32 %v214_v7, %v11526_v17 }
 0x164   : > { %4180 = vmatpush.xpose.msra.mxu2 %v11489_v23 }
 0x165   : > { %v2461_v14 = vpop.f32.mrf.mxu3 }
 0x166   : > { %v11523_v15 = vpop.f32.mrf.mxu1  ;;  %3944 = vmatmul.f32.vlgmr.msra.gmra.mxu0 %v11457_v6  ;;  %v2435_v34 = vpop.f32.mrf.mxu2  ;;  %v11535_v6 = vsub.f32 %v215_v1, %v11528_v13 }
 0x167   : > { %v2462_v51 = vadd.f32 %v2461_v14, %v2435_v34  ;;  %4136 = vmatpush.xpose.msra.mxu0 %v4037_v0  ;;  %v216_v14 = vld [vmem:[%s11130_s4 + $0xf0] sm:$0xff]  ;;  %v217_v34 = vld [vmem:[%s11130_s4 + $0xf8] sm:$0xff] }
 0x168   : > { %v11540_v41 = vand.u32 4294901760, %v11535_v6 }
 0x169   : > { %3968 = vmatmul.f32.vlgmr.msra.gmra.mxu1 %v11462_v37  ;;  %v4329_v37 = vand.u32 4294901760, %v4328_v39 }
 0x16a   : > { %4114 = vmatmul.f32.vlgmr.msrb.gmra.mxu3 %v4037_v0  ;;  %4158 = vmatpush.xpose.msra.mxu1 %v11487_v19  ;;  %v4476_v47 = vsub.f32 %v11535_v6, %v11540_v41 }
 0x16b   : > { %v2485_v25 = vpop.f32.mrf.mxu0  ;;  %4090 = vmatmul.f32.vlgmr.msrb.gmra.mxu2 %v4036_v54  ;;  %4304 = vmatpush.xpose.msrb.mxu3 %v11489_v23  ;;  %v4330_v12 = vsub.f32 %v4328_v39, %v4329_v37 }
 0x16c   : > { %v2486_v30 = vadd.f32 %v2485_v25, %v2462_v51  ;;  %4282 = vmatpush.xpose.msrb.mxu2 %v11501_v42  ;;  %v4477_v49 = vand.u32 4294901760, %v4476_v47 }
 0x16d   : > { %v2555_v10 = vpop.f32.mrf.mxu3 }
 0x16e   : > { %v2509_v33 = vpop.f32.mrf.mxu1  ;;  %4040 = vmatmul.f32.vlgmr.msrb.gmra.mxu0 %v4039_v57  ;;  %v2533_v35 = vpop.f32.mrf.mxu2  ;;  %v4331_v57 = vand.u32 4294901760, %v4330_v12 }
 0x16f   : > { %v2510_v0 = vadd.f32 %v2509_v33, %v2486_v30  ;;  %4233 = vmatpush.xpose.msrb.mxu0 %v11496_v38  ;;  %v11565_v30 = vand.u32 4294901760, %v216_v14  ;;  %v11567_v33 = vand.u32 4294901760, %v217_v34 }
 0x171   : > { %v2534_v54 = vadd.f32 %v2533_v35, %v2510_v0  ;;  %4066 = vmatmul.f32.vlgmr.msrb.gmra.mxu1 %v11487_v19 }
 0x172   : > { %4212 = vmatmul.f32.vlgmr.msra.gmra.mxu3 %v11489_v23  ;;  %4256 = vmatpush.xpose.msrb.mxu1 %v11489_v23 }
 0x173   : > { %v11545_v46 = vadd.f32 %v2555_v10, %v2534_v54  ;;  %v2581_v21 = vpop.f32.mrf.mxu0  ;;  %4186 = vmatmul.f32.vlgmr.msra.gmra.mxu2 %v4185_v61  ;;  %4402 = vmatpush.xpose.msra.mxu3 %v11526_v17 }
 0x174   : > { %4379 = vmatpush.xpose.msra.mxu2 %v4328_v39 }
 0x175   : > { %v2655_v53 = vpop.f32.mrf.mxu3 }
 0x176   : > { %v2607_v40 = vpop.f32.mrf.mxu1  ;;  %4138 = vmatmul.f32.vlgmr.msra.gmra.mxu0 %v11487_v19  ;;  %v2631_v56 = vpop.f32.mrf.mxu2 }
 0x177   : > { %v2608_v60 = vadd.f32 %v2607_v40, %v2581_v21  ;;  %4326 = vmatpush.xpose.msra.mxu0 %v11526_v17 }
 0x179   : > { %v2632_v7 = vadd.f32 %v2631_v56, %v2608_v60  ;;  %4160 = vmatmul.f32.vlgmr.msra.gmra.mxu1 %v11487_v19 }
 0x17a   : > { %4306 = vmatmul.f32.vlgmr.msrb.gmra.mxu3 %v11489_v23  ;;  %4356 = vmatpush.xpose.msra.mxu1 %v4331_v57 }
 0x17b   : > { %v11554_v61 = vadd.f32 %v2655_v53, %v2632_v7  ;;  %v11556_v1 = vpop.f32.mrf.mxu0  ;;  %4284 = vmatmul.f32.vlgmr.msrb.gmra.mxu2 %v11489_v23  ;;  %4502 = vmatpush.xpose.msrb.mxu3 %v4477_v49  ;;  %v4620_v23 = vsub.f32 %v216_v14, %v11565_v30 }
 0x17c   : > { %4472 = vmatpush.xpose.msrb.mxu2 %v11528_v13 }
 0x17d   : > { %v2753_v51 = vpop.f32.mrf.mxu3 }
 0x17e   : > { %v11562_v25 = vpop.f32.mrf.mxu1  ;;  %4236 = vmatmul.f32.vlgmr.msrb.gmra.mxu0 %v11496_v38  ;;  %v2727_v19 = vpop.f32.mrf.mxu2  ;;  %v11574_v38 = vsub.f32 %v217_v34, %v11567_v33 }
 0x17f   : > { %v2754_v10 = vadd.f32 %v2753_v51, %v2727_v19  ;;  %4428 = vmatpush.xpose.msrb.mxu0 %v4329_v37 }
 0x180   : > { %v11579_v47 = vand.u32 4294901760, %v11574_v38 }
 0x181   : > { %4260 = vmatmul.f32.vlgmr.msrb.gmra.mxu1 %v11501_v42  ;;  %v4621_v42 = vand.u32 4294901760, %v4620_v23 }
 0x182   : > { %4406 = vmatmul.f32.vlgmr.msra.gmra.mxu3 %v4329_v37  ;;  %4450 = vmatpush.xpose.msrb.mxu1 %v11526_v17 }
 0x183   : > { %v2777_v35 = vpop.f32.mrf.mxu0  ;;  %4382 = vmatmul.f32.vlgmr.msra.gmra.mxu2 %v4328_v39  ;;  %4596 = vmatpush.xpose.msra.mxu3 %v11528_v13  ;;  %v4622_v53 = vsub.f32 %v4620_v23, %v4621_v42 }
 0x184   : > { %v2778_v0 = vadd.f32 %v2777_v35, %v2754_v10  ;;  %4574 = vmatpush.xpose.msra.mxu2 %v11540_v41  ;;  %v344_v10 = vadd.f32 %v11244_v27, %v11242_v26 }
 0x185   : > { %v2847_v54 = vpop.f32.mrf.mxu3  ;;  %v4623_v34 = vand.u32 4294901760, %v4622_v53 }
 0x186   : > { %v2801_v12 = vpop.f32.mrf.mxu1  ;;  %4332 = vmatmul.f32.vlgmr.msra.gmra.mxu0 %v4331_v57  ;;  %v2825_v21 = vpop.f32.mrf.mxu2  ;;  %v4768_v57 = vsub.f32 %v11574_v38, %v11579_v47 }
 0x187   : > { %v2802_v37 = vadd.f32 %v2801_v12, %v2778_v0  ;;  %4525 = vmatpush.xpose.msra.mxu0 %v11535_v6 }
 0x188   : > { %v4769_v19 = vand.u32 4294901760, %v4768_v57 }
 0x189   : > { %v2826_v39 = vadd.f32 %v2825_v21, %v2802_v37  ;;  %4358 = vmatmul.f32.vlgmr.msra.gmra.mxu1 %v11526_v17  ;;  %v11608_v37 = vand.u32 4294901760, %v11272_v48 }
 0x18a   : > { %4504 = vmatmul.f32.vlgmr.msrb.gmra.mxu3 %v11528_v13  ;;  %4548 = vmatpush.xpose.msra.mxu1 %v11528_v13 }
 0x18b   : > { %v11584_v40 = vadd.f32 %v2847_v54, %v2826_v39  ;;  %v2873_v56 = vpop.f32.mrf.mxu0  ;;  %4478 = vmatmul.f32.vlgmr.msrb.gmra.mxu2 %v4477_v49  ;;  %4694 = vmatpush.xpose.msrb.mxu3 %v11565_v30  ;;  %v366_v54 = vadd.f32 %v11250_v31, %v344_v10  ;;  %v11615_v39 = vld [vmem:[#allocation2] sm:$0xff]  ;;  %v11619_v53 = vsub.f32 %v11272_v48, %v11608_v37 }
 0x18c   : > { %4671 = vmatpush.xpose.msrb.mxu2 %v4620_v23 }
 0x18d   : > { %v2947_v60 = vpop.f32.mrf.mxu3 }
 0x18e   : > { %v2899_v7 = vpop.f32.mrf.mxu1  ;;  %4430 = vmatmul.f32.vlgmr.msrb.gmra.mxu0 %v11526_v17  ;;  %v2923_v14 = vpop.f32.mrf.mxu2 }
 0x18f   : > { %v2900_v51 = vadd.f32 %v2899_v7, %v2873_v56  ;;  %4618 = vmatpush.xpose.msrb.mxu0 %v11565_v30  ;;  %v5090_v7 = vand.u32 4294901760, %v11619_v53 }
 0x191   : > { %v2924_v49 = vadd.f32 %v2923_v14, %v2900_v51  ;;  %4452 = vmatmul.f32.vlgmr.msrb.gmra.mxu1 %v11526_v17  ;;  %v11605_v17 = vand.u32 4294901760, %v366_v54  ;;  %v11626_v51 = vld [vmem:[#allocation2 + $0x8] sm:$0xff] }
 0x192   : > { %4598 = vmatmul.f32.vlgmr.msra.gmra.mxu3 %v11528_v13  ;;  %4648 = vmatpush.xpose.msrb.mxu1 %v4623_v34 }
 0x193   : > { %v11595_v35 = vadd.f32 %v2947_v60, %v2924_v49  ;;  %v11597_v0 = vpop.f32.mrf.mxu0  ;;  %4576 = vmatmul.f32.vlgmr.msra.gmra.mxu2 %v11528_v13  ;;  %4794 = vmatpush.xpose.msra.mxu3 %v4769_v19  ;;  %v4940_v13 = vsub.f32 %v366_v54, %v11605_v17  ;;  %v5045_v54 = vsel %vm13134_vm0, %v11626_v51, 0 }
 0x194   : > { %13146 = vst [vmem:[#allocation8_spill] sm:$0xff] %v11597_v0  ;;  %4764 = vmatpush.xpose.msra.mxu2 %v11567_v33 }
 0x195   : > { %v3045_v12 = vpop.f32.mrf.mxu3  ;;  %v4941_v60 = vand.u32 4294901760, %v4940_v13 }
 0x196   : > { %v11602_v21 = vpop.f32.mrf.mxu1  ;;  %4528 = vmatmul.f32.vlgmr.msra.gmra.mxu0 %v11535_v6  ;;  %v3019_v26 = vpop.f32.mrf.mxu2 }
 0x197   : > { %13147 = vst [vmem:[#allocation9_spill] sm:$0xff] %v11602_v21  ;;  %v3046_v27 = vadd.f32 %v3045_v12, %v3019_v26  ;;  %4720 = vmatpush.xpose.msra.mxu0 %v4621_v42  ;;  %v4942_v49 = vsub.f32 %v4940_v13, %v4941_v60  ;;  %v5091_v26 = vsub.f32 %v11619_v53, %v5090_v7 }
 0x199   : > { %4552 = vmatmul.f32.vlgmr.msra.gmra.mxu1 %v11540_v41 }
 0x19a   : > { %4698 = vmatmul.f32.vlgmr.msrb.gmra.mxu3 %v4621_v42  ;;  %4742 = vmatpush.xpose.msra.mxu1 %v11565_v30 }
 0x19b   : > { %v3069_v31 = vpop.f32.mrf.mxu0  ;;  %4674 = vmatmul.f32.vlgmr.msrb.gmra.mxu2 %v4620_v23  ;;  %4888 = vmatpush.xpose.msrb.mxu3 %v11567_v33  ;;  %v4896_v23 = vsel %vm13134_vm0, %v11615_v39, 0 }
 0x19c   : > { %v3070_v6 = vadd.f32 %v3069_v31, %v3046_v27  ;;  %4866 = vmatpush.xpose.msrb.mxu2 %v11579_v47  ;;  %v11630_v48 = vand.u32 4294901760, %v4896_v23 }
 0x19d   : > { %v3139_v41 = vpop.f32.mrf.mxu3 }
 0x19e   : > { %v3093_v42 = vpop.f32.mrf.mxu1  ;;  %4624 = vmatmul.f32.vlgmr.msrb.gmra.mxu0 %v4623_v34  ;;  %v3117_v56 = vpop.f32.mrf.mxu2 }
 0x19f   : > { %v3094_v57 = vadd.f32 %v3093_v42, %v3070_v6  ;;  %4817 = vmatpush.xpose.msrb.mxu0 %v11574_v38  ;;  %v11640_v6 = vsub.f32 %v4896_v23, %v11630_v48  ;;  %v11643_v42 = vand.u32 4294901760, %v5045_v54 }
 0x1a1   : > { %v3118_v14 = vadd.f32 %v3117_v56, %v3094_v57  ;;  %4650 = vmatmul.f32.vlgmr.msrb.gmra.mxu1 %v11565_v30  ;;  %v5092_v57 = vand.u32 4294901760, %v5091_v26 }
 0x1a2   : > { %4796 = vmatmul.f32.vlgmr.msra.gmra.mxu3 %v11567_v33  ;;  %4840 = vmatpush.xpose.msrb.mxu1 %v11567_v33 }
 0x1a3   : > { %v11632_v34 = vadd.f32 %v3139_v41, %v3118_v14  ;;  %4990 = vmatpush.msra.mxu3 %v11605_v17  ;;  %v3165_v10 = vpop.f32.mrf.mxu0  ;;  %4770 = vmatmul.f32.vlgmr.msra.gmra.mxu2 %v4769_v19  ;;  %v636_v19 = vadd.f32 %v11283_v59, %v11281_v58  ;;  %v11650_v14 = vand.u32 4294901760, %v11640_v6  ;;  %v11658_v58 = vsub.f32 %v5045_v54, %v11643_v42 }
 0x1a4   : > { %4967 = vmatpush.msra.mxu2 %v4940_v13  ;;  %v4943_v13 = vand.u32 4294901760, %v4942_v49 }
 0x1a5   : > { %13148 = vst [vmem:[#allocation10_spill] sm:$0xff] %v11632_v34  ;;  %v3239_v12 = vpop.f32.mrf.mxu3  ;;  %v658_v59 = vadd.f32 %v11289_v63, %v636_v19  ;;  %v11673_v63 = vand.u32 4294901760, %v11311_v16 }
 0x1a6   : > { %v3191_v27 = vpop.f32.mrf.mxu1  ;;  %4722 = vmatmul.f32.vlgmr.msra.gmra.mxu0 %v11565_v30  ;;  %v3215_v31 = vpop.f32.mrf.mxu2 }
 0x1a7   : > { %v3192_v41 = vadd.f32 %v3191_v27, %v3165_v10  ;;  %4914 = vmatpush.msra.mxu0 %v11605_v17  ;;  %v11670_v54 = vand.u32 4294901760, %v658_v59 }
 0x1a9   : > { %v3216_v56 = vadd.f32 %v3215_v31, %v3192_v41  ;;  %4744 = vmatmul.f32.vlgmr.msra.gmra.mxu1 %v11565_v30  ;;  %v5238_v41 = vsub.f32 %v658_v59, %v11670_v54 }
 0x1aa   : > { %4944 = vmatpush.msra.mxu1 %v4943_v13  ;;  %4890 = vmatmul.f32.vlgmr.msrb.gmra.mxu3 %v11567_v33  ;;  %v11685_v13 = vld [vmem:[#allocation2 + $0x10] sm:$0xff] }
 0x1ab   : > { %v11652_v23 = vadd.f32 %v3239_v12, %v3216_v56  ;;  %5093 = vmatpush.msrb.mxu3 %v5092_v57  ;;  %v11654_v10 = vpop.f32.mrf.mxu0  ;;  %4868 = vmatmul.f32.vlgmr.msrb.gmra.mxu2 %v11567_v33  ;;  %v4918_v12 = vsub.f32 %v11640_v6, %v11650_v14  ;;  %v11668_v33 = vand.u32 4294901760, %v11658_v58  ;;  %v5194_v59 = vsel %vm13134_vm0, %v11685_v13, 0 }
 0x1ac   : > { %13150 = vst [vmem:[#allocation12_spill] sm:$0xff] %v11654_v10  ;;  %5063 = vmatpush.msrb.mxu2 %v11608_v37 }
 0x1ad   : > { %13149 = vst [vmem:[#allocation11_spill] sm:$0xff] %v11652_v23  ;;  %v3337_v30 = vpop.f32.mrf.mxu3  ;;  %v5067_v31 = vsub.f32 %v11658_v58, %v11668_v33 }
 0x1ae   : > { %v11662_v49 = vpop.f32.mrf.mxu1  ;;  %4820 = vmatmul.f32.vlgmr.msrb.gmra.mxu0 %v11574_v38  ;;  %v3311_v26 = vpop.f32.mrf.mxu2  ;;  %v11678_v38 = vand.u32 4294901760, %v4918_v12 }
 0x1af   : > { %13151 = vst [vmem:[#allocation13_spill] sm:$0xff] %v11662_v49  ;;  %5016 = vmatpush.msrb.mxu0 %v4941_v60  ;;  %v3338_v27 = vadd.f32 %v3337_v30, %v3311_v26  ;;  %v11693_v26 = vand.u32 4294901760, %v5067_v31 }
 0x1b1   : > { %4844 = vmatmul.f32.vlgmr.msrb.gmra.mxu1 %v11579_v47  ;;  %v11689_v47 = vsub.f32 %v11311_v16, %v11673_v63  ;;  %v11699_v16 = vld [vmem:[#allocation2 + $0x18] sm:$0xff] }
 0x1b2   : > { %5038 = vmatpush.msrb.mxu1 %v11605_v17  ;;  %4994 = vmatmul.f32.vlgmr.msra.gmra.mxu3 %v11650_v14 }
 0x1b3   : > { %5187 = vmatpush.msra.mxu3 %v11608_v37  ;;  %v3361_v60 = vpop.f32.mrf.mxu0  ;;  %4970 = vmatmul.f32.vlgmr.msra.gmra.mxu2 %v11640_v6  ;;  %v5388_v12 = vand.u32 4294901760, %v11689_v47 }
 0x1b4   : > { %v3362_v19 = vadd.f32 %v3361_v60, %v3338_v27  ;;  %5165 = vmatpush.msra.mxu2 %v5090_v7  ;;  %v5239_v7 = vand.u32 4294901760, %v5238_v41  ;;  %v11703_v60 = vand.u32 4294901760, %v5194_v59 }
 0x1b5   : > { %v3431_v17 = vpop.f32.mrf.mxu3 }
 0x1b6   : > { %v3385_v56 = vpop.f32.mrf.mxu1  ;;  %4920 = vmatmul.f32.vlgmr.msra.gmra.mxu0 %v11678_v38  ;;  %v3409_v57 = vpop.f32.mrf.mxu2 }
 0x1b7   : > { %v3386_v30 = vadd.f32 %v3385_v56, %v3362_v19  ;;  %5116 = vmatpush.msra.mxu0 %v11619_v53  ;;  %v5240_v19 = vsub.f32 %v5238_v41, %v5239_v7  ;;  %v5343_v56 = vsel %vm13134_vm0, %v11699_v16, 0 }
 0x1b9   : > { %v3410_v27 = vadd.f32 %v3409_v57, %v3386_v30  ;;  %4946 = vmatmul.f32.vlgmr.msra.gmra.mxu1 %v11630_v48  ;;  %v5389_v30 = vsub.f32 %v11689_v47, %v5388_v12  ;;  %v5241_v10 = vand.u32 4294901760, %v5240_v19 }
 0x1ba   : > { %5139 = vmatpush.msra.mxu1 %v11608_v37  ;;  %5095 = vmatmul.f32.vlgmr.msrb.gmra.mxu3 %v11643_v42 }
 0x1bb   : > { %v11705_v53 = vadd.f32 %v3431_v17, %v3410_v27  ;;  %5288 = vmatpush.msrb.mxu3 %v11670_v54  ;;  %v3457_v31 = vpop.f32.mrf.mxu0  ;;  %5069 = vmatmul.f32.vlgmr.msrb.gmra.mxu2 %v11693_v26  ;;  %v11714_v17 = vsub.f32 %v5194_v59, %v11703_v60  ;;  %v5390_v34 = vand.u32 4294901760, %v5389_v30  ;;  %v11745_v30 = vand.u32 4294901760, %v11350_v52 }
 0x1bc   : > { %5265 = vmatpush.msrb.mxu2 %v5238_v41  ;;  %v928_v41 = vadd.f32 %v11322_v29, %v11320_v28 }
 0x1bd   : > { %13152 = vst [vmem:[#allocation14_spill] sm:$0xff] %v11705_v53  ;;  %v3531_v57 = vpop.f32.mrf.mxu3  ;;  %v11717_v53 = vand.u32 4294901760, %v5343_v56  ;;  %v11724_v21 = vand.u32 4294901760, %v11714_v17 }
 0x1be   : > { %v3483_v37 = vpop.f32.mrf.mxu1  ;;  %5018 = vmatmul.f32.vlgmr.msrb.gmra.mxu0 %v11630_v48  ;;  %v3507_v49 = vpop.f32.mrf.mxu2  ;;  %v950_v29 = vadd.f32 %v11328_v36, %v928_v41 }
 0x1bf   : > { %v3484_v27 = vadd.f32 %v3483_v37, %v3457_v31  ;;  %5212 = vmatpush.msrb.mxu0 %v11670_v54  ;;  %v11732_v28 = vsub.f32 %v5343_v56, %v11717_v53 }
 0x1c0   : > { %v5506_v56 = vand.u32 4294901760, %v950_v29 }
 0x1c1   : > { %v3508_v23 = vadd.f32 %v3507_v49, %v3484_v27  ;;  %5040 = vmatmul.f32.vlgmr.msrb.gmra.mxu1 %v11630_v48 }
 0x1c2   : > { %5242 = vmatpush.msrb.mxu1 %v5241_v10  ;;  %5189 = vmatmul.f32.vlgmr.msra.gmra.mxu3 %v11643_v42  ;;  %v5533_v27 = vsub.f32 %v950_v29, %v5506_v56 }
 0x1c3   : > { %v11726_v59 = vadd.f32 %v3531_v57, %v3508_v23  ;;  %5391 = vmatpush.msra.mxu3 %v5390_v34  ;;  %v11728_v31 = vpop.f32.mrf.mxu0  ;;  %5167 = vmatmul.f32.vlgmr.msra.gmra.mxu2 %v11643_v42  ;;  %v5216_v34 = vsub.f32 %v11714_v17, %v11724_v21  ;;  %v11742_v57 = vand.u32 4294901760, %v11732_v28 }
 0x1c4   : > { %13154 = vst [vmem:[#allocation16_spill] sm:$0xff] %v11728_v31  ;;  %5361 = vmatpush.msra.mxu2 %v11673_v63 }
 0x1c5   : > { %13153 = vst [vmem:[#allocation15_spill] sm:$0xff] %v11726_v59  ;;  %v3629_v10 = vpop.f32.mrf.mxu3  ;;  %v11750_v36 = vand.u32 4294901760, %v5216_v34  ;;  %v5534_v59 = vand.u32 4294901760, %v5533_v27 }
 0x1c6   : > { %v11736_v49 = vpop.f32.mrf.mxu1  ;;  %5119 = vmatmul.f32.vlgmr.msra.gmra.mxu0 %v11658_v58  ;;  %v3603_v19 = vpop.f32.mrf.mxu2 }
 0x1c7   : > { %13155 = vst [vmem:[#allocation17_spill] sm:$0xff] %v11736_v49  ;;  %5314 = vmatpush.msra.mxu0 %v5239_v7  ;;  %v3630_v23 = vadd.f32 %v3629_v10, %v3603_v19  ;;  %v5365_v7 = vsub.f32 %v11732_v28, %v11742_v57  ;;  %v11758_v10 = vsub.f32 %v11350_v52, %v11745_v30 }
 0x1c9   : > { %5143 = vmatmul.f32.vlgmr.msra.gmra.mxu1 %v11668_v33  ;;  %v11762_v31 = vand.u32 4294901760, %v5365_v7  ;;  %v5680_v0 = vand.u32 4294901760, %v11758_v10 }
 0x1ca   : > { %5336 = vmatpush.msra.mxu1 %v11670_v54  ;;  %5292 = vmatmul.f32.vlgmr.msrb.gmra.mxu3 %v11724_v21 }
 0x1cb   : > { %5485 = vmatpush.msrb.mxu3 %v11673_v63  ;;  %v3653_v37 = vpop.f32.mrf.mxu0  ;;  %5268 = vmatmul.f32.vlgmr.msrb.gmra.mxu2 %v11714_v17 }
 0x1cc   : > { %v3654_v41 = vadd.f32 %v3653_v37, %v3630_v23  ;;  %5463 = vmatpush.msrb.mxu2 %v5388_v12  ;;  %v5681_v37 = vsub.f32 %v11758_v10, %v5680_v0 }
 0x1cd   : > { %v3723_v54 = vpop.f32.mrf.mxu3 }
 0x1ce   : > { %v3677_v19 = vpop.f32.mrf.mxu1  ;;  %5218 = vmatmul.f32.vlgmr.msrb.gmra.mxu0 %v11750_v36  ;;  %v3701_v34 = vpop.f32.mrf.mxu2 }
 0x1cf   : > { %v3678_v49 = vadd.f32 %v3677_v19, %v3654_v41  ;;  %5414 = vmatpush.msrb.mxu0 %v11689_v47  ;;  %v5535_v47 = vsub.f32 %v5533_v27, %v5534_v59 }
 0x1d1   : > { %v3702_v29 = vadd.f32 %v3701_v34, %v3678_v49  ;;  %5244 = vmatmul.f32.vlgmr.msrb.gmra.mxu1 %v11703_v60  ;;  %v5682_v34 = vand.u32 4294901760, %v5681_v37 }
 0x1d2   : > { %5437 = vmatpush.msrb.mxu1 %v11673_v63  ;;  %5393 = vmatmul.f32.vlgmr.msra.gmra.mxu3 %v11717_v53  ;;  %v1220_v63 = vadd.f32 %v11361_v4, %v11359_v2 }
 0x1d3   : > { %v11768_v52 = vadd.f32 %v3723_v54, %v3702_v29  ;;  %5583 = vmatpush.msra.mxu3 %v5506_v56  ;;  %v3749_v12 = vpop.f32.mrf.mxu0  ;;  %5367 = vmatmul.f32.vlgmr.msra.gmra.mxu2 %v11762_v31  ;;  %v5536_v54 = vand.u32 4294901760, %v5535_v47 }
 0x1d4   : > { %5560 = vmatpush.msra.mxu2 %v5533_v27 }
 0x1d5   : > { %v3823_v23 = vpop.f32.mrf.mxu3 }
 0x1d6   : > { %v3775_v7 = vpop.f32.mrf.mxu1  ;;  %5316 = vmatmul.f32.vlgmr.msra.gmra.mxu0 %v11703_v60  ;;  %v3799_v49 = vpop.f32.mrf.mxu2 }
 0x1d7   : > { %v3776_v41 = vadd.f32 %v3775_v7, %v3749_v12  ;;  %5507 = vmatpush.msra.mxu0 %v5506_v56  ;;  %v1242_v12 = vadd.f32 %v11367_v9, %v1220_v63 }
 0x1d9   : > { %v3800_v19 = vadd.f32 %v3799_v49, %v3776_v41  ;;  %5338 = vmatmul.f32.vlgmr.msra.gmra.mxu1 %v11703_v60  ;;  %v5798_v7 = vand.u32 4294901760, %v1242_v12 }
 0x1da   : > { %5537 = vmatpush.msra.mxu1 %v5536_v54  ;;  %5487 = vmatmul.f32.vlgmr.msrb.gmra.mxu3 %v11717_v53 }
 0x1db   : > { %v11777_v27 = vadd.f32 %v3823_v23, %v3800_v19  ;;  %5683 = vmatpush.msrb.mxu3 %v5682_v34  ;;  %v11779_v29 = vpop.f32.mrf.mxu0  ;;  %5465 = vmatmul.f32.vlgmr.msrb.gmra.mxu2 %v11717_v53  ;;  %v11788_v23 = vand.u32 4294901760, %v11389_v24  ;;  %v5825_v49 = vsub.f32 %v1242_v12, %v5798_v7 }
 0x1dc   : > { %5653 = vmatpush.msrb.mxu2 %v11745_v30 }
 0x1dd   : > { %v3921_v2 = vpop.f32.mrf.mxu3 }
 0x1de   : > { %v11784_v4 = vpop.f32.mrf.mxu1  ;;  %5417 = vmatmul.f32.vlgmr.msrb.gmra.mxu0 %v11732_v28  ;;  %v3895_v47 = vpop.f32.mrf.mxu2 }
 0x1df   : > { %5609 = vmatpush.msrb.mxu0 %v5534_v59  ;;  %v3922_v37 = vadd.f32 %v3921_v2, %v3895_v47  ;;  %v5971_v59 = vsub.f32 %v11389_v24, %v11788_v23 }
 0x1e1   : > { %5441 = vmatmul.f32.vlgmr.msrb.gmra.mxu1 %v11742_v57  ;;  %v5972_v2 = vand.u32 4294901760, %v5971_v59 }
 0x1e2   : > { %5631 = vmatpush.msrb.mxu1 %v5506_v56  ;;  %5587 = vmatmul.f32.vlgmr.msra.gmra.mxu3 %v11650_v14  ;;  %v5826_v56 = vand.u32 4294901760, %v5825_v49 }
 0x1e3   : > { %5777 = vmatpush.msra.mxu3 %v11745_v30  ;;  %v3945_v9 = vpop.f32.mrf.mxu0  ;;  %5563 = vmatmul.f32.vlgmr.msra.gmra.mxu2 %v11640_v6 }
 0x1e4   : > { %v3946_v41 = vadd.f32 %v3945_v9, %v3922_v37  ;;  %5755 = vmatpush.msra.mxu2 %v5680_v0  ;;  %v5827_v12 = vsub.f32 %v5825_v49, %v5826_v56  ;;  %v5973_v9 = vsub.f32 %v5971_v59, %v5972_v2 }
 0x1e5   : > { %v4015_v63 = vpop.f32.mrf.mxu3 }
 0x1e6   : > { %v3969_v54 = vpop.f32.mrf.mxu1  ;;  %5513 = vmatmul.f32.vlgmr.msra.gmra.mxu0 %v11678_v38  ;;  %v3993_v19 = vpop.f32.mrf.mxu2 }
 0x1e7   : > { %v3970_v34 = vadd.f32 %v3969_v54, %v3946_v41  ;;  %5706 = vmatpush.msra.mxu0 %v11758_v10 }
 0x1e9   : > { %v3994_v47 = vadd.f32 %v3993_v19, %v3970_v34  ;;  %5539 = vmatmul.f32.vlgmr.msra.gmra.mxu1 %v11630_v48  ;;  %v5828_v19 = vand.u32 4294901760, %v5827_v12  ;;  %v5974_v34 = vand.u32 4294901760, %v5973_v9 }
 0x1ea   : > { %5729 = vmatpush.msra.mxu1 %v11745_v30  ;;  %5685 = vmatmul.f32.vlgmr.msrb.gmra.mxu3 %v11643_v42  ;;  %v1512_v30 = vadd.f32 %v11400_v44, %v11398_v43 }
 0x1eb   : > { %v11801_v0 = vadd.f32 %v4015_v63, %v3994_v47  ;;  %5875 = vmatpush.msrb.mxu3 %v5798_v7  ;;  %v4041_v24 = vpop.f32.mrf.mxu0  ;;  %5659 = vmatmul.f32.vlgmr.msrb.gmra.mxu2 %v11693_v26 }
 0x1ec   : > { %5852 = vmatpush.msrb.mxu2 %v5825_v49 }
 0x1ed   : > { %v4115_v37 = vpop.f32.mrf.mxu3 }
 0x1ee   : > { %v4067_v10 = vpop.f32.mrf.mxu1  ;;  %5611 = vmatmul.f32.vlgmr.msrb.gmra.mxu0 %v11630_v48  ;;  %v4091_v41 = vpop.f32.mrf.mxu2 }
 0x1ef   : > { %v4068_v54 = vadd.f32 %v4067_v10, %v4041_v24  ;;  %5799 = vmatpush.msrb.mxu0 %v5798_v7  ;;  %v1534_v24 = vadd.f32 %v11406_v50, %v1512_v30 }
 0x1f1   : > { %v4092_v63 = vadd.f32 %v4091_v41, %v4068_v54  ;;  %5633 = vmatmul.f32.vlgmr.msrb.gmra.mxu1 %v11630_v48  ;;  %v6090_v10 = vand.u32 4294901760, %v1534_v24 }
 0x1f2   : > { %5829 = vmatpush.msrb.mxu1 %v5828_v19  ;;  %5779 = vmatmul.f32.vlgmr.msra.gmra.mxu3 %v11643_v42 }
 0x1f3   : > { %v11809_v49 = vadd.f32 %v4115_v37, %v4092_v63  ;;  %5975 = vmatpush.msra.mxu3 %v5974_v34  ;;  %v11811_v47 = vpop.f32.mrf.mxu0  ;;  %5757 = vmatmul.f32.vlgmr.msra.gmra.mxu2 %v11643_v42  ;;  %v11820_v37 = vand.u32 4294901760, %v11428_v8  ;;  %v6117_v41 = vsub.f32 %v1534_v24, %v6090_v10 }
 0x1f4   : > { %5945 = vmatpush.msra.mxu2 %v11788_v23 }
 0x1f5   : > { %v4213_v43 = vpop.f32.mrf.mxu3 }
 0x1f6   : > { %v11816_v44 = vpop.f32.mrf.mxu1  ;;  %5709 = vmatmul.f32.vlgmr.msra.gmra.mxu0 %v11658_v58  ;;  %v4187_v12 = vpop.f32.mrf.mxu2 }
 0x1f7   : > { %5901 = vmatpush.msra.mxu0 %v5826_v56  ;;  %v4214_v9 = vadd.f32 %v4213_v43, %v4187_v12  ;;  %v6263_v56 = vsub.f32 %v11428_v8, %v11820_v37 }
 0x1f9   : > { %5733 = vmatmul.f32.vlgmr.msra.gmra.mxu1 %v11668_v33  ;;  %v6264_v43 = vand.u32 4294901760, %v6263_v56 }
 0x1fa   : > { %5923 = vmatpush.msra.mxu1 %v5798_v7  ;;  %5879 = vmatmul.f32.vlgmr.msrb.gmra.mxu3 %v11724_v21  ;;  %v6118_v7 = vand.u32 4294901760, %v6117_v41 }
 0x1fb   : > { %6069 = vmatpush.msrb.mxu3 %v11788_v23  ;;  %v4237_v50 = vpop.f32.mrf.mxu0  ;;  %5855 = vmatmul.f32.vlgmr.msrb.gmra.mxu2 %v11714_v17 }
 0x1fc   : > { %v4238_v54 = vadd.f32 %v4237_v50, %v4214_v9  ;;  %6047 = vmatpush.msrb.mxu2 %v5972_v2  ;;  %v6119_v24 = vsub.f32 %v6117_v41, %v6118_v7  ;;  %v6265_v50 = vsub.f32 %v6263_v56, %v6264_v43 }
 0x1fd   : > { %v4307_v30 = vpop.f32.mrf.mxu3 }
 0x1fe   : > { %v4261_v19 = vpop.f32.mrf.mxu1  ;;  %5805 = vmatmul.f32.vlgmr.msrb.gmra.mxu0 %v11750_v36  ;;  %v4285_v63 = vpop.f32.mrf.mxu2 }
 0x1ff   : > { %v4262_v34 = vadd.f32 %v4261_v19, %v4238_v54  ;;  %5998 = vmatpush.msrb.mxu0 %v5971_v59 }
 0x201   : > { %v4286_v12 = vadd.f32 %v4285_v63, %v4262_v34  ;;  %5831 = vmatmul.f32.vlgmr.msrb.gmra.mxu1 %v11703_v60  ;;  %v6120_v63 = vand.u32 4294901760, %v6119_v24  ;;  %v6266_v34 = vand.u32 4294901760, %v6265_v50 }
 0x202   : > { %6021 = vmatpush.msrb.mxu1 %v11788_v23  ;;  %5977 = vmatmul.f32.vlgmr.msra.gmra.mxu3 %v11717_v53  ;;  %v1804_v23 = vadd.f32 %v11439_v22, %v11437_v20 }
 0x203   : > { %v11832_v2 = vadd.f32 %v4307_v30, %v4286_v12  ;;  %6167 = vmatpush.msra.mxu3 %v6090_v10  ;;  %v4333_v8 = vpop.f32.mrf.mxu0  ;;  %5951 = vmatmul.f32.vlgmr.msra.gmra.mxu2 %v11762_v31 }
 0x204   : > { %6144 = vmatpush.msra.mxu2 %v6117_v41 }
 0x205   : > { %v4407_v9 = vpop.f32.mrf.mxu3 }
 0x206   : > { %v4359_v59 = vpop.f32.mrf.mxu1  ;;  %5903 = vmatmul.f32.vlgmr.msra.gmra.mxu0 %v11703_v60  ;;  %v4383_v54 = vpop.f32.mrf.mxu2 }
 0x207   : > { %v4360_v19 = vadd.f32 %v4359_v59, %v4333_v8  ;;  %6091 = vmatpush.msra.mxu0 %v6090_v10  ;;  %v1826_v8 = vadd.f32 %v11445_v32, %v1804_v23 }
 0x209   : > { %v4384_v30 = vadd.f32 %v4383_v54, %v4360_v19  ;;  %5925 = vmatmul.f32.vlgmr.msra.gmra.mxu1 %v11703_v60  ;;  %v6382_v59 = vand.u32 4294901760, %v1826_v8 }
 0x20a   : > { %6121 = vmatpush.msra.mxu1 %v6120_v63  ;;  %6071 = vmatmul.f32.vlgmr.msrb.gmra.mxu3 %v11717_v53 }
 0x20b   : > { %v11840_v41 = vadd.f32 %v4407_v9, %v4384_v30  ;;  %6267 = vmatpush.msrb.mxu3 %v6266_v34  ;;  %v11842_v12 = vpop.f32.mrf.mxu0  ;;  %6049 = vmatmul.f32.vlgmr.msrb.gmra.mxu2 %v11717_v53  ;;  %v11851_v9 = vand.u32 4294901760, %v11467_v55  ;;  %v6409_v54 = vsub.f32 %v1826_v8, %v6382_v59 }
 0x20c   : > { %6237 = vmatpush.msrb.mxu2 %v11820_v37 }
 0x20d   : > { %v4505_v20 = vpop.f32.mrf.mxu3 }
 0x20e   : > { %v11847_v22 = vpop.f32.mrf.mxu1  ;;  %6001 = vmatmul.f32.vlgmr.msrb.gmra.mxu0 %v11732_v28  ;;  %v4479_v24 = vpop.f32.mrf.mxu2 }
 0x20f   : > { %6193 = vmatpush.msrb.mxu0 %v6118_v7  ;;  %v4506_v50 = vadd.f32 %v4505_v20, %v4479_v24  ;;  %v6555_v7 = vsub.f32 %v11467_v55, %v11851_v9 }
 0x211   : > { %6025 = vmatmul.f32.vlgmr.msrb.gmra.mxu1 %v11742_v57  ;;  %v6556_v20 = vand.u32 4294901760, %v6555_v7 }
 0x212   : > { %6215 = vmatpush.msrb.mxu1 %v6090_v10  ;;  %6171 = vmatmul.f32.vlgmr.msra.gmra.mxu3 %v11650_v14  ;;  %v6410_v10 = vand.u32 4294901760, %v6409_v54 }
 0x213   : > { %6361 = vmatpush.msra.mxu3 %v11820_v37  ;;  %v4529_v32 = vpop.f32.mrf.mxu0  ;;  %6147 = vmatmul.f32.vlgmr.msra.gmra.mxu2 %v11640_v6 }
 0x214   : > { %v4530_v19 = vadd.f32 %v4529_v32, %v4506_v50  ;;  %6339 = vmatpush.msra.mxu2 %v6264_v43  ;;  %v6411_v8 = vsub.f32 %v6409_v54, %v6410_v10  ;;  %v6557_v32 = vsub.f32 %v6555_v7, %v6556_v20 }
 0x215   : > { %v4599_v23 = vpop.f32.mrf.mxu3 }
 0x216   : > { %v4553_v63 = vpop.f32.mrf.mxu1  ;;  %6097 = vmatmul.f32.vlgmr.msra.gmra.mxu0 %v11678_v38  ;;  %v4577_v30 = vpop.f32.mrf.mxu2 }
 0x217   : > { %v4554_v34 = vadd.f32 %v4553_v63, %v4530_v19  ;;  %6290 = vmatpush.msra.mxu0 %v6263_v56 }
 0x219   : > { %v4578_v24 = vadd.f32 %v4577_v30, %v4554_v34  ;;  %6123 = vmatmul.f32.vlgmr.msra.gmra.mxu1 %v11630_v48  ;;  %v6412_v30 = vand.u32 4294901760, %v6411_v8  ;;  %v6558_v34 = vand.u32 4294901760, %v6557_v32 }
 0x21a   : > { %6313 = vmatpush.msra.mxu1 %v11820_v37  ;;  %6269 = vmatmul.f32.vlgmr.msrb.gmra.mxu3 %v11643_v42  ;;  %v2096_v37 = vadd.f32 %v11478_v3, %v11476_v11 }
 0x21b   : > { %v11863_v43 = vadd.f32 %v4599_v23, %v4578_v24  ;;  %6459 = vmatpush.msrb.mxu3 %v6382_v59  ;;  %v4625_v55 = vpop.f32.mrf.mxu0  ;;  %6243 = vmatmul.f32.vlgmr.msrb.gmra.mxu2 %v11693_v26 }
 0x21c   : > { %6436 = vmatpush.msrb.mxu2 %v6409_v54 }
 0x21d   : > { %v4699_v50 = vpop.f32.mrf.mxu3 }
 0x21e   : > { %v4651_v56 = vpop.f32.mrf.mxu1  ;;  %6195 = vmatmul.f32.vlgmr.msrb.gmra.mxu0 %v11630_v48  ;;  %v4675_v19 = vpop.f32.mrf.mxu2 }
 0x21f   : > { %v4652_v63 = vadd.f32 %v4651_v56, %v4625_v55  ;;  %6383 = vmatpush.msrb.mxu0 %v6382_v59  ;;  %v2118_v55 = vadd.f32 %v11484_v18, %v2096_v37 }
 0x221   : > { %v4676_v23 = vadd.f32 %v4675_v19, %v4652_v63  ;;  %6217 = vmatmul.f32.vlgmr.msrb.gmra.mxu1 %v11630_v48  ;;  %v6674_v56 = vand.u32 4294901760, %v2118_v55 }
 0x222   : > { %6413 = vmatpush.msrb.mxu1 %v6412_v30  ;;  %6363 = vmatmul.f32.vlgmr.msra.gmra.mxu3 %v11643_v42 }
 0x223   : > { %v11871_v54 = vadd.f32 %v4699_v50, %v4676_v23  ;;  %6559 = vmatpush.msra.mxu3 %v6558_v34  ;;  %v11873_v24 = vpop.f32.mrf.mxu0  ;;  %6341 = vmatmul.f32.vlgmr.msra.gmra.mxu2 %v11643_v42  ;;  %v11882_v50 = vand.u32 4294901760, %v11506_v45  ;;  %v6701_v19 = vsub.f32 %v2118_v55, %v6674_v56 }
 0x224   : > { %6529 = vmatpush.msra.mxu2 %v11851_v9 }
 0x225   : > { %v4797_v11 = vpop.f32.mrf.mxu3  ;;  %v6702_v34 = vand.u32 4294901760, %v6701_v19 }
 0x226   : > { %v11878_v3 = vpop.f32.mrf.mxu1  ;;  %6293 = vmatmul.f32.vlgmr.msra.gmra.mxu0 %v11658_v58  ;;  %v4771_v8 = vpop.f32.mrf.mxu2 }
 0x227   : > { %6485 = vmatpush.msra.mxu0 %v6410_v10  ;;  %v4798_v32 = vadd.f32 %v4797_v11, %v4771_v8  ;;  %v11890_v10 = vsub.f32 %v11506_v45, %v11882_v50  ;;  %v6703_v55 = vsub.f32 %v6701_v19, %v6702_v34 }
 0x229   : > { %6317 = vmatmul.f32.vlgmr.msra.gmra.mxu1 %v11668_v33  ;;  %v6848_v11 = vand.u32 4294901760, %v11890_v10 }
 0x22a   : > { %6507 = vmatpush.msra.mxu1 %v6382_v59  ;;  %6463 = vmatmul.f32.vlgmr.msrb.gmra.mxu3 %v11724_v21 }
 0x22b   : > { %6653 = vmatpush.msrb.mxu3 %v11851_v9  ;;  %v4821_v18 = vpop.f32.mrf.mxu0  ;;  %6439 = vmatmul.f32.vlgmr.msrb.gmra.mxu2 %v11714_v17 }
 0x22c   : > { %v4822_v63 = vadd.f32 %v4821_v18, %v4798_v32  ;;  %6631 = vmatpush.msrb.mxu2 %v6556_v20 }
 0x22d   : > { %v4891_v37 = vpop.f32.mrf.mxu3 }
 0x22e   : > { %v4845_v30 = vpop.f32.mrf.mxu1  ;;  %6389 = vmatmul.f32.vlgmr.msrb.gmra.mxu0 %v11750_v36  ;;  %v4869_v23 = vpop.f32.mrf.mxu2 }
 0x22f   : > { %v4846_v59 = vadd.f32 %v4845_v30, %v4822_v63  ;;  %6582 = vmatpush.msrb.mxu0 %v6555_v7  ;;  %v6849_v7 = vsub.f32 %v11890_v10, %v6848_v11 }
 0x231   : > { %v4870_v8 = vadd.f32 %v4869_v23, %v4846_v59  ;;  %6415 = vmatmul.f32.vlgmr.msrb.gmra.mxu1 %v11703_v60  ;;  %v6850_v59 = vand.u32 4294901760, %v6849_v7 }
 0x232   : > { %6605 = vmatpush.msrb.mxu1 %v11851_v9  ;;  %6561 = vmatmul.f32.vlgmr.msra.gmra.mxu3 %v11717_v53  ;;  %v2388_v9 = vadd.f32 %v11517_v5, %v11515_v62 }
 0x233   : > { %v11897_v20 = vadd.f32 %v4891_v37, %v4870_v8  ;;  %6751 = vmatpush.msra.mxu3 %v6674_v56  ;;  %v4921_v45 = vpop.f32.mrf.mxu0  ;;  %6535 = vmatmul.f32.vlgmr.msra.gmra.mxu2 %v11762_v31  ;;  %v6704_v37 = vand.u32 4294901760, %v6703_v55 }
 0x234   : > { %6728 = vmatpush.msra.mxu2 %v6701_v19 }
 0x235   : > { %13156 = vst [vmem:[#allocation18_spill] sm:$0xff] %v11897_v20  ;;  %v4995_v32 = vpop.f32.mrf.mxu3  ;;  %v2410_v20 = vadd.f32 %v11523_v15, %v2388_v9 }
 0x236   : > { %v4947_v18 = vpop.f32.mrf.mxu1  ;;  %6487 = vmatmul.f32.vlgmr.msra.gmra.mxu0 %v11703_v60  ;;  %v4971_v63 = vpop.f32.mrf.mxu2 }
 0x237   : > { %v4948_v30 = vadd.f32 %v4947_v18, %v4921_v45  ;;  %6675 = vmatpush.msra.mxu0 %v6674_v56  ;;  %v11910_v7 = vand.u32 4294901760, %v2410_v20 }
 0x239   : > { %v4972_v23 = vadd.f32 %v4971_v63, %v4948_v30  ;;  %6509 = vmatmul.f32.vlgmr.msra.gmra.mxu1 %v11703_v60  ;;  %v6993_v9 = vsub.f32 %v2410_v20, %v11910_v7 }
 0x23a   : > { %6705 = vmatpush.msra.mxu1 %v6704_v37  ;;  %6655 = vmatmul.f32.vlgmr.msrb.gmra.mxu3 %v11717_v53 }
 0x23b   : > { %v4996_v19 = vadd.f32 %v4995_v32, %v4972_v23  ;;  %6851 = vmatpush.msrb.mxu3 %v6850_v59  ;;  %v5019_v8 = vpop.f32.mrf.mxu0  ;;  %6633 = vmatmul.f32.vlgmr.msrb.gmra.mxu2 %v11717_v53  ;;  %v11913_v32 = vand.u32 4294901760, %v11545_v46 }
 0x23c   : > { %6821 = vmatpush.msrb.mxu2 %v11882_v50 }
 0x23d   : > { %v5020_v45 = vadd.f32 %v5019_v8, %v4996_v19  ;;  %v5096_v18 = vpop.f32.mrf.mxu3  ;;  %v11924_v23 = vsub.f32 %v11545_v46, %v11913_v32  ;;  %v6994_v8 = vand.u32 4294901760, %v6993_v9 }
 0x23e   : > { %v5041_v62 = vpop.f32.mrf.mxu1  ;;  %6585 = vmatmul.f32.vlgmr.msrb.gmra.mxu0 %v11732_v28  ;;  %v5070_v5 = vpop.f32.mrf.mxu2 }
 0x23f   : > { %v5042_v55 = vadd.f32 %v5041_v62, %v5020_v45  ;;  %6777 = vmatpush.msrb.mxu0 %v6702_v34  ;;  %v5097_v63 = vadd.f32 %v5096_v18, %v5070_v5  ;;  %v7140_v45 = vand.u32 4294901760, %v11924_v23  ;;  %v6995_v20 = vsub.f32 %v6993_v9, %v6994_v8 }
 0x241   : > { %6609 = vmatmul.f32.vlgmr.msrb.gmra.mxu1 %v11742_v57  ;;  %v9579_v15 = vmul.f32 %v5042_v55, %v11615_v39  ;;  %v7141_v5 = vsub.f32 %v11924_v23, %v7140_v45 }
 0x242   : > { %6799 = vmatpush.msrb.mxu1 %v6674_v56  ;;  %6755 = vmatmul.f32.vlgmr.msra.gmra.mxu3 %v11650_v14 }
 0x243   : > { %6945 = vmatpush.msra.mxu3 %v11882_v50  ;;  %v5120_v30 = vpop.f32.mrf.mxu0  ;;  %6731 = vmatmul.f32.vlgmr.msra.gmra.mxu2 %v11640_v6  ;;  %v9611_v34 = vsel %vm13134_vm0, %v9579_v15, 0.0 }
 0x244   : > { %v5121_v37 = vadd.f32 %v5120_v30, %v5097_v63  ;;  %6923 = vmatpush.msra.mxu2 %v6848_v11  ;;  %9612 = vadd.xlane.f32.xlu0 %v9611_v34  ;;  %v2680_v30 = vadd.f32 %v11556_v1, %v11554_v61  ;;  %v6996_v34 = vand.u32 4294901760, %v6995_v20  ;;  %v11950_v20 = vand.u32 4294901760, %v11584_v40 }
 0x245   : > { %v5190_v39 = vpop.f32.mrf.mxu3 }
 0x246   : > { %v5144_v56 = vpop.f32.mrf.mxu1  ;;  %6681 = vmatmul.f32.vlgmr.msra.gmra.mxu0 %v11678_v38  ;;  %v5168_v59 = vpop.f32.mrf.mxu2 }
 0x247   : > { %v5145_v19 = vadd.f32 %v5144_v56, %v5121_v37  ;;  %6874 = vmatpush.msra.mxu0 %v11890_v10  ;;  %v2702_v56 = vadd.f32 %v11562_v25, %v2680_v30 }
 0x249   : > { %v5169_v18 = vadd.f32 %v5168_v59, %v5145_v19  ;;  %6707 = vmatmul.f32.vlgmr.msra.gmra.mxu1 %v11630_v48 }
 0x24a   : > { %6897 = vmatpush.msra.mxu1 %v11882_v50  ;;  %6853 = vmatmul.f32.vlgmr.msrb.gmra.mxu3 %v11643_v42 }
 0x24b   : > { %v5191_v46 = vadd.f32 %v5190_v39, %v5169_v18  ;;  %7043 = vmatpush.msrb.mxu3 %v11910_v7  ;;  %v5219_v11 = vpop.f32.mrf.mxu0  ;;  %6827 = vmatmul.f32.vlgmr.msrb.gmra.mxu2 %v11693_v26 }
 0x24c   : > { %7020 = vmatpush.msrb.mxu2 %v6993_v9 }
 0x24d   : > { %v5293_v62 = vpop.f32.mrf.mxu3  ;;  %v9580_v10 = vmul.f32 %v5191_v46, %v11626_v51  ;;  %v7142_v51 = vand.u32 4294901760, %v7141_v5  ;;  %v11947_v46 = vand.u32 4294901760, %v2702_v56 }
 0x24e   : > { %v5245_v55 = vpop.f32.mrf.mxu1  ;;  %6779 = vmatmul.f32.vlgmr.msrb.gmra.mxu0 %v11630_v48  ;;  %v5269_v63 = vpop.f32.mrf.mxu2 }
 0x24f   : > { %v5246_v50 = vadd.f32 %v5245_v55, %v5219_v11  ;;  %6967 = vmatpush.msrb.mxu0 %v11910_v7  ;;  %v9614_v15 = vsel %vm13134_vm0, %v9580_v10, 0.0  ;;  %v7285_v10 = vsub.f32 %v2702_v56, %v11947_v46  ;;  %v11962_v55 = vsub.f32 %v11584_v40, %v11950_v20 }
 0x250   : > { %9615 = vadd.xlane.f32.xlu0 %v9614_v15 }
 0x251   : > { %v5270_v9 = vadd.f32 %v5269_v63, %v5246_v50  ;;  %6801 = vmatmul.f32.vlgmr.msrb.gmra.mxu1 %v11630_v48  ;;  %v7286_v15 = vand.u32 4294901760, %v7285_v10  ;;  %v7432_v30 = vand.u32 4294901760, %v11962_v55 }
 0x252   : > { %6997 = vmatpush.msrb.mxu1 %v6996_v34  ;;  %6947 = vmatmul.f32.vlgmr.msra.gmra.mxu3 %v11643_v42 }
 0x253   : > { %v5294_v37 = vadd.f32 %v5293_v62, %v5270_v9  ;;  %7143 = vmatpush.msra.mxu3 %v7142_v51  ;;  %v5317_v39 = vpop.f32.mrf.mxu0  ;;  %6925 = vmatmul.f32.vlgmr.msra.gmra.mxu2 %v11643_v42  ;;  %v7287_v9 = vsub.f32 %v7285_v10, %v7286_v15 }
 0x254   : > { %7113 = vmatpush.msra.mxu2 %v11913_v32 }
 0x255   : > { %v5318_v59 = vadd.f32 %v5317_v39, %v5294_v37  ;;  %v5394_v61 = vpop.f32.mrf.mxu3  ;;  %v7433_v37 = vsub.f32 %v11962_v55, %v7432_v30 }
 0x256   : > { %v5339_v1 = vpop.f32.mrf.mxu1  ;;  %6877 = vmatmul.f32.vlgmr.msra.gmra.mxu0 %v11658_v58  ;;  %v5368_v19 = vpop.f32.mrf.mxu2 }
 0x257   : > { %v5340_v18 = vadd.f32 %v5339_v1, %v5318_v59  ;;  %7069 = vmatpush.msra.mxu0 %v6994_v8  ;;  %v5395_v11 = vadd.f32 %v5394_v61, %v5368_v19  ;;  %v13157_v61 = vld [vmem:[#allocation8_spill] sm:$0xff]  ;;  %v7288_v19 = vand.u32 4294901760, %v7287_v9 }
 0x258   : > { %v2972_v1 = vadd.f32 %v13157_v61, %v11595_v35 }
 0x259   : > { %6901 = vmatmul.f32.vlgmr.msra.gmra.mxu1 %v11668_v33  ;;  %v9581_v25 = vmul.f32 %v5340_v18, %v11685_v13 }
 0x25a   : > { %7091 = vmatpush.msra.mxu1 %v11910_v7  ;;  %7047 = vmatmul.f32.vlgmr.msrb.gmra.mxu3 %v11724_v21 }
 0x25b   : > { %7237 = vmatpush.msrb.mxu3 %v11913_v32  ;;  %v5418_v62 = vpop.f32.mrf.mxu0  ;;  %7023 = vmatmul.f32.vlgmr.msrb.gmra.mxu2 %v11714_v17  ;;  %v9617_v8 = vsel %vm13134_vm0, %v9581_v25, 0.0 }
 0x25c   : > { %v5419_v5 = vadd.f32 %v5418_v62, %v5395_v11  ;;  %7215 = vmatpush.msrb.mxu2 %v7140_v45  ;;  %9618 = vadd.xlane.f32.xlu1 %v9617_v8  ;;  %v13158_v62 = vld [vmem:[#allocation9_spill] sm:$0xff] }
 0x25d   : > { %v5488_v13 = vpop.f32.mrf.mxu3  ;;  %v2994_v8 = vadd.f32 %v13158_v62, %v2972_v1 }
 0x25e   : > { %v5442_v7 = vpop.f32.mrf.mxu1  ;;  %6973 = vmatmul.f32.vlgmr.msrb.gmra.mxu0 %v11750_v36  ;;  %v5466_v63 = vpop.f32.mrf.mxu2 }
 0x25f   : > { %v5443_v50 = vadd.f32 %v5442_v7, %v5419_v5  ;;  %7166 = vmatpush.msrb.mxu0 %v11924_v23 }
 0x261   : > { %v5467_v34 = vadd.f32 %v5466_v63, %v5443_v50  ;;  %6999 = vmatmul.f32.vlgmr.msrb.gmra.mxu1 %v11703_v60  ;;  %v11985_v63 = vand.u32 4294901760, %v2994_v8 }
 0x262   : > { %7189 = vmatpush.msrb.mxu1 %v11913_v32  ;;  %7145 = vmatmul.f32.vlgmr.msra.gmra.mxu3 %v11717_v53 }
 0x263   : > { %v5489_v40 = vadd.f32 %v5488_v13, %v5467_v34  ;;  %7335 = vmatpush.msra.mxu3 %v11947_v46  ;;  %v5514_v45 = vpop.f32.mrf.mxu0  ;;  %7119 = vmatmul.f32.vlgmr.msra.gmra.mxu2 %v11762_v31  ;;  %v13159_v34 = vld [vmem:[#allocation10_spill] sm:$0xff] }
 0x264   : > { %7312 = vmatpush.msra.mxu2 %v7285_v10 }
 0x265   : > { %v5588_v51 = vpop.f32.mrf.mxu3  ;;  %v9582_v23 = vmul.f32 %v5489_v40, %v11699_v16  ;;  %v7434_v16 = vand.u32 4294901760, %v7433_v37  ;;  %v11988_v40 = vand.u32 4294901760, %v13159_v34 }
 0x266   : > { %v5540_v39 = vpop.f32.mrf.mxu1  ;;  %7071 = vmatmul.f32.vlgmr.msra.gmra.mxu0 %v11703_v60  ;;  %v5564_v56 = vpop.f32.mrf.mxu2 }
 0x267   : > { %v5541_v32 = vadd.f32 %v5540_v39, %v5514_v45  ;;  %7259 = vmatpush.msra.mxu0 %v11947_v46  ;;  %v9620_v59 = vsel %vm13134_vm0, %v9582_v23, 0.0  ;;  %v11991_v45 = vld [vmem:[#allocation2] sm:$0xff]  ;;  %v7577_v23 = vsub.f32 %v2994_v8, %v11985_v63  ;;  %v12002_v39 = vsub.f32 %v13159_v34, %v11988_v40 }
 0x268   : > { %9621 = vadd.xlane.f32.xlu1 %v9620_v59 }
 0x269   : > { %v5565_v18 = vadd.f32 %v5564_v56, %v5541_v32  ;;  %7093 = vmatmul.f32.vlgmr.msra.gmra.mxu1 %v11703_v60  ;;  %v7578_v61 = vand.u32 4294901760, %v7577_v23  ;;  %v7724_v1 = vand.u32 4294901760, %v12002_v39 }
 0x26a   : > { %7289 = vmatpush.msra.mxu1 %v7288_v19  ;;  %7239 = vmatmul.f32.vlgmr.msrb.gmra.mxu3 %v11717_v53 }
 0x26b   : > { %v5589_v11 = vadd.f32 %v5588_v51, %v5565_v18  ;;  %7435 = vmatpush.msrb.mxu3 %v7434_v16  ;;  %v5612_v25 = vpop.f32.mrf.mxu0  ;;  %7217 = vmatmul.f32.vlgmr.msrb.gmra.mxu2 %v11717_v53  ;;  %v7579_v16 = vsub.f32 %v7577_v23, %v7578_v61  ;;  %v7725_v62 = vsub.f32 %v12002_v39, %v7724_v1 }
 0x26c   : > { %7405 = vmatpush.msrb.mxu2 %v11950_v20 }
 0x26d   : > { %v5613_v10 = vadd.f32 %v5612_v25, %v5589_v11  ;;  %v5686_v35 = vpop.f32.mrf.mxu3 }
 0x26e   : > { %v5634_v5 = vpop.f32.mrf.mxu1  ;;  %7169 = vmatmul.f32.vlgmr.msrb.gmra.mxu0 %v11732_v28  ;;  %v5660_v13 = vpop.f32.mrf.mxu2 }
 0x26f   : > { %v5635_v7 = vadd.f32 %v5634_v5, %v5613_v10  ;;  %7361 = vmatpush.msrb.mxu0 %v7286_v15  ;;  %v5687_v50 = vadd.f32 %v5686_v35, %v5660_v13  ;;  %v13160_v5 = vld [vmem:[#allocation11_spill] sm:$0xff]  ;;  %v13161_v13 = vld [vmem:[#allocation12_spill] sm:$0xff] }
 0x271   : > { %7193 = vmatmul.f32.vlgmr.msrb.gmra.mxu1 %v11742_v57  ;;  %v9583_v9 = vmul.f32 %v11991_v45, %v5635_v7  ;;  %v3264_v7 = vadd.f32 %v13161_v13, %v13160_v5 }
 0x272   : > { %7383 = vmatpush.msrb.mxu1 %v11947_v46  ;;  %7339 = vmatmul.f32.vlgmr.msra.gmra.mxu3 %v11650_v14 }
 0x273   : > { %7529 = vmatpush.msra.mxu3 %v11950_v20  ;;  %v5710_v51 = vpop.f32.mrf.mxu0  ;;  %7315 = vmatmul.f32.vlgmr.msra.gmra.mxu2 %v11640_v6  ;;  %v9623_v15 = vsel %vm13134_vm0, %v9583_v9, 0.0  ;;  %v7726_v9 = vand.u32 4294901760, %v7725_v62 }
 0x274   : > { %v5711_v37 = vadd.f32 %v5710_v51, %v5687_v50  ;;  %7507 = vmatpush.msra.mxu2 %v7432_v30  ;;  %9624 = vadd.xlane.f32.xlu2 %v9623_v15  ;;  %v7580_v50 = vand.u32 4294901760, %v7579_v16  ;;  %v13163_v16 = vld [vmem:[#allocation14_spill] sm:$0xff] }
 0x275   : > { %v5780_v56 = vpop.f32.mrf.mxu3 }
 0x276   : > { %v5734_v46 = vpop.f32.mrf.mxu1  ;;  %7265 = vmatmul.f32.vlgmr.msra.gmra.mxu0 %v11678_v38  ;;  %v5758_v32 = vpop.f32.mrf.mxu2 }
 0x277   : > { %v5735_v59 = vadd.f32 %v5734_v46, %v5711_v37  ;;  %7458 = vmatpush.msra.mxu0 %v11962_v55  ;;  %v12012_v55 = vld [vmem:[#allocation2 + $0x8] sm:$0xff] }
 0x279   : > { %v5759_v19 = vadd.f32 %v5758_v32, %v5735_v59  ;;  %7291 = vmatmul.f32.vlgmr.msra.gmra.mxu1 %v11630_v48 }
 0x27a   : > { %7481 = vmatpush.msra.mxu1 %v11950_v20  ;;  %7437 = vmatmul.f32.vlgmr.msrb.gmra.mxu3 %v11643_v42 }
 0x27b   : > { %v5781_v30 = vadd.f32 %v5780_v56, %v5759_v19  ;;  %7627 = vmatpush.msrb.mxu3 %v11985_v63  ;;  %v5806_v18 = vpop.f32.mrf.mxu0  ;;  %7411 = vmatmul.f32.vlgmr.msrb.gmra.mxu2 %v11693_v26 }
 0x27c   : > { %7604 = vmatpush.msrb.mxu2 %v7577_v23  ;;  %v13162_v23 = vld [vmem:[#allocation13_spill] sm:$0xff] }
 0x27d   : > { %v5880_v11 = vpop.f32.mrf.mxu3  ;;  %v9584_v25 = vmul.f32 %v12012_v55, %v5781_v30  ;;  %v3286_v37 = vadd.f32 %v13162_v23, %v3264_v7 }
 0x27e   : > { %v5832_v8 = vpop.f32.mrf.mxu1  ;;  %7363 = vmatmul.f32.vlgmr.msrb.gmra.mxu0 %v11630_v48  ;;  %v5856_v20 = vpop.f32.mrf.mxu2 }
 0x27f   : > { %v5833_v10 = vadd.f32 %v5832_v8, %v5806_v18  ;;  %7551 = vmatpush.msrb.mxu0 %v11985_v63  ;;  %v9626_v35 = vsel %vm13134_vm0, %v9584_v25, 0.0  ;;  %v12027_v30 = vand.u32 4294901760, %v3286_v37  ;;  %v12033_v25 = vld [vmem:[#allocation2 + $0x10] sm:$0xff] }
 0x280   : > { %9627 = vadd.xlane.f32.xlu2 %v9626_v35 }
 0x281   : > { %v5857_v34 = vadd.f32 %v5856_v20, %v5833_v10  ;;  %7385 = vmatmul.f32.vlgmr.msrb.gmra.mxu1 %v11630_v48  ;;  %v7869_v20 = vsub.f32 %v3286_v37, %v12027_v30 }
 0x282   : > { %7581 = vmatpush.msrb.mxu1 %v7580_v50  ;;  %7531 = vmatmul.f32.vlgmr.msra.gmra.mxu3 %v11643_v42 }
 0x283   : > { %v5881_v51 = vadd.f32 %v5880_v11, %v5857_v34  ;;  %7727 = vmatpush.msra.mxu3 %v7726_v9  ;;  %v5904_v15 = vpop.f32.mrf.mxu0  ;;  %7509 = vmatmul.f32.vlgmr.msra.gmra.mxu2 %v11643_v42  ;;  %v12030_v11 = vand.u32 4294901760, %v13163_v16  ;;  %v7870_v50 = vand.u32 4294901760, %v7869_v20 }
 0x284   : > { %7697 = vmatpush.msra.mxu2 %v11988_v40 }
 0x285   : > { %v5905_v56 = vadd.f32 %v5904_v15, %v5881_v51  ;;  %v5978_v46 = vpop.f32.mrf.mxu3  ;;  %v12044_v35 = vsub.f32 %v13163_v16, %v12030_v11  ;;  %v7871_v15 = vsub.f32 %v7869_v20, %v7870_v50 }
 0x286   : > { %v5926_v32 = vpop.f32.mrf.mxu1  ;;  %7461 = vmatmul.f32.vlgmr.msra.gmra.mxu0 %v11658_v58  ;;  %v5952_v59 = vpop.f32.mrf.mxu2 }
 0x287   : > { %v5927_v19 = vadd.f32 %v5926_v32, %v5905_v56  ;;  %7653 = vmatpush.msra.mxu0 %v7578_v61  ;;  %v5979_v18 = vadd.f32 %v5978_v46, %v5952_v59  ;;  %v8016_v34 = vand.u32 4294901760, %v12044_v35 }
 0x289   : > { %7485 = vmatmul.f32.vlgmr.msra.gmra.mxu1 %v11668_v33  ;;  %v9585_v62 = vmul.f32 %v12033_v25, %v5927_v19  ;;  %v8017_v56 = vsub.f32 %v12044_v35, %v8016_v34  ;;  %v13164_v19 = vld [vmem:[#allocation15_spill] sm:$0xff] }
 0x28a   : > { %7675 = vmatpush.msra.mxu1 %v11985_v63  ;;  %7631 = vmatmul.f32.vlgmr.msrb.gmra.mxu3 %v11724_v21 }
 0x28b   : > { %7821 = vmatpush.msrb.mxu3 %v11988_v40  ;;  %v6002_v8 = vpop.f32.mrf.mxu0  ;;  %7607 = vmatmul.f32.vlgmr.msrb.gmra.mxu2 %v11714_v17  ;;  %v9629_v61 = vsel %vm13134_vm0, %v9585_v62, 0.0  ;;  %v7872_v62 = vand.u32 4294901760, %v7871_v15 }
 0x28c   : > { %v6003_v10 = vadd.f32 %v6002_v8, %v5979_v18  ;;  %7799 = vmatpush.msrb.mxu2 %v7724_v1  ;;  %9630 = vadd.xlane.f32.xlu0 %v9629_v61  ;;  %v13165_v18 = vld [vmem:[#allocation16_spill] sm:$0xff]  ;;  %v8018_v61 = vand.u32 4294901760, %v8017_v56 }
 0x28d   : > { %v6072_v5 = vpop.f32.mrf.mxu3  ;;  %v3556_v16 = vadd.f32 %v13165_v18, %v13164_v19 }
 0x28e   : > { %v6026_v63 = vpop.f32.mrf.mxu1  ;;  %7557 = vmatmul.f32.vlgmr.msrb.gmra.mxu0 %v11750_v36  ;;  %v6050_v13 = vpop.f32.mrf.mxu2 }
 0x28f   : > { %v6027_v7 = vadd.f32 %v6026_v63, %v6003_v10  ;;  %7750 = vmatpush.msrb.mxu0 %v12002_v39  ;;  %v12054_v39 = vld [vmem:[#allocation2 + $0x18] sm:$0xff] }
 0x291   : > { %v6051_v9 = vadd.f32 %v6050_v13, %v6027_v7  ;;  %7583 = vmatmul.f32.vlgmr.msrb.gmra.mxu1 %v11703_v60 }
 0x292   : > { %7773 = vmatpush.msrb.mxu1 %v11988_v40  ;;  %7729 = vmatmul.f32.vlgmr.msra.gmra.mxu3 %v11717_v53 }
 0x293   : > { %v6073_v1 = vadd.f32 %v6072_v5, %v6051_v9  ;;  %7919 = vmatpush.msra.mxu3 %v12027_v30  ;;  %v6098_v51 = vpop.f32.mrf.mxu0  ;;  %7703 = vmatmul.f32.vlgmr.msra.gmra.mxu2 %v11762_v31  ;;  %v13166_v5 = vld [vmem:[#allocation17_spill] sm:$0xff] }
 0x294   : > { %7896 = vmatpush.msra.mxu2 %v7869_v20  ;;  %v3578_v63 = vadd.f32 %v13166_v5, %v3556_v16 }
 0x295   : > { %v6172_v23 = vpop.f32.mrf.mxu3  ;;  %v9586_v37 = vmul.f32 %v12054_v39, %v6073_v1 }
 0x296   : > { %v6124_v46 = vpop.f32.mrf.mxu1  ;;  %7655 = vmatmul.f32.vlgmr.msra.gmra.mxu0 %v11703_v60  ;;  %v6148_v40 = vpop.f32.mrf.mxu2  ;;  %v12069_v15 = vand.u32 4294901760, %v3578_v63 }
 0x297   : > { %v6125_v32 = vadd.f32 %v6124_v46, %v6098_v51  ;;  %7843 = vmatpush.msra.mxu0 %v12027_v30  ;;  %v9632_v59 = vsel %vm13134_vm0, %v9586_v37, 0.0 }
 0x298   : > { %9633 = vadd.xlane.f32.xlu1 %v9632_v59 }
 0x299   : > { %v6149_v8 = vadd.f32 %v6148_v40, %v6125_v32  ;;  %7677 = vmatmul.f32.vlgmr.msra.gmra.mxu1 %v11703_v60  ;;  %v8161_v40 = vsub.f32 %v3578_v63, %v12069_v15 }
 0x29a   : > { %7873 = vmatpush.msra.mxu1 %v7872_v62  ;;  %7823 = vmatmul.f32.vlgmr.msrb.gmra.mxu3 %v11717_v53 }
 0x29b   : > { %v6173_v20 = vadd.f32 %v6172_v23, %v6149_v8  ;;  %8019 = vmatpush.msrb.mxu3 %v8018_v61  ;;  %v6196_v10 = vpop.f32.mrf.mxu0  ;;  %7801 = vmatmul.f32.vlgmr.msrb.gmra.mxu2 %v11717_v53  ;;  %v12072_v23 = vand.u32 4294901760, %v11768_v52  ;;  %v8162_v62 = vand.u32 4294901760, %v8161_v40 }
 0x29c   : > { %7989 = vmatpush.msrb.mxu2 %v12030_v11 }
 0x29d   : > { %v6197_v13 = vadd.f32 %v6196_v10, %v6173_v20  ;;  %v6270_v7 = vpop.f32.mrf.mxu3  ;;  %v12084_v59 = vsub.f32 %v11768_v52, %v12072_v23  ;;  %v8163_v20 = vsub.f32 %v8161_v40, %v8162_v62 }
 0x29e   : > { %v6218_v9 = vpop.f32.mrf.mxu1  ;;  %7753 = vmatmul.f32.vlgmr.msrb.gmra.mxu0 %v11732_v28  ;;  %v6244_v1 = vpop.f32.mrf.mxu2 }
 0x29f   : > { %v6219_v51 = vadd.f32 %v6218_v9, %v6197_v13  ;;  %7945 = vmatpush.msrb.mxu0 %v7870_v50  ;;  %v6271_v37 = vadd.f32 %v6270_v7, %v6244_v1  ;;  %v8308_v8 = vand.u32 4294901760, %v12084_v59  ;;  %v3848_v9 = vadd.f32 %v11779_v29, %v11777_v27 }
 0x2a0   : > { %v8164_v1 = vand.u32 4294901760, %v8163_v20 }
 0x2a1   : > { %7777 = vmatmul.f32.vlgmr.msrb.gmra.mxu1 %v11742_v57  ;;  %v9587_v56 = vmul.f32 %v11991_v45, %v6219_v51  ;;  %v8309_v5 = vsub.f32 %v12084_v59, %v8308_v8 }
 0x2a2   : > { %7967 = vmatpush.msrb.mxu1 %v12027_v30  ;;  %7923 = vmatmul.f32.vlgmr.msra.gmra.mxu3 %v11650_v14 }
 0x2a3   : > { %8113 = vmatpush.msra.mxu3 %v12030_v11  ;;  %v6294_v46 = vpop.f32.mrf.mxu0  ;;  %7899 = vmatmul.f32.vlgmr.msra.gmra.mxu2 %v11640_v6  ;;  %v9635_v50 = vsel %vm13134_vm0, %v9587_v56, 0.0 }
 0x2a4   : > { %v6295_v32 = vadd.f32 %v6294_v46, %v6271_v37  ;;  %8091 = vmatpush.msra.mxu2 %v8016_v34  ;;  %9636 = vadd.xlane.f32.xlu2 %v9635_v50  ;;  %v8310_v37 = vand.u32 4294901760, %v8309_v5  ;;  %v3870_v50 = vadd.f32 %v11784_v4, %v3848_v9 }
 0x2a5   : > { %v6364_v19 = vpop.f32.mrf.mxu3 }
 0x2a6   : > { %v6318_v30 = vpop.f32.mrf.mxu1  ;;  %7849 = vmatmul.f32.vlgmr.msra.gmra.mxu0 %v11678_v38  ;;  %v6342_v18 = vpop.f32.mrf.mxu2 }
 0x2a7   : > { %v6319_v16 = vadd.f32 %v6318_v30, %v6295_v32  ;;  %8042 = vmatpush.msra.mxu0 %v12044_v35  ;;  %v12107_v30 = vand.u32 4294901760, %v3870_v50 }
 0x2a9   : > { %v6343_v61 = vadd.f32 %v6342_v18, %v6319_v16  ;;  %7875 = vmatmul.f32.vlgmr.msra.gmra.mxu1 %v11630_v48  ;;  %v12110_v16 = vand.u32 4294901760, %v11801_v0 }
 0x2aa   : > { %8065 = vmatpush.msra.mxu1 %v12030_v11  ;;  %8021 = vmatmul.f32.vlgmr.msrb.gmra.mxu3 %v11643_v42 }
 0x2ab   : > { %v6365_v52 = vadd.f32 %v6364_v19, %v6343_v61  ;;  %8211 = vmatpush.msrb.mxu3 %v12069_v15  ;;  %v6390_v34 = vpop.f32.mrf.mxu0  ;;  %7995 = vmatmul.f32.vlgmr.msrb.gmra.mxu2 %v11693_v26  ;;  %v12122_v20 = vsub.f32 %v11801_v0, %v12110_v16 }
 0x2ac   : > { %8188 = vmatpush.msrb.mxu2 %v8161_v40 }
 0x2ad   : > { %v6464_v10 = vpop.f32.mrf.mxu3  ;;  %v9588_v35 = vmul.f32 %v12012_v55, %v6365_v52  ;;  %v8453_v52 = vsub.f32 %v3870_v50, %v12107_v30 }
 0x2ae   : > { %v6416_v63 = vpop.f32.mrf.mxu1  ;;  %7947 = vmatmul.f32.vlgmr.msrb.gmra.mxu0 %v11630_v48  ;;  %v6440_v13 = vpop.f32.mrf.mxu2 }
 0x2af   : > { %v6417_v11 = vadd.f32 %v6416_v63, %v6390_v34  ;;  %8135 = vmatpush.msrb.mxu0 %v12069_v15  ;;  %v9638_v7 = vsel %vm13134_vm0, %v9588_v35, 0.0  ;;  %v8454_v63 = vand.u32 4294901760, %v8453_v52 }
 0x2b0   : > { %9639 = vadd.xlane.f32.xlu0 %v9638_v7 }
 0x2b1   : > { %v6441_v51 = vadd.f32 %v6440_v13, %v6417_v11  ;;  %7969 = vmatmul.f32.vlgmr.msrb.gmra.mxu1 %v11630_v48  ;;  %v8600_v13 = vand.u32 4294901760, %v12122_v20  ;;  %v8455_v7 = vsub.f32 %v8453_v52, %v8454_v63 }
 0x2b2   : > { %8165 = vmatpush.msrb.mxu1 %v8164_v1  ;;  %8115 = vmatmul.f32.vlgmr.msra.gmra.mxu3 %v11643_v42 }
 0x2b3   : > { %v6465_v56 = vadd.f32 %v6464_v10, %v6441_v51  ;;  %8311 = vmatpush.msra.mxu3 %v8310_v37  ;;  %v6488_v46 = vpop.f32.mrf.mxu0  ;;  %8093 = vmatmul.f32.vlgmr.msra.gmra.mxu2 %v11643_v42  ;;  %v8601_v1 = vsub.f32 %v12122_v20, %v8600_v13  ;;  %v8456_v50 = vand.u32 4294901760, %v8455_v7 }
 0x2b4   : > { %8281 = vmatpush.msra.mxu2 %v12072_v23 }
 0x2b5   : > { %v6489_v40 = vadd.f32 %v6488_v46, %v6465_v56  ;;  %v6562_v27 = vpop.f32.mrf.mxu3  ;;  %v4140_v46 = vadd.f32 %v11811_v47, %v11809_v49 }
 0x2b6   : > { %v6510_v29 = vpop.f32.mrf.mxu1  ;;  %8045 = vmatmul.f32.vlgmr.msra.gmra.mxu0 %v11658_v58  ;;  %v6536_v32 = vpop.f32.mrf.mxu2 }
 0x2b7   : > { %v6511_v19 = vadd.f32 %v6510_v29, %v6489_v40  ;;  %8237 = vmatpush.msra.mxu0 %v8162_v62  ;;  %v6563_v18 = vadd.f32 %v6562_v27, %v6536_v32  ;;  %v8602_v27 = vand.u32 4294901760, %v8601_v1 }
 0x2b9   : > { %8069 = vmatmul.f32.vlgmr.msra.gmra.mxu1 %v11668_v33  ;;  %v9589_v4 = vmul.f32 %v12033_v25, %v6511_v19  ;;  %v4162_v19 = vadd.f32 %v11816_v44, %v4140_v46 }
 0x2ba   : > { %8259 = vmatpush.msra.mxu1 %v12069_v15  ;;  %8215 = vmatmul.f32.vlgmr.msrb.gmra.mxu3 %v11724_v21 }
 0x2bb   : > { %8405 = vmatpush.msrb.mxu3 %v12072_v23  ;;  %v6586_v61 = vpop.f32.mrf.mxu0  ;;  %8191 = vmatmul.f32.vlgmr.msrb.gmra.mxu2 %v11714_v17  ;;  %v9641_v62 = vsel %vm13134_vm0, %v9589_v4, 0.0 }
 0x2bc   : > { %v6587_v34 = vadd.f32 %v6586_v61, %v6563_v18  ;;  %8383 = vmatpush.msrb.mxu2 %v8308_v8  ;;  %9642 = vadd.xlane.f32.xlu1 %v9641_v62  ;;  %v12145_v62 = vand.u32 4294901760, %v4162_v19 }
 0x2bd   : > { %v6656_v10 = vpop.f32.mrf.mxu3 }
 0x2be   : > { %v6610_v15 = vpop.f32.mrf.mxu1  ;;  %8141 = vmatmul.f32.vlgmr.msrb.gmra.mxu0 %v11750_v36  ;;  %v6634_v35 = vpop.f32.mrf.mxu2 }
 0x2bf   : > { %v6611_v5 = vadd.f32 %v6610_v15, %v6587_v34  ;;  %8334 = vmatpush.msrb.mxu0 %v12084_v59  ;;  %v12148_v34 = vand.u32 4294901760, %v11832_v2 }
 0x2c1   : > { %v6635_v11 = vadd.f32 %v6634_v35, %v6611_v5  ;;  %8167 = vmatmul.f32.vlgmr.msrb.gmra.mxu1 %v11703_v60  ;;  %v8745_v35 = vsub.f32 %v4162_v19, %v12145_v62 }
 0x2c2   : > { %8357 = vmatpush.msrb.mxu1 %v12072_v23  ;;  %8313 = vmatmul.f32.vlgmr.msra.gmra.mxu3 %v11717_v53 }
 0x2c3   : > { %v6657_v0 = vadd.f32 %v6656_v10, %v6635_v11  ;;  %8503 = vmatpush.msra.mxu3 %v12107_v30  ;;  %v6682_v8 = vpop.f32.mrf.mxu0  ;;  %8287 = vmatmul.f32.vlgmr.msra.gmra.mxu2 %v11762_v31  ;;  %v8746_v7 = vand.u32 4294901760, %v8745_v35 }
 0x2c4   : > { %8480 = vmatpush.msra.mxu2 %v8453_v52 }
 0x2c5   : > { %v6756_v9 = vpop.f32.mrf.mxu3  ;;  %v9590_v59 = vmul.f32 %v12054_v39, %v6657_v0  ;;  %v8747_v1 = vsub.f32 %v8745_v35, %v8746_v7 }
 0x2c6   : > { %v6708_v51 = vpop.f32.mrf.mxu1  ;;  %8239 = vmatmul.f32.vlgmr.msra.gmra.mxu0 %v11703_v60  ;;  %v6732_v37 = vpop.f32.mrf.mxu2 }
 0x2c7   : > { %v6709_v23 = vadd.f32 %v6708_v51, %v6682_v8  ;;  %8427 = vmatpush.msra.mxu0 %v12107_v30  ;;  %v9644_v56 = vsel %vm13134_vm0, %v9590_v59, 0.0 }
 0x2c8   : > { %9645 = vadd.xlane.f32.xlu2 %v9644_v56 }
 0x2c9   : > { %v6733_v40 = vadd.f32 %v6732_v37, %v6709_v23  ;;  %8261 = vmatmul.f32.vlgmr.msra.gmra.mxu1 %v11703_v60 }
 0x2ca   : > { %8457 = vmatpush.msra.mxu1 %v8456_v50  ;;  %8407 = vmatmul.f32.vlgmr.msrb.gmra.mxu3 %v11717_v53  ;;  %v4432_v50 = vadd.f32 %v11842_v12, %v11840_v41 }
 0x2cb   : > { %v6757_v29 = vadd.f32 %v6756_v9, %v6733_v40  ;;  %8603 = vmatpush.msrb.mxu3 %v8602_v27  ;;  %v6780_v32 = vpop.f32.mrf.mxu0  ;;  %8385 = vmatmul.f32.vlgmr.msrb.gmra.mxu2 %v11717_v53  ;;  %v8748_v40 = vand.u32 4294901760, %v8747_v1 }
 0x2cc   : > { %8573 = vmatpush.msrb.mxu2 %v12110_v16 }
 0x2cd   : > { %v6781_v18 = vadd.f32 %v6780_v32, %v6757_v29  ;;  %v6854_v49 = vpop.f32.mrf.mxu3 }
 0x2ce   : > { %v6802_v47 = vpop.f32.mrf.mxu1  ;;  %8337 = vmatmul.f32.vlgmr.msrb.gmra.mxu0 %v11732_v28  ;;  %v6828_v4 = vpop.f32.mrf.mxu2 }
 0x2cf   : > { %v6803_v61 = vadd.f32 %v6802_v47, %v6781_v18  ;;  %8529 = vmatpush.msrb.mxu0 %v8454_v63  ;;  %v6855_v52 = vadd.f32 %v6854_v49, %v6828_v4  ;;  %v12160_v63 = vsub.f32 %v11832_v2, %v12148_v34  ;;  %v4454_v18 = vadd.f32 %v11847_v22, %v4432_v50 }
 0x2d1   : > { %8361 = vmatmul.f32.vlgmr.msrb.gmra.mxu1 %v11742_v57  ;;  %v9591_v44 = vmul.f32 %v11991_v45, %v6803_v61  ;;  %v8892_v9 = vand.u32 4294901760, %v12160_v63  ;;  %v12183_v61 = vand.u32 4294901760, %v4454_v18 }
 0x2d2   : > { %8551 = vmatpush.msrb.mxu1 %v12107_v30  ;;  %8507 = vmatmul.f32.vlgmr.msra.gmra.mxu3 %v11650_v14 }
 0x2d3   : > { %8697 = vmatpush.msra.mxu3 %v12110_v16  ;;  %v6878_v10 = vpop.f32.mrf.mxu0  ;;  %8483 = vmatmul.f32.vlgmr.msra.gmra.mxu2 %v11640_v6  ;;  %v9647_v15 = vsel %vm13134_vm0, %v9591_v44, 0.0  ;;  %v8893_v37 = vsub.f32 %v12160_v63, %v8892_v9  ;;  %v12186_v44 = vand.u32 4294901760, %v11863_v43 }
 0x2d4   : > { %v6879_v5 = vadd.f32 %v6878_v10, %v6855_v52  ;;  %8675 = vmatpush.msra.mxu2 %v8600_v13  ;;  %9648 = vadd.xlane.f32.xlu0 %v9647_v15 }
 0x2d5   : > { %v6948_v11 = vpop.f32.mrf.mxu3  ;;  %v8894_v29 = vand.u32 4294901760, %v8893_v37 }
 0x2d6   : > { %v6902_v30 = vpop.f32.mrf.mxu1  ;;  %8433 = vmatmul.f32.vlgmr.msra.gmra.mxu0 %v11678_v38  ;;  %v6926_v0 = vpop.f32.mrf.mxu2 }
 0x2d7   : > { %v6903_v8 = vadd.f32 %v6902_v30, %v6879_v5  ;;  %8626 = vmatpush.msra.mxu0 %v12122_v20 }
 0x2d9   : > { %v6927_v59 = vadd.f32 %v6926_v0, %v6903_v8  ;;  %8459 = vmatmul.f32.vlgmr.msra.gmra.mxu1 %v11630_v48 }
 0x2da   : > { %8649 = vmatpush.msra.mxu1 %v12110_v16  ;;  %8605 = vmatmul.f32.vlgmr.msrb.gmra.mxu3 %v11643_v42 }
 0x2db   : > { %v6949_v2 = vadd.f32 %v6948_v11, %v6927_v59  ;;  %8795 = vmatpush.msrb.mxu3 %v12145_v62  ;;  %v6974_v13 = vpop.f32.mrf.mxu0  ;;  %8579 = vmatmul.f32.vlgmr.msrb.gmra.mxu2 %v11693_v26  ;;  %v12198_v11 = vsub.f32 %v11863_v43, %v12186_v44 }
 0x2dc   : > { %8772 = vmatpush.msrb.mxu2 %v8745_v35  ;;  %v9037_v35 = vsub.f32 %v4454_v18, %v12183_v61 }
 0x2dd   : > { %v7048_v51 = vpop.f32.mrf.mxu3  ;;  %v9592_v20 = vmul.f32 %v12012_v55, %v6949_v2  ;;  %v9184_v59 = vand.u32 4294901760, %v12198_v11 }
 0x2de   : > { %v7000_v23 = vpop.f32.mrf.mxu1  ;;  %8531 = vmatmul.f32.vlgmr.msrb.gmra.mxu0 %v11630_v48  ;;  %v7024_v56 = vpop.f32.mrf.mxu2 }
 0x2df   : > { %v7001_v16 = vadd.f32 %v7000_v23, %v6974_v13  ;;  %8719 = vmatpush.msrb.mxu0 %v12145_v62  ;;  %v9650_v46 = vsel %vm13134_vm0, %v9592_v20, 0.0 }
 0x2e0   : > { %9651 = vadd.xlane.f32.xlu1 %v9650_v46 }
 0x2e1   : > { %v7025_v27 = vadd.f32 %v7024_v56, %v7001_v16  ;;  %8553 = vmatmul.f32.vlgmr.msrb.gmra.mxu1 %v11630_v48  ;;  %v4724_v56 = vadd.f32 %v11873_v24, %v11871_v54  ;;  %v12222_v54 = vpop.xlane.xlu1 %9618 }
 0x2e2   : > { %8749 = vmatpush.msrb.mxu1 %v8748_v40  ;;  %8699 = vmatmul.f32.vlgmr.msra.gmra.mxu3 %v11643_v42 }
 0x2e3   : > { %v7049_v32 = vadd.f32 %v7048_v51, %v7025_v27  ;;  %8895 = vmatpush.msra.mxu3 %v8894_v29  ;;  %v7072_v19 = vpop.f32.mrf.mxu0  ;;  %8677 = vmatmul.f32.vlgmr.msra.gmra.mxu2 %v11643_v42  ;;  %v9185_v51 = vsub.f32 %v12198_v11, %v9184_v59  ;;  %v4746_v29 = vadd.f32 %v11878_v3, %v4724_v56 }
 0x2e4   : > { %8865 = vmatpush.msra.mxu2 %v12148_v34 }
 0x2e5   : > { %v7073_v49 = vadd.f32 %v7072_v19, %v7049_v32  ;;  %v7146_v41 = vpop.f32.mrf.mxu3  ;;  %v9186_v50 = vand.u32 4294901760, %v9185_v51  ;;  %v12219_v32 = vpop.xlane.xlu0 %9612 }
 0x2e6   : > { %v7094_v12 = vpop.f32.mrf.mxu1  ;;  %8629 = vmatmul.f32.vlgmr.msra.gmra.mxu0 %v11658_v58  ;;  %v7120_v47 = vpop.f32.mrf.mxu2 }
 0x2e7   : > { %v7095_v4 = vadd.f32 %v7094_v12, %v7073_v49  ;;  %8821 = vmatpush.msra.mxu0 %v8746_v7  ;;  %v7147_v52 = vadd.f32 %v7146_v41, %v7120_v47  ;;  %v9038_v7 = vand.u32 4294901760, %v9037_v35  ;;  %v12225_v12 = vand.u32 4294901760, %v4746_v29  ;;  %v13167_v47 = vld [vmem:[#allocation18_spill] sm:$0xff] }
 0x2e9   : > { %8653 = vmatmul.f32.vlgmr.msra.gmra.mxu1 %v11668_v33  ;;  %v9593_v22 = vmul.f32 %v12033_v25, %v7095_v4  ;;  %v9039_v13 = vsub.f32 %v9037_v35, %v9038_v7  ;;  %v12228_v4 = vand.u32 4294901760, %v13167_v47 }
 0x2ea   : > { %8843 = vmatpush.msra.mxu1 %v12145_v62  ;;  %8799 = vmatmul.f32.vlgmr.msrb.gmra.mxu3 %v11724_v21 }
 0x2eb   : > { %8989 = vmatpush.msrb.mxu3 %v12148_v34  ;;  %v7170_v10 = vpop.f32.mrf.mxu0  ;;  %8775 = vmatmul.f32.vlgmr.msrb.gmra.mxu2 %v11714_v17  ;;  %v9653_v15 = vsel %vm13134_vm0, %v9593_v22, 0.0  ;;  %v9040_v16 = vand.u32 4294901760, %v9039_v13  ;;  %v9739_v22 = vlaneseq }
 0x2ec   : > { %v7171_v5 = vadd.f32 %v7170_v10, %v7147_v52  ;;  %8967 = vmatpush.msrb.mxu2 %v8892_v9  ;;  %9654 = vadd.xlane.f32.xlu2 %v9653_v15  ;;  %v12234_v10 = vpop.xlane.xlu2 %9624 }
 0x2ed   : > { %v7240_v30 = vpop.f32.mrf.mxu3 }
 0x2ee   : > { %v7194_v62 = vpop.f32.mrf.mxu1  ;;  %8725 = vmatmul.f32.vlgmr.msrb.gmra.mxu0 %v11750_v36  ;;  %v7218_v0 = vpop.f32.mrf.mxu2 }
 0x2ef   : > { %v7195_v8 = vadd.f32 %v7194_v62, %v7171_v5  ;;  %8918 = vmatpush.msrb.mxu0 %v12160_v63  ;;  %v12240_v5 = vsub.f32 %v4746_v29, %v12225_v12 }
 0x2f1   : > { %v7219_v2 = vadd.f32 %v7218_v0, %v7195_v8  ;;  %8751 = vmatmul.f32.vlgmr.msrb.gmra.mxu1 %v11703_v60  ;;  %v12251_v8 = vand.u32 127, %v9739_v22 }
 0x2f2   : > { %8941 = vmatpush.msrb.mxu1 %v12148_v34  ;;  %8897 = vmatmul.f32.vlgmr.msra.gmra.mxu3 %v11717_v53 }
 0x2f3   : > { %v7241_v43 = vadd.f32 %v7240_v30, %v7219_v2  ;;  %9087 = vmatpush.msra.mxu3 %v12183_v61  ;;  %v7266_v9 = vpop.f32.mrf.mxu0  ;;  %8871 = vmatmul.f32.vlgmr.msra.gmra.mxu2 %v11762_v31  ;;  %v12248_v30 = vpop.xlane.xlu1 %9621  ;;  %v9330_v2 = vand.u32 4294901760, %v12240_v5 }
 0x2f4   : > { %9064 = vmatpush.msra.mxu2 %v9037_v35  ;;  %v12265_v13 = vpop.xlane.xlu2 %9627  ;;  %v9744_v51 = vperm.slane %v12248_v30, %v12251_v8 }
 0x2f5   : > { %v7340_v1 = vpop.f32.mrf.mxu3  ;;  %v9594_v63 = vmul.f32 %v12054_v39, %v7241_v43 }
 0x2f6   : > { %v7292_v20 = vpop.f32.mrf.mxu1  ;;  %8823 = vmatmul.f32.vlgmr.msra.gmra.mxu0 %v11703_v60  ;;  %v7316_v37 = vpop.f32.mrf.mxu2 }
 0x2f7   : > { %v7293_v34 = vadd.f32 %v7292_v20, %v7266_v9  ;;  %9011 = vmatpush.msra.mxu0 %v12183_v61  ;;  %v9656_v23 = vsel %vm13134_vm0, %v9594_v63, 0.0 }
 0x2f8   : > { %9657 = vadd.xlane.f32.xlu0 %v9656_v23 }
 0x2f9   : > { %v7317_v46 = vadd.f32 %v7316_v37, %v7293_v34  ;;  %8845 = vmatmul.f32.vlgmr.msra.gmra.mxu1 %v11703_v60 }
 0x2fa   : > { %9041 = vmatpush.msra.mxu1 %v9040_v16  ;;  %8991 = vmatmul.f32.vlgmr.msrb.gmra.mxu3 %v11717_v53 }
 0x2fb   : > { %v7341_v40 = vadd.f32 %v7340_v1, %v7317_v46  ;;  %9187 = vmatpush.msrb.mxu3 %v9186_v50  ;;  %v7364_v27 = vpop.f32.mrf.mxu0  ;;  %8969 = vmatmul.f32.vlgmr.msrb.gmra.mxu2 %v11717_v53  ;;  %v9746_v50 = vperm.slane %v12265_v13, %v12251_v8 }
 0x2fc   : > { %9157 = vmatpush.msrb.mxu2 %v12186_v44 }
 0x2fd   : > { %v7365_v24 = vadd.f32 %v7364_v27, %v7341_v40  ;;  %v7438_v19 = vpop.f32.mrf.mxu3 }
 0x2fe   : > { %v7386_v18 = vpop.f32.mrf.mxu1  ;;  %8921 = vmatmul.f32.vlgmr.msrb.gmra.mxu0 %v11732_v28  ;;  %v7412_v49 = vpop.f32.mrf.mxu2 }
 0x2ff   : > { %v7387_v41 = vadd.f32 %v7386_v18, %v7365_v24  ;;  %9113 = vmatpush.msrb.mxu0 %v9038_v7  ;;  %v7439_v3 = vadd.f32 %v7438_v19, %v7412_v49 }
 0x301   : > { %8945 = vmatmul.f32.vlgmr.msrb.gmra.mxu1 %v11742_v57  ;;  %v9595_v52 = vmul.f32 %v11991_v45, %v7387_v41  ;;  %v12244_v45 = vsub.f32 %v13167_v47, %v12228_v4 }
 0x302   : > { %9135 = vmatpush.msrb.mxu1 %v12183_v61  ;;  %9091 = vmatmul.f32.vlgmr.msra.gmra.mxu3 %v11650_v14  ;;  %v12246_v61 = vpop.xlane.xlu0 %9615 }
 0x303   : > { %9281 = vmatpush.msra.mxu3 %v12186_v44  ;;  %v7462_v15 = vpop.f32.mrf.mxu0  ;;  %9067 = vmatmul.f32.vlgmr.msra.gmra.mxu2 %v11640_v6  ;;  %v9659_v35 = vsel %vm13134_vm0, %v9595_v52, 0.0  ;;  %v9476_v43 = vand.u32 4294901760, %v12244_v45 }
 0x304   : > { %v7463_v14 = vadd.f32 %v7462_v15, %v7439_v3  ;;  %9259 = vmatpush.msra.mxu2 %v9184_v59  ;;  %9660 = vadd.xlane.f32.xlu1 %v9659_v35  ;;  %v9742_v59 = vperm.slane %v12246_v61, %v12251_v8 }
 0x305   : > { %v7532_v62 = vpop.f32.mrf.mxu3  ;;  %v9477_v37 = vsub.f32 %v12244_v45, %v9476_v43 }
 0x306   : > { %v7486_v0 = vpop.f32.mrf.mxu1  ;;  %9017 = vmatmul.f32.vlgmr.msra.gmra.mxu0 %v11678_v38  ;;  %v7510_v6 = vpop.f32.mrf.mxu2  ;;  %v9743_v38 = vperm.slane %v12222_v54, %v12251_v8 }
 0x307   : > { %v7487_v7 = vadd.f32 %v7486_v0, %v7463_v14  ;;  %9210 = vmatpush.msra.mxu0 %v12198_v11  ;;  %v9741_v11 = vperm.slane %v12219_v32, %v12251_v8  ;;  %v9478_v52 = vand.u32 4294901760, %v9477_v37 }
 0x309   : > { %v7511_v9 = vadd.f32 %v7510_v6, %v7487_v7  ;;  %9043 = vmatmul.f32.vlgmr.msra.gmra.mxu1 %v11630_v48  ;;  %v9774_v34 = vsel %vm13141_vm1, %v9742_v59, %v9741_v11 }
 0x30a   : > { %9233 = vmatpush.msra.mxu1 %v12186_v44  ;;  %9189 = vmatmul.f32.vlgmr.msrb.gmra.mxu3 %v11643_v42  ;;  %v12271_v20 = vpop.xlane.xlu0 %9630  ;;  %v9331_v44 = vsub.f32 %v12240_v5, %v9330_v2  ;;  %v9776_v46 = vsel %vm13140_vm2, %v9743_v38, %v9774_v34 }
 0x30b   : > { %v7533_v1 = vadd.f32 %v7532_v62, %v7511_v9  ;;  %9379 = vmatpush.msrb.mxu3 %v12225_v12  ;;  %v7558_v63 = vpop.f32.mrf.mxu0  ;;  %9163 = vmatmul.f32.vlgmr.msrb.gmra.mxu2 %v11693_v26  ;;  %v9745_v26 = vperm.slane %v12234_v10, %v12251_v8  ;;  %v12283_v23 = vpop.xlane.xlu1 %9633  ;;  %v9747_v29 = vperm.slane %v12271_v20, %v12251_v8 }
 0x30c   : > { %9356 = vmatpush.msrb.mxu2 %v12240_v5  ;;  %v9778_v18 = vsel %vm13139_vm3, %v9744_v51, %v9776_v46  ;;  %v9748_v49 = vperm.slane %v12283_v23, %v12251_v8  ;;  %v9332_v41 = vand.u32 4294901760, %v9331_v44 }
 0x30d   : > { %v7632_v56 = vpop.f32.mrf.mxu3  ;;  %v9596_v16 = vmul.f32 %v12012_v55, %v7533_v1  ;;  %v9780_v47 = vsel %vm13138_vm4, %v9745_v26, %v9778_v18 }
 0x30e   : > { %v7584_v40 = vpop.f32.mrf.mxu1  ;;  %9115 = vmatmul.f32.vlgmr.msrb.gmra.mxu0 %v11630_v48  ;;  %v7608_v27 = vpop.f32.mrf.mxu2  ;;  %v9782_v22 = vsel %vm13137_vm5, %v9746_v50, %v9780_v47 }
 0x30f   : > { %v7585_v24 = vadd.f32 %v7584_v40, %v7558_v63  ;;  %9303 = vmatpush.msrb.mxu0 %v12225_v12  ;;  %v9662_v19 = vsel %vm13134_vm0, %v9596_v16, 0.0  ;;  %v9784_v14 = vsel %vm13136_vm6, %v9747_v29, %v9782_v22 }
 0x310   : > { %9663 = vadd.xlane.f32.xlu2 %v9662_v19  ;;  %v9786_v62 = vsel %vm13135_vm7, %v9748_v49, %v9784_v14 }
 0x311   : > { %v7609_v3 = vadd.f32 %v7608_v27, %v7585_v24  ;;  %9137 = vmatmul.f32.vlgmr.msrb.gmra.mxu1 %v11630_v48  ;;  %v9812_v9 = vsel %vm13134_vm0, %v9786_v62, 0.0  ;;  %v12331_v27 = vld [vmem:[#allocation2] sm:$0xff] }
 0x312   : > { %9333 = vmatpush.msrb.mxu1 %v9332_v41  ;;  %9283 = vmatmul.f32.vlgmr.msra.gmra.mxu3 %v11643_v42 }
 0x313   : > { %v7633_v15 = vadd.f32 %v7632_v56, %v7609_v3  ;;  %9479 = vmatpush.msra.mxu3 %v9478_v52  ;;  %v7656_v35 = vpop.f32.mrf.mxu0  ;;  %9261 = vmatmul.f32.vlgmr.msra.gmra.mxu2 %v11643_v42 }
 0x314   : > { %9449 = vmatpush.msra.mxu2 %v12228_v4 }
 0x315   : > { %v7657_v0 = vadd.f32 %v7656_v35, %v7633_v15  ;;  %v7730_v48 = vpop.f32.mrf.mxu3 }
 0x316   : > { %v7678_v6 = vpop.f32.mrf.mxu1  ;;  %9213 = vmatmul.f32.vlgmr.msra.gmra.mxu0 %v11658_v58  ;;  %v7704_v7 = vpop.f32.mrf.mxu2 }
 0x317   : > { %v7679_v59 = vadd.f32 %v7678_v6, %v7657_v0  ;;  %9405 = vmatpush.msra.mxu0 %v9330_v2  ;;  %v7731_v38 = vadd.f32 %v7730_v48, %v7704_v7 }
 0x318   : > { %9813 = vadd.xlane.f32.xlu2 %v9812_v9 }
 0x319   : > { %9237 = vmatmul.f32.vlgmr.msra.gmra.mxu1 %v11668_v33  ;;  %v9597_v42 = vmul.f32 %v12033_v25, %v7679_v59 }
 0x31a   : > { %9427 = vmatpush.msra.mxu1 %v12225_v12  ;;  %9383 = vmatmul.f32.vlgmr.msrb.gmra.mxu3 %v11724_v21 }
 0x31b   : > { %9573 = vmatpush.msrb.mxu3 %v12228_v4  ;;  %v7754_v58 = vpop.f32.mrf.mxu0  ;;  %9359 = vmatmul.f32.vlgmr.msrb.gmra.mxu2 %v11714_v17  ;;  %v9665_v5 = vsel %vm13134_vm0, %v9597_v42, 0.0 }
 0x31c   : > { %v7755_v2 = vadd.f32 %v7754_v58, %v7731_v38  ;;  %9551 = vmatpush.msrb.mxu2 %v9476_v43  ;;  %9666 = vadd.xlane.f32.xlu0 %v9665_v5 }
 0x31d   : > { %v7824_v11 = vpop.f32.mrf.mxu3 }
 0x31e   : > { %v7778_v33 = vpop.f32.mrf.mxu1  ;;  %9309 = vmatmul.f32.vlgmr.msrb.gmra.mxu0 %v11750_v36  ;;  %v7802_v1 = vpop.f32.mrf.mxu2 }
 0x31f   : > { %v7779_v12 = vadd.f32 %v7778_v33, %v7755_v2  ;;  %9502 = vmatpush.msrb.mxu0 %v12244_v45 }
 0x321   : > { %v7803_v21 = vadd.f32 %v7802_v1, %v7779_v12  ;;  %9335 = vmatmul.f32.vlgmr.msrb.gmra.mxu1 %v11703_v60 }
 0x322   : > { %9525 = vmatpush.msrb.mxu1 %v12228_v4  ;;  %9481 = vmatmul.f32.vlgmr.msra.gmra.mxu3 %v11717_v53 }
 0x323   : > { %v7825_v17 = vadd.f32 %v7824_v11, %v7803_v21  ;;  %v7850_v63 = vpop.f32.mrf.mxu0  ;;  %9455 = vmatmul.f32.vlgmr.msra.gmra.mxu2 %v11762_v31 }
 0x325   : > { %v7924_v43 = vpop.f32.mrf.mxu3  ;;  %v9598_v51 = vmul.f32 %v12054_v39, %v7825_v17 }
 0x326   : > { %v7876_v44 = vpop.f32.mrf.mxu1  ;;  %9407 = vmatmul.f32.vlgmr.msra.gmra.mxu0 %v11703_v60  ;;  %v7900_v36 = vpop.f32.mrf.mxu2 }
 0x327   : > { %v7877_v37 = vadd.f32 %v7876_v44, %v7850_v63  ;;  %v9668_v45 = vsel %vm13134_vm0, %v9598_v51, 0.0 }
 0x328   : > { %9669 = vadd.xlane.f32.xlu1 %v9668_v45 }
 0x329   : > { %v7901_v34 = vadd.f32 %v7900_v36, %v7877_v37  ;;  %9429 = vmatmul.f32.vlgmr.msra.gmra.mxu1 %v11703_v60 }
 0x32a   : > { %9575 = vmatmul.f32.vlgmr.msrb.gmra.mxu3 %v11717_v53 }
 0x32b   : > { %v7925_v4 = vadd.f32 %v7924_v43, %v7901_v34  ;;  %v7948_v26 = vpop.f32.mrf.mxu0  ;;  %9553 = vmatmul.f32.vlgmr.msrb.gmra.mxu2 %v11717_v53 }
 0x32d   : > { %v7949_v31 = vadd.f32 %v7948_v26, %v7925_v4  ;;  %v8022_v56 = vpop.f32.mrf.mxu3 }
 0x32e   : > { %v7970_v16 = vpop.f32.mrf.mxu1  ;;  %v7996_v46 = vpop.f32.mrf.mxu2  ;;  %9505 = vmatmul.f32.vlgmr.msrb.gmra.mxu0 %v11732_v28 }
 0x32f   : > { %v7971_v50 = vadd.f32 %v7970_v16, %v7949_v31  ;;  %v8023_v40 = vadd.f32 %v8022_v56, %v7996_v46 }
 0x331   : > { %v9599_v29 = vmul.f32 %v12331_v27, %v7971_v50  ;;  %9529 = vmatmul.f32.vlgmr.msrb.gmra.mxu1 %v11742_v57 }
 0x333   : > { %v8046_v60 = vpop.f32.mrf.mxu0  ;;  %v9671_v24 = vsel %vm13134_vm0, %v9599_v29, 0.0 }
 0x334   : > { %v8047_v19 = vadd.f32 %v8046_v60, %v8023_v40  ;;  %9672 = vadd.xlane.f32.xlu2 %v9671_v24 }
 0x335   : > { %v8116_v53 = vpop.f32.mrf.mxu3 }
 0x336   : > { %v8070_v18 = vpop.f32.mrf.mxu1  ;;  %v8094_v49 = vpop.f32.mrf.mxu2 }
 0x337   : > { %v8071_v41 = vadd.f32 %v8070_v18, %v8047_v19 }
 0x339   : > { %v8095_v47 = vadd.f32 %v8094_v49, %v8071_v41  ;;  %v12344_v41 = vpop.xlane.xlu2 %9636 }
 0x33b   : > { %v8117_v3 = vadd.f32 %v8116_v53, %v8095_v47  ;;  %v8142_v28 = vpop.f32.mrf.mxu0 }
 0x33d   : > { %v8216_v52 = vpop.f32.mrf.mxu3  ;;  %v9600_v22 = vmul.f32 %v12012_v55, %v8117_v3 }
 0x33e   : > { %v8168_v15 = vpop.f32.mrf.mxu1  ;;  %v8192_v35 = vpop.f32.mrf.mxu2 }
 0x33f   : > { %v8169_v14 = vadd.f32 %v8168_v15, %v8142_v28  ;;  %v9674_v57 = vsel %vm13134_vm0, %v9600_v22, 0.0 }
 0x340   : > { %9675 = vadd.xlane.f32.xlu0 %v9674_v57 }
 0x341   : > { %v8193_v62 = vadd.f32 %v8192_v35, %v8169_v14 }
 0x343   : > { %v8217_v0 = vadd.f32 %v8216_v52, %v8193_v62  ;;  %v8240_v48 = vpop.f32.mrf.mxu0  ;;  %v12346_v52 = vld [vmem:[#allocation2 + $0x8] sm:$0xff] }
 0x345   : > { %v8241_v6 = vadd.f32 %v8240_v48, %v8217_v0  ;;  %v8314_v7 = vpop.f32.mrf.mxu3  ;;  %v12350_v0 = vpop.xlane.xlu2 %9645 }
 0x346   : > { %v8262_v59 = vpop.f32.mrf.mxu1  ;;  %v8288_v9 = vpop.f32.mrf.mxu2 }
 0x347   : > { %v8263_v38 = vadd.f32 %v8262_v59, %v8241_v6  ;;  %v8315_v42 = vadd.f32 %v8314_v7, %v8288_v9 }
 0x349   : > { %v9601_v58 = vmul.f32 %v12033_v25, %v8263_v38 }
 0x34b   : > { %v8338_v5 = vpop.f32.mrf.mxu0  ;;  %v9677_v55 = vsel %vm13134_vm0, %v9601_v58, 0.0 }
 0x34c   : > { %v8339_v2 = vadd.f32 %v8338_v5, %v8315_v42  ;;  %9678 = vadd.xlane.f32.xlu1 %v9677_v55  ;;  %v12352_v5 = vld [vmem:[#allocation2 + $0x10] sm:$0xff] }
 0x34d   : > { %v8408_v11 = vpop.f32.mrf.mxu3 }
 0x34e   : > { %v8362_v33 = vpop.f32.mrf.mxu1  ;;  %v8386_v1 = vpop.f32.mrf.mxu2 }
 0x34f   : > { %v8363_v12 = vadd.f32 %v8362_v33, %v8339_v2 }
 0x351   : > { %v8387_v21 = vadd.f32 %v8386_v1, %v8363_v12 }
 0x353   : > { %v8409_v17 = vadd.f32 %v8408_v11, %v8387_v21  ;;  %v8434_v63 = vpop.f32.mrf.mxu0 }
 0x355   : > { %v8508_v43 = vpop.f32.mrf.mxu3  ;;  %v9602_v51 = vmul.f32 %v12054_v39, %v8409_v17 }
 0x356   : > { %v8460_v44 = vpop.f32.mrf.mxu1  ;;  %v8484_v36 = vpop.f32.mrf.mxu2 }
 0x357   : > { %v8461_v37 = vadd.f32 %v8460_v44, %v8434_v63  ;;  %v9680_v25 = vsel %vm13134_vm0, %v9602_v51, 0.0 }
 0x358   : > { %9681 = vadd.xlane.f32.xlu2 %v9680_v25  ;;  %v12360_v25 = vld [vmem:[#allocation2 + $0x18] sm:$0xff] }
 0x359   : > { %v8485_v45 = vadd.f32 %v8484_v36, %v8461_v37 }
 0x35b   : > { %v8509_v34 = vadd.f32 %v8508_v43, %v8485_v45  ;;  %v8532_v4 = vpop.f32.mrf.mxu0 }
 0x35d   : > { %v8533_v26 = vadd.f32 %v8532_v4, %v8509_v34  ;;  %v8606_v31 = vpop.f32.mrf.mxu3 }
 0x35e   : > { %v8554_v56 = vpop.f32.mrf.mxu1  ;;  %v8580_v16 = vpop.f32.mrf.mxu2 }
 0x35f   : > { %v8555_v46 = vadd.f32 %v8554_v56, %v8533_v26  ;;  %v8607_v50 = vadd.f32 %v8606_v31, %v8580_v16  ;;  %v12355_v2 = vpop.xlane.xlu2 %9654 }
 0x361   : > { %v9603_v40 = vmul.f32 %v12331_v27, %v8555_v46 }
 0x363   : > { %v8630_v29 = vpop.f32.mrf.mxu0  ;;  %v9683_v39 = vsel %vm13134_vm0, %v9603_v40, 0.0  ;;  %v11024_v40 = vmov 0  }
 0x364   : > { %v8631_v60 = vadd.f32 %v8630_v29, %v8607_v50  ;;  %9684 = vadd.xlane.f32.xlu0 %v9683_v39  ;;  %10783 = vset.pattern.permute.xlu1 %v11024_v40 }
 0x365   : > { %v8700_v24 = vpop.f32.mrf.mxu3  ;;  %10784 = vset.pattern.permute.xlu2 %v11024_v40  ;;  %10782 = vset.pattern.permute.xlu0 %v11024_v40 }
 0x366   : > { %v8654_v19 = vpop.f32.mrf.mxu1  ;;  %v8678_v53 = vpop.f32.mrf.mxu2 }
 0x367   : > { %v8655_v18 = vadd.f32 %v8654_v19, %v8631_v60 }
 0x369   : > { %v8679_v49 = vadd.f32 %v8678_v53, %v8655_v18 }
 0x36b   : > { %v8701_v47 = vadd.f32 %v8700_v24, %v8679_v49  ;;  %v8726_v3 = vpop.f32.mrf.mxu0 }
 0x36d   : > { %v8800_v28 = vpop.f32.mrf.mxu3  ;;  %v9604_v22 = vmul.f32 %v12346_v52, %v8701_v47 }
 0x36e   : > { %v8752_v15 = vpop.f32.mrf.mxu1  ;;  %v8776_v35 = vpop.f32.mrf.mxu2 }
 0x36f   : > { %v8753_v14 = vadd.f32 %v8752_v15, %v8726_v3  ;;  %v9686_v57 = vsel %vm13134_vm0, %v9604_v22, 0.0  ;;  %v12380_v22 = vpop.xlane.xlu0 %9639 }
 0x370   : > { %9687 = vadd.xlane.f32.xlu1 %v9686_v57 }
 0x371   : > { %v8777_v62 = vadd.f32 %v8776_v35, %v8753_v14  ;;  %v12383_v14 = vpop.xlane.xlu1 %9642 }
 0x373   : > { %v8801_v48 = vadd.f32 %v8800_v28, %v8777_v62  ;;  %v8824_v6 = vpop.f32.mrf.mxu0 }
 0x375   : > { %v8825_v7 = vadd.f32 %v8824_v6, %v8801_v48  ;;  %v8898_v59 = vpop.f32.mrf.mxu3 }
 0x376   : > { %v8846_v9 = vpop.f32.mrf.mxu1  ;;  %v8872_v38 = vpop.f32.mrf.mxu2 }
 0x377   : > { %v8847_v42 = vadd.f32 %v8846_v9, %v8825_v7  ;;  %v8899_v58 = vadd.f32 %v8898_v59, %v8872_v38  ;;  %v9749_v59 = vperm.slane %v12344_v41, %v12251_v8  ;;  %v9750_v9 = vperm.slane %v12380_v22, %v12251_v8 }
 0x379   : > { %v9605_v55 = vmul.f32 %v12352_v5, %v8847_v42 }
 0x37b   : > { %v8922_v11 = vpop.f32.mrf.mxu0  ;;  %v9689_v33 = vsel %vm13134_vm0, %v9605_v55, 0.0 }
 0x37c   : > { %v8923_v1 = vadd.f32 %v8922_v11, %v8899_v58  ;;  %9690 = vadd.xlane.f32.xlu2 %v9689_v33  ;;  %v9751_v11 = vperm.slane %v12383_v14, %v12251_v8 }
 0x37d   : > { %v8992_v12 = vpop.f32.mrf.mxu3 }
 0x37e   : > { %v8946_v21 = vpop.f32.mrf.mxu1  ;;  %v8970_v17 = vpop.f32.mrf.mxu2 }
 0x37f   : > { %v8947_v63 = vadd.f32 %v8946_v21, %v8923_v1 }
 0x381   : > { %v8971_v43 = vadd.f32 %v8970_v17, %v8947_v63 }
 0x383   : > { %v8993_v51 = vadd.f32 %v8992_v12, %v8971_v43  ;;  %v9018_v44 = vpop.f32.mrf.mxu0  ;;  %v12358_v36 = vpop.xlane.xlu2 %9663 }
 0x385   : > { %v9092_v37 = vpop.f32.mrf.mxu3  ;;  %v9606_v45 = vmul.f32 %v12360_v25, %v8993_v51 }
 0x386   : > { %v9044_v34 = vpop.f32.mrf.mxu1  ;;  %v9068_v4 = vpop.f32.mrf.mxu2 }
 0x387   : > { %v9045_v26 = vadd.f32 %v9044_v34, %v9018_v44  ;;  %v9692_v31 = vsel %vm13134_vm0, %v9606_v45, 0.0 }
 0x388   : > { %9693 = vadd.xlane.f32.xlu0 %v9692_v31  ;;  %v9787_v31 = vsel %vm13141_vm1, %v9750_v9, %v9749_v59 }
 0x389   : > { %v9069_v56 = vadd.f32 %v9068_v4, %v9045_v26 }
 0x38b   : > { %v9093_v16 = vadd.f32 %v9092_v37, %v9069_v56  ;;  %v9116_v46 = vpop.f32.mrf.mxu0  ;;  %v12364_v50 = vpop.xlane.xlu2 %9813 }
 0x38c   : > { %v9829_v29 = vperm.slane %v12364_v50, 1  ;;  %v12368_v39 = vperm.slane %v12364_v50, 2  ;;  %v12371_v24 = vperm.slane %v12364_v50, 3  ;;  %v12374_v53 = vperm.slane %v12364_v50, 4 }
 0x38d   : > { %v9117_v60 = vadd.f32 %v9116_v46, %v9093_v16  ;;  %v9190_v19 = vpop.f32.mrf.mxu3  ;;  %v12386_v57 = vperm.slane %v12364_v50, 0  ;;  %v12389_v6 = vperm.slane %v12364_v50, 5  ;;  %v12404_v17 = vperm.slane %v12364_v50, 7 }
 0x38e   : > { %v9138_v18 = vpop.f32.mrf.mxu1  ;;  %v9164_v49 = vpop.f32.mrf.mxu2  ;;  %10785 = vrcp.f32 %v9829_v29  ;;  %v9916_v1 = vand.u32 2147483647, %v9829_v29  ;;  %v9918_v43 = vand.u32 2147483648, %v9829_v29  ;;  %vm9912_vm8 = vweird.f32 %v9829_v29 }
 0x38f   : > { %v9139_v47 = vadd.f32 %v9138_v18, %v9117_v60  ;;  %10787 = vrcp.f32 %v12368_v39  ;;  %v9191_v3 = vadd.f32 %v9190_v19, %v9164_v49  ;;  %vm9957_vm11 = vweird.f32 %v12374_v53 }
 0x390   : > { %10789 = vrcp.f32 %v12371_v24  ;;  %vm12411_vm10 = vcmp.eq.f32.partialorder %v9916_v1, 8.507059e+37  ;;  %v9919_v40 = vor.u32 1.1754944e-38, %v9918_v43  ;;  %v9961_v60 = vand.u32 2147483647, %v12374_v53 }
 0x391   : > { %v9607_v28 = vmul.f32 %v12331_v27, %v9139_v47  ;;  %10791 = vrcp.f32 %v12374_v53  ;;  %v9963_v49 = vand.u32 2147483648, %v12374_v53  ;;  %v9933_v43 = vand.u32 2147483648, %v12368_v39 }
 0x392   : > { %10793 = vrcp.f32 %v12386_v57 }
 0x393   : > { %v9214_v15 = vpop.f32.mrf.mxu0  ;;  %v9695_v35 = vsel %vm13134_vm0, %v9607_v28, 0.0  ;;  %10795 = vrcp.f32 %v12389_v6 }
 0x394   : > { %v9215_v62 = vadd.f32 %v9214_v15, %v9191_v3  ;;  %9696 = vadd.xlane.f32.xlu1 %v9695_v35  ;;  %v10786_v48 = vpop.eup %10785  ;;  %10797 = vrcp.f32 %v12404_v17 }
 0x395   : > { %v9284_v7 = vpop.f32.mrf.mxu3  ;;  %v12391_v27 = vpop.eup %10787  ;;  %v9908_v58 = vmul.f32 %v10786_v48, %v9829_v29  ;;  %vm9913_vm9 = vweird.f32 %v10786_v48 }
 0x396   : > { %v9238_v38 = vpop.f32.mrf.mxu1  ;;  %v9262_v42 = vpop.f32.mrf.mxu2  ;;  %v9923_v12 = vmul.f32 %v12391_v27, %v12368_v39  ;;  %vm12419_vm12 = vmor %vm9912_vm8, %vm9913_vm9  ;;  %vm9928_vm14 = vweird.f32 %v12391_v27  ;;  %vm9927_vm8 = vweird.f32 %v12368_v39  ;;  %vm9962_vm9 = vcmp.eq.f32.partialorder %v9961_v60, 8.507059e+37 }
 0x397   : > { %v12397_v55 = vpop.eup %10789  ;;  %v9239_v33 = vadd.f32 %v9238_v38, %v9215_v62  ;;  %v9909_v63 = vsub.f32 1.0, %v9908_v58 }
 0x398   : > { %v10792_v21 = vpop.eup %10791  ;;  %v9924_v37 = vsub.f32 1.0, %v9923_v12  ;;  %v9938_v34 = vmul.f32 %v12397_v55, %v12371_v24 }
 0x399   : > { %v9263_v51 = vadd.f32 %v9262_v42, %v9239_v33  ;;  %v9953_v44 = vmul.f32 %v10792_v21, %v12374_v53  ;;  %v9910_v45 = vmul.f32 %v10786_v48, %v9909_v63  ;;  %vm9958_vm13 = vweird.f32 %v10792_v21  ;;  %v12424_v47 = vpop.eup %10793 }
 0x39a   : > { %v9925_v16 = vmul.f32 %v12391_v27, %v9924_v37  ;;  %v12430_v62 = vpop.eup %10795  ;;  %vm12441_vm15 = vmor %vm9957_vm11, %vm9958_vm13  ;;  %v9931_v63 = vand.u32 2147483647, %v12368_v39  ;;  %vm9942_vm13 = vweird.f32 %v12371_v24 }
 0x39b   : > { %v9285_v4 = vadd.f32 %v9284_v7, %v9263_v51  ;;  %v9310_v26 = vpop.f32.mrf.mxu0  ;;  %v9954_v56 = vsub.f32 1.0, %v9953_v44  ;;  %v9911_v46 = vadd.f32 %v10786_v48, %v9910_v45  ;;  %v12432_v7 = vpop.xlane.xlu0 %9648  ;;  %v9968_v39 = vmul.f32 %v12430_v62, %v12389_v6 }
 0x39c   : > { %v9926_v35 = vadd.f32 %v12391_v27, %v9925_v16  ;;  %v9752_v45 = vperm.slane %v12350_v0, %v12251_v8  ;;  %v9934_v16 = vor.u32 1.1754944e-38, %v9933_v43  ;;  %vm9932_vm11 = vcmp.eq.f32.partialorder %v9931_v63, 8.507059e+37 }
 0x39d   : > { %v9608_v29 = vmul.f32 %v12346_v52, %v9285_v4  ;;  %v9955_v18 = vmul.f32 %v10792_v21, %v9954_v56  ;;  %v9915_v15 = vsel %vm12419_vm12, %v10786_v48, %v9911_v46  ;;  %v9939_v52 = vsub.f32 1.0, %v9938_v34  ;;  %v9384_v1 = vpop.f32.mrf.mxu3 }
 0x39e   : > { %v9336_v3 = vpop.f32.mrf.mxu1  ;;  %v9360_v28 = vpop.f32.mrf.mxu2  ;;  %v9920_v58 = vsel %vm12411_vm10, %v9919_v40, %v9915_v15  ;;  %vm12453_vm10 = vmor %vm9927_vm8, %vm9928_vm14  ;;  %v9753_v56 = vperm.slane %v12432_v7, %v12251_v8  ;;  %v9893_v46 = vmul.f32 %v12424_v47, %v12386_v57  ;;  %vm9943_vm12 = vweird.f32 %v12397_v55 }
 0x39f   : > { %v9337_v38 = vadd.f32 %v9336_v3, %v9310_v26  ;;  %v9698_v42 = vsel %vm13134_vm0, %v9608_v29, 0.0  ;;  %v9956_v33 = vadd.f32 %v10792_v21, %v9955_v18  ;;  %v9921_v48 = vmul.f32 %v9920_v58, %v12246_v61  ;;  %v12480_v40 = vpop.xlane.xlu1 %9651  ;;  %vm12501_vm14 = vmor %vm9942_vm13, %vm9943_vm12 }
 0x3a0   : > { %9699 = vadd.xlane.f32.xlu2 %v9698_v42  ;;  %v9964_v61 = vor.u32 1.1754944e-38, %v9963_v49  ;;  %v9940_v37 = vmul.f32 %v12397_v55, %v9939_v52  ;;  %v9930_v26 = vsel %vm12453_vm10, %v12391_v27, %v9926_v35  ;;  %v9788_v27 = vsel %vm13140_vm2, %v9751_v11, %v9787_v31  ;;  %v12485_v49 = vpop.eup %10797 }
 0x3a1   : > { %v9361_v51 = vadd.f32 %v9360_v28, %v9337_v38  ;;  %v9960_v44 = vsel %vm12441_vm15, %v10792_v21, %v9956_v33  ;;  %10799 = vlog2.f32 %v9921_v48  ;;  %v9935_v9 = vsel %vm9932_vm11, %v9934_v16, %v9930_v26 }
 0x3a2   : > { %v9965_v21 = vsel %vm9962_vm9, %v9964_v61, %v9960_v44  ;;  %v9941_v19 = vadd.f32 %v12397_v55, %v9940_v37  ;;  %v9969_v18 = vsub.f32 1.0, %v9968_v39  ;;  %v9789_v3 = vsel %vm13139_vm3, %v9752_v45, %v9788_v27 }
 0x3a3   : > { %v9385_v34 = vadd.f32 %v9384_v1, %v9361_v51  ;;  %v9408_v4 = vpop.f32.mrf.mxu0  ;;  %v9966_v59 = vmul.f32 %v9965_v21, %v12234_v10  ;;  %v12488_v28 = vpop.xlane.xlu0 %9657  ;;  %v9894_v15 = vsub.f32 1.0, %v9893_v46  ;;  %v9790_v52 = vsel %vm13138_vm4, %v9753_v56, %v9789_v3 }
 0x3a4   : > { %v9754_v38 = vperm.slane %v12480_v40, %v12251_v8  ;;  %v9948_v10 = vand.u32 2147483648, %v12371_v24  ;;  %v9755_v42 = vperm.slane %v12355_v2, %v12251_v8  ;;  %v9936_v33 = vmul.f32 %v9935_v9, %v12222_v54 }
 0x3a5   : > { %v9409_v60 = vadd.f32 %v9408_v4, %v9385_v34  ;;  %v9946_v48 = vand.u32 2147483647, %v12371_v24  ;;  %v9756_v12 = vperm.slane %v12488_v28, %v12251_v8  ;;  %10801 = vlog2.f32 %v9966_v59 }
 0x3a6   : > { %v9430_v29 = vpop.f32.mrf.mxu1  ;;  %v9945_v63 = vsel %vm12501_vm14, %v12397_v55, %v9941_v19  ;;  %v9895_v51 = vmul.f32 %v12424_v47, %v9894_v15  ;;  %v9998_v44 = vmul.f32 %v12485_v49, %v12404_v17  ;;  %v9791_v24 = vsel %vm13137_vm5, %v9754_v38, %v9790_v52 }
 0x3a7   : > { %v9431_v11 = vadd.f32 %v9430_v29, %v9409_v60  ;;  %v10800_v35 = vpop.eup %10799  ;;  %v9949_v61 = vor.u32 1.1754944e-38, %v9948_v10  ;;  %v9792_v53 = vsel %vm13136_vm6, %v9755_v42, %v9791_v24  ;;  %10803 = vlog2.f32 %v9936_v33  ;;  %v9482_v33 = vpop.f32.mrf.mxu3 }
 0x3a8   : > { %v10375_v43 = vmul.f32 0.6931472, %v10800_v35  ;;  %vm9947_vm15 = vcmp.eq.f32.partialorder %v9946_v48, 8.507059e+37  ;;  %v9793_v55 = vsel %vm13135_vm7, %v9756_v12, %v9792_v53  ;;  %vm9973_vm8 = vweird.f32 %v12430_v62  ;;  %v9456_v48 = vpop.f32.mrf.mxu2 }
 0x3a9   : > { %v9609_v58 = vmul.f32 %v12352_v5, %v9431_v11  ;;  %v9970_v5 = vmul.f32 %v12430_v62, %v9969_v18  ;;  %v9950_v37 = vsel %vm9947_vm15, %v9949_v61, %v9945_v63  ;;  %v9978_v45 = vand.u32 2147483648, %v12389_v6 }
 0x3aa   : > { %v9896_v34 = vadd.f32 %v12424_v47, %v9895_v51  ;;  %vm9898_vm9 = vweird.f32 %v12424_v47  ;;  %v9999_v4 = vsub.f32 1.0, %v9998_v44  ;;  %vm9972_vm10 = vweird.f32 %v12389_v6 }
 0x3ab   : > { %v9701_v54 = vsel %vm13134_vm0, %v9609_v58, 0.0  ;;  %v9971_v39 = vadd.f32 %v12430_v62, %v9970_v5  ;;  %v10802_v21 = vpop.eup %10801  ;;  %v9976_v26 = vand.u32 2147483647, %v12389_v6  ;;  %v9903_v31 = vand.u32 2147483648, %v12386_v57  ;;  %vm12528_vm11 = vmor %vm9972_vm10, %vm9973_vm8 }
 0x3ac   : > { %9702 = vadd.xlane.f32.xlu0 %v9701_v54  ;;  %v9951_v56 = vmul.f32 %v9950_v37, %v12248_v30  ;;  %vm9897_vm12 = vweird.f32 %v12386_v57  ;;  %v9901_v46 = vand.u32 2147483647, %v12386_v57  ;;  %v9815_v27 = vsel %vm13134_vm0, %v9793_v55, 0.0 }
 0x3ad   : > { %10472 = vperm.xlu1 %10783, %v10375_v43   ;;  %v9975_v60 = vsel %vm12528_vm11, %v12430_v62, %v9971_v39  ;;  %vm9899_vm13 = vmor %vm9897_vm12, %vm9898_vm9  ;;  %v10804_v6 = vpop.eup %10803  ;;  %v10381_v29 = vmul.f32 0.6931472, %v10802_v21  ;;  %v9979_v59 = vor.u32 1.1754944e-38, %v9978_v45  ;;  %v10000_v9 = vmul.f32 %v12485_v49, %v9999_v4 }
 0x3ae   : > { %v9900_v30 = vsel %vm9899_vm13, %v12424_v47, %v9896_v34  ;;  %vm9977_vm14 = vcmp.eq.f32.partialorder %v9976_v26, 8.507059e+37  ;;  %v9904_v19 = vor.u32 1.1754944e-38, %v9903_v31  ;;  %10805 = vlog2.f32 %v9951_v56  ;;  %v9530_v43 = vpop.f32.mrf.mxu1 }
 0x3af   : > { %v9980_v57 = vsel %vm9977_vm14, %v9979_v59, %v9975_v60  ;;  %vm9902_vm15 = vcmp.eq.f32.partialorder %v9901_v46, 8.507059e+37  ;;  %v10377_v18 = vmul.f32 0.6931472, %v10804_v6  ;;  %v10001_v11 = vadd.f32 %v12485_v49, %v10000_v9  ;;  %v9576_v55 = vpop.f32.mrf.mxu3  ;;  %v12561_v9 = vpop.xlane.xlu2 %9672 }
 0x3b0   : > { %v9905_v3 = vsel %vm9902_vm15, %v9904_v19, %v9900_v30  ;;  %vm10003_vm8 = vweird.f32 %v12485_v49  ;;  %v9981_v62 = vmul.f32 %v9980_v57, %v12265_v13  ;;  %v10008_v47 = vand.u32 2147483648, %v12404_v17  ;;  %v9554_v24 = vpop.f32.mrf.mxu2 }
 0x3b1   : > { %v9906_v15 = vmul.f32 %v9905_v3, %v12219_v32  ;;  %vm10002_vm9 = vweird.f32 %v12404_v17  ;;  %v10006_v35 = vand.u32 2147483647, %v12404_v17  ;;  %v9483_v12 = vadd.f32 %v9482_v33, %v9456_v48  ;;  %v9506_v17 = vpop.f32.mrf.mxu0 }
 0x3b2   : > { %vm10004_vm10 = vmor %vm10002_vm9, %vm10003_vm8  ;;  %10807 = vlog2.f32 %v9981_v62  ;;  %v10009_v10 = vor.u32 1.1754944e-38, %v10008_v47  ;;  %v9834_v63 = vperm.slane %v12364_v50, 6  ;;  %v9758_v57 = vperm.slane %v12358_v36, %v12251_v8 }
 0x3b3   : > { %v10005_v38 = vsel %vm10004_vm10, %v12485_v49, %v10001_v11  ;;  %10809 = vlog2.f32 %v9906_v15  ;;  %vm10007_vm11 = vcmp.eq.f32.partialorder %v10006_v35, 8.507059e+37  ;;  %v9507_v54 = vadd.f32 %v9506_v17, %v9483_v12 }
 0x3b4   : > { %9816 = vadd.xlane.f32.xlu0 %v9815_v27  ;;  %v10806_v52 = vpop.eup %10805  ;;  %v10010_v58 = vsel %vm10007_vm11, %v10009_v10, %v10005_v38  ;;  %v9993_v26 = vand.u32 2147483648, %v9834_v63  ;;  %vm9987_vm13 = vweird.f32 %v9834_v63  ;;  %v9991_v31 = vand.u32 2147483647, %v9834_v63 }
 0x3b5   : > { %10481 = vperm.xlu1 %10783, %v10381_v29   ;;  %v10379_v42 = vmul.f32 0.6931472, %v10806_v52  ;;  %v10011_v13 = vmul.f32 %v10010_v58, %v12283_v23  ;;  %v9531_v44 = vadd.f32 %v9530_v43, %v9507_v54  ;;  %v12555_v29 = vpop.xlane.xlu1 %9660  ;;  %v9761_v62 = vperm.slane %v12561_v9, %v12251_v8 }
 0x3b6   : > { %v9994_v16 = vor.u32 1.1754944e-38, %v9993_v26  ;;  %vm9992_vm15 = vcmp.eq.f32.partialorder %v9991_v31, 8.507059e+37 }
 0x3b7   : > { %10811 = vlog2.f32 %v10011_v13  ;;  %v9555_v53 = vadd.f32 %v9554_v24, %v9531_v44 }
 0x3b8   : > { %10475 = vperm.xlu2 %10784, %v10377_v18   ;;  %v10808_v1 = vpop.eup %10807  ;;  %10813 = vrcp.f32 %v9834_v63  ;;  %v9757_v18 = vperm.slane %v12555_v29, %v12251_v8 }
 0x3b9   : > { %v10810_v32 = vpop.eup %10809  ;;  %v10383_v5 = vmul.f32 0.6931472, %v10808_v1  ;;  %v9577_v39 = vadd.f32 %v9576_v55, %v9555_v53 }
 0x3ba   : > { %v10373_v49 = vmul.f32 0.6931472, %v10810_v32  ;;  %v9794_v35 = vsel %vm13141_vm1, %v9758_v57, %v9757_v18 }
 0x3bb   : > { %v9610_v50 = vmul.f32 %v12360_v25, %v9577_v39  ;;  %v12553_v25 = vpop.xlane.xlu0 %9666 }
 0x3bd   : > { %v10812_v51 = vpop.eup %10811  ;;  %v9704_v4 = vsel %vm13134_vm0, %v9610_v50, 0.0  ;;  %v12559_v30 = vpop.xlane.xlu1 %9669 }
 0x3be   : > { %v10387_v23 = vmul.f32 0.6931472, %v10812_v51  ;;  %v10814_v61 = vpop.eup %10813  ;;  %v9760_v3 = vperm.slane %v12559_v30, %v12251_v8 }
 0x3bf   : > { %v9983_v37 = vmul.f32 %v10814_v61, %v9834_v63  ;;  %vm9988_vm12 = vweird.f32 %v10814_v61 }
 0x3c0   : > { %10478 = vperm.xlu2 %10784, %v10379_v42   ;;  %vm9989_vm14 = vmor %vm9987_vm13, %vm9988_vm12 }
 0x3c1   : > { %v9984_v45 = vsub.f32 1.0, %v9983_v37 }
 0x3c3   : > { %v9985_v34 = vmul.f32 %v10814_v61, %v9984_v45  ;;  %v12557_v59 = vpop.xlane.xlu0 %9675 }
 0x3c4   : > { %v9762_v52 = vperm.slane %v12557_v59, %v12251_v8 }
 0x3c5   : > { %v9986_v21 = vadd.f32 %v10814_v61, %v9985_v34  ;;  %v12573_v11 = vpop.xlane.xlu1 %9678 }
 0x3c6   : > { %v9763_v10 = vperm.slane %v12573_v11, %v12251_v8 }
 0x3c7   : > { %v9990_v56 = vsel %vm9989_vm14, %v10814_v61, %v9986_v21 }
 0x3c8   : > { %10484 = vperm.xlu2 %10784, %v10383_v5   ;;  %10469 = vperm.xlu0 %10782, %v10373_v49   ;;  %v9995_v46 = vsel %vm9992_vm15, %v9994_v16, %v9990_v56 }
 0x3c9   : > { %v9996_v27 = vmul.f32 %v9995_v46, %v12271_v20  ;;  %v9759_v20 = vperm.slane %v12553_v25, %v12251_v8 }
 0x3cb   : > { %10815 = vlog2.f32 %v9996_v27  ;;  %v12577_v47 = vpop.xlane.xlu2 %9681  ;;  %v9795_v38 = vsel %vm13140_vm2, %v9759_v20, %v9794_v35 }
 0x3cc   : > { %v9796_v42 = vsel %vm13139_vm3, %v9760_v3, %v9795_v38  ;;  %v9764_v58 = vperm.slane %v12577_v47, %v12251_v8 }
 0x3cd   : > { %v9797_v13 = vsel %vm13138_vm4, %v9761_v62, %v9796_v42 }
 0x3ce   : > { %v9798_v33 = vsel %vm13137_vm5, %v9762_v52, %v9797_v13 }
 0x3cf   : > { %v9799_v1 = vsel %vm13136_vm6, %v9763_v10, %v9798_v33 }
 0x3d0   : > { %10490 = vperm.xlu0 %10782, %v10387_v23   ;;  %v9800_v32 = vsel %vm13135_vm7, %v9764_v58, %v9799_v1 }
 0x3d1   : > { %v10816_v60 = vpop.eup %10815  ;;  %v9818_v12 = vsel %vm13134_vm0, %v9800_v32, 0.0 }
 0x3d2   : > { %v10385_v6 = vmul.f32 0.6931472, %v10816_v60 }
 0x3d7   : > { %v12563_v19 = vpop.xlane.xlu0 %9684 }
 0x3df   : > { %9705 = vadd.xlane.f32.xlu1 %v9704_v4 }
 0x3f8   : > { %10487 = vperm.xlu1 %10783, %v10385_v6  }
 0x3fb   : > { %v12579_v15 = vpop.xlane.xlu0 %9693 }
 0x41f   : > { %v12594_v48 = vpop.xlane.xlu0 %9702 }
 0x422   : > { %9819 = vadd.xlane.f32.xlu1 %v9818_v12 }
 0x427   : > { %v12597_v17 = vpop.xlane.xlu0 %9816 }
 0x428   : > { %v9836_v63 = vperm.slane %v12597_v17, 0  ;;  %v12601_v5 = vperm.slane %v12597_v17, 1  ;;  %v12604_v49 = vperm.slane %v12597_v17, 2  ;;  %v12607_v54 = vperm.slane %v12597_v17, 3 }
 0x429   : > { %v12610_v43 = vperm.slane %v12597_v17, 4  ;;  %v12613_v51 = vperm.slane %v12597_v17, 5  ;;  %v12623_v55 = vperm.slane %v12597_v17, 7 }
 0x42a   : > { %10817 = vrcp.f32 %v9836_v63  ;;  %v10053_v44 = vand.u32 2147483648, %v12604_v49  ;;  %v10038_v24 = vand.u32 2147483648, %v12601_v5  ;;  %v10036_v23 = vand.u32 2147483647, %v12601_v5 }
 0x42b   : > { %10819 = vrcp.f32 %v12601_v5  ;;  %v10021_v61 = vand.u32 2147483647, %v9836_v63  ;;  %v10023_v53 = vand.u32 2147483648, %v9836_v63  ;;  %v10051_v37 = vand.u32 2147483647, %v12604_v49 }
 0x42c   : > { %10821 = vrcp.f32 %v12604_v49  ;;  %v10054_v45 = vor.u32 1.1754944e-38, %v10053_v44  ;;  %vm10032_vm8 = vweird.f32 %v12601_v5  ;;  %vm10047_vm9 = vweird.f32 %v12604_v49 }
 0x42d   : > { %10823 = vrcp.f32 %v12607_v54  ;;  %v10039_v34 = vor.u32 1.1754944e-38, %v10038_v24  ;;  %vm10017_vm10 = vweird.f32 %v9836_v63  ;;  %v10098_v21 = vand.u32 2147483648, %v12613_v51 }
 0x42e   : > { %10825 = vrcp.f32 %v12610_v43  ;;  %vm12631_vm11 = vcmp.eq.f32.partialorder %v10036_v23, 8.507059e+37  ;;  %vm12635_vm12 = vcmp.eq.f32.partialorder %v10021_v61, 8.507059e+37  ;;  %v10024_v46 = vor.u32 1.1754944e-38, %v10023_v53 }
 0x42f   : > { %10827 = vrcp.f32 %v12613_v51  ;;  %v10096_v27 = vand.u32 2147483647, %v12613_v51  ;;  %vm12644_vm13 = vcmp.eq.f32.partialorder %v10051_v37, 8.507059e+37  ;;  %vm10077_vm15 = vweird.f32 %v12610_v43 }
 0x430   : > { %v10818_v39 = vpop.eup %10817  ;;  %10829 = vrcp.f32 %v12623_v55  ;;  %vm10092_vm7 = vweird.f32 %v12613_v51  ;;  %v10081_v62 = vand.u32 2147483647, %v12610_v43  ;;  %v10099_v42 = vor.u32 1.1754944e-38, %v10098_v21 }
 0x431   : > { %v10820_v50 = vpop.eup %10819  ;;  %v10013_v4 = vmul.f32 %v10818_v39, %v9836_v63  ;;  %vm10018_vm14 = vweird.f32 %v10818_v39  ;;  %vm12655_vm5 = vcmp.eq.f32.partialorder %v10096_v27, 8.507059e+37  ;;  %v10083_v32 = vand.u32 2147483648, %v12610_v43 }
 0x432   : > { %v10822_v26 = vpop.eup %10821  ;;  %v10028_v31 = vmul.f32 %v10820_v50, %v12601_v5  ;;  %vm10033_vm0 = vweird.f32 %v10820_v50  ;;  %vm10019_vm4 = vmor %vm10017_vm10, %vm10018_vm14  ;;  %vm12662_vm2 = vcmp.eq.f32.partialorder %v10081_v62, 8.507059e+37  ;;  %v10068_v16 = vand.u32 2147483648, %v12607_v54 }
 0x433   : > { %v12640_v60 = vpop.eup %10823  ;;  %v10043_v6 = vmul.f32 %v10822_v26, %v12604_v49  ;;  %v10014_v20 = vsub.f32 1.0, %v10013_v4  ;;  %vm10048_vm6 = vweird.f32 %v10822_v26  ;;  %vm10034_vm1 = vmor %vm10032_vm8, %vm10033_vm0 }
 0x434   : > { %v10826_v18 = vpop.eup %10825  ;;  %v10029_v3 = vsub.f32 1.0, %v10028_v31  ;;  %v10058_v35 = vmul.f32 %v12640_v60, %v12607_v54  ;;  %vm10049_vm10 = vmor %vm10047_vm9, %vm10048_vm6  ;;  %vm10062_vm6 = vweird.f32 %v12607_v54 }
 0x435   : > { %v10828_v52 = vpop.eup %10827  ;;  %v10044_v38 = vsub.f32 1.0, %v10043_v6  ;;  %v10015_v10 = vmul.f32 %v10818_v39, %v10014_v20  ;;  %v10073_v58 = vmul.f32 %v10826_v18, %v12610_v43  ;;  %vm10078_vm3 = vweird.f32 %v10826_v18 }
 0x436   : > { %v10030_v13 = vmul.f32 %v10820_v50, %v10029_v3  ;;  %v10088_v33 = vmul.f32 %v10828_v52, %v12613_v51  ;;  %v10059_v23 = vsub.f32 1.0, %v10058_v35  ;;  %v12666_v4 = vpop.eup %10829  ;;  %vm10093_vm14 = vweird.f32 %v10828_v52  ;;  %vm10079_vm0 = vmor %vm10077_vm15, %vm10078_vm3  ;;  %v12697_v51 = vpop.xlane.xlu1 %9687 }
 0x437   : > { %v10045_v12 = vmul.f32 %v10822_v26, %v10044_v38  ;;  %v10016_v44 = vadd.f32 %v10818_v39, %v10015_v10  ;;  %v10074_v24 = vsub.f32 1.0, %v10073_v58  ;;  %v10066_v43 = vand.u32 2147483647, %v12607_v54 }
 0x438   : > { %v10031_v61 = vadd.f32 %v10820_v50, %v10030_v13  ;;  %v10089_v53 = vsub.f32 1.0, %v10088_v33  ;;  %v10060_v6 = vmul.f32 %v12640_v60, %v10059_v23  ;;  %v10126_v33 = vand.u32 2147483647, %v12623_v55 }
 0x439   : > { %v10046_v21 = vadd.f32 %v10822_v26, %v10045_v12  ;;  %v10020_v31 = vsel %vm10019_vm4, %v10818_v39, %v10016_v44  ;;  %v10075_v27 = vmul.f32 %v10826_v18, %v10074_v24  ;;  %v10084_v39 = vor.u32 1.1754944e-38, %v10083_v32 }
 0x43a   : > { %v10035_v63 = vsel %vm10034_vm1, %v10820_v50, %v10031_v61  ;;  %v10025_v20 = vsel %vm12635_vm12, %v10024_v46, %v10020_v31  ;;  %v10090_v3 = vmul.f32 %v10828_v52, %v10089_v53  ;;  %vm10094_vm1 = vmor %vm10092_vm7, %vm10093_vm14  ;;  %vm10063_vm4 = vweird.f32 %v12640_v60  ;;  %v12705_v46 = vpop.xlane.xlu2 %9690 }
 0x43b   : > { %v10050_v62 = vsel %vm10049_vm10, %v10822_v26, %v10046_v21  ;;  %v10040_v35 = vsel %vm12631_vm11, %v10039_v34, %v10035_v63  ;;  %v10026_v5 = vmul.f32 %v10025_v20, %v12344_v41  ;;  %v10076_v58 = vadd.f32 %v10826_v18, %v10075_v27  ;;  %vm12700_vm3 = vmor %vm10062_vm6, %vm10063_vm4 }
 0x43c   : > { %v10055_v38 = vsel %vm12644_vm13, %v10054_v45, %v10050_v62  ;;  %v10041_v10 = vmul.f32 %v10040_v35, %v12380_v22  ;;  %v10091_v49 = vadd.f32 %v10828_v52, %v10090_v3  ;;  %v10061_v41 = vadd.f32 %v12640_v60, %v10060_v6 }
 0x43d   : > { %v10056_v50 = vmul.f32 %v10055_v38, %v12383_v14  ;;  %10831 = vlog2.f32 %v10026_v5  ;;  %v10080_v34 = vsel %vm10079_vm0, %v10826_v18, %v10076_v58  ;;  %vm10122_vm7 = vweird.f32 %v12623_v55 }
 0x43e   : > { %10833 = vlog2.f32 %v10041_v10  ;;  %v10095_v45 = vsel %vm10094_vm1, %v10828_v52, %v10091_v49  ;;  %v10085_v14 = vsel %vm12662_vm2, %v10084_v39, %v10080_v34  ;;  %v10065_v18 = vsel %vm12700_vm3, %v12640_v60, %v10061_v41  ;;  %v12720_v53 = vpop.xlane.xlu1 %9696 }
 0x43f   : > { %10835 = vlog2.f32 %v10056_v50  ;;  %v10100_v22 = vsel %vm12655_vm5, %v10099_v42, %v10095_v45  ;;  %v10086_v26 = vmul.f32 %v10085_v14, %v12432_v7  ;;  %v10118_v52 = vmul.f32 %v12666_v4, %v12623_v55 }
 0x440   : > { %v10101_v57 = vmul.f32 %v10100_v22, %v12480_v40  ;;  %v10069_v42 = vor.u32 1.1754944e-38, %v10068_v16  ;;  %vm10067_vm2 = vcmp.eq.f32.partialorder %v10066_v43, 8.507059e+37  ;;  %vm10123_vm5 = vweird.f32 %v12666_v4 }
 0x441   : > { %v10119_v7 = vsub.f32 1.0, %v10118_v52  ;;  %10837 = vlog2.f32 %v10086_v26  ;;  %v10128_v40 = vand.u32 2147483648, %v12623_v55  ;;  %vm10124_vm8 = vmor %vm10122_vm7, %vm10123_vm5  ;;  %vm10127_vm9 = vcmp.eq.f32.partialorder %v10126_v33, 8.507059e+37 }
 0x442   : > { %v10070_v32 = vsel %vm10067_vm2, %v10069_v42, %v10065_v18  ;;  %10839 = vlog2.f32 %v10101_v57  ;;  %v12724_v21 = vpop.xlane.xlu2 %9699  ;;  %v9842_v50 = vperm.slane %v12597_v17, 6  ;;  %vm13192_vm11 = vcmask 1041409  }
 0x443   : > { %v10832_v13 = vpop.eup %10831  ;;  %v10071_v60 = vmul.f32 %v10070_v32, %v12350_v0  ;;  %v10120_v24 = vmul.f32 %v12666_v4, %v10119_v7  ;;  %v10129_v37 = vor.u32 1.1754944e-38, %v10128_v40  ;;  %vm13193_vm12 = vcmask 1042434   ;;  %vm13199_vm1 = vmmov %vm13192_vm11 }
 0x444   : > { %v10834_v54 = vpop.eup %10833  ;;  %v10389_v1 = vmul.f32 0.6931472, %v10832_v13  ;;  %vm13194_vm13 = vcmask 1043459   ;;  %vm13195_vm15 = vcmask 1044484   ;;  %v9766_v42 = vperm.slane %v12697_v51, %v12251_v8  ;;  %vm13201_vm6 = vmmov %vm13193_vm12 }
 0x445   : > { %v10836_v12 = vpop.eup %10835  ;;  %v10391_v44 = vmul.f32 0.6931472, %v10834_v54  ;;  %10841 = vlog2.f32 %v10071_v60  ;;  %v10121_v61 = vadd.f32 %v12666_v4, %v10120_v24  ;;  %v9767_v7 = vperm.slane %v12705_v46, %v12251_v8  ;;  %vm13202_vm3 = vmmov %vm13194_vm13 }
 0x446   : > { %v10393_v23 = vmul.f32 0.6931472, %v10836_v12  ;;  %10493 = vperm.xlu2 %10784, %v10389_v1   ;;  %v10473_v35 = vpop.permute.xlu1 %10472  ;;  %vm13196_vm10 = vcmask 1045509   ;;  %v9765_v32 = vperm.slane %v12563_v19, %v12251_v8  ;;  %v9768_v40 = vperm.slane %v12579_v15, %v12251_v8  ;;  %vm13203_vm2 = vmmov %vm13195_vm15 }
 0x447   : > { %10496 = vperm.xlu1 %10783, %v10391_v44   ;;  %v10125_v0 = vsel %vm10124_vm8, %v12666_v4, %v10121_v61  ;;  %v10838_v31 = vpop.eup %10837  ;;  %v10470_v4 = vpop.permute.xlu0 %10469  ;;  %vm13197_vm14 = vcmask 1046534   ;;  %v9769_v44 = vperm.slane %v12720_v53, %v12251_v8  ;;  %vm13198_vm0 = vcmask 1047559   ;;  %vm13204_vm5 = vmmov %vm13196_vm10 }
 0x448   : > { %10499 = vperm.xlu0 %10782, %v10393_v23   ;;  %v10130_v27 = vsel %vm10127_vm9, %v10129_v37, %v10125_v0  ;;  %v10840_v6 = vpop.eup %10839  ;;  %v10397_v3 = vmul.f32 0.6931472, %v10838_v31  ;;  %v10564_v49 = vperm.slane %v10470_v4, %v12251_v8  ;;  %v9801_v24 = vsel %vm13199_vm1, %v9766_v42, %v9765_v32  ;;  %vm13205_vm7 = vmmov %vm13197_vm14 }
 0x449   : > { %v10131_v63 = vmul.f32 %v10130_v27, %v12488_v28  ;;  %v10399_v55 = vmul.f32 0.6931472, %v10840_v6  ;;  %v10565_v28 = vperm.slane %v10473_v35, %v12251_v8  ;;  %v9770_v23 = vperm.slane %v12724_v21, %v12251_v8  ;;  %vm13206_vm8 = vmmov %vm13198_vm0 }
 0x44a   : > { %v10476_v39 = vpop.permute.xlu2 %10475  ;;  %vm13200_vm4 = vcmask 64512   ;;  %v9802_v61 = vsel %vm13201_vm6, %v9767_v7, %v9801_v24  ;;  %v9771_v37 = vperm.slane %v12594_v48, %v12251_v8 }
 0x44b   : > { %v10842_v20 = vpop.eup %10841  ;;  %10843 = vlog2.f32 %v10131_v63  ;;  %v10596_v41 = vsel %vm13192_vm11, %v10565_v28, %v10564_v49  ;;  %v10566_v45 = vperm.slane %v10476_v39, %v12251_v8  ;;  %v9803_v31 = vsel %vm13202_vm3, %v9768_v40, %v9802_v61  ;;  %vm13207_vm9 = vmmov %vm13200_vm4 }
 0x44c   : > { %v10395_v62 = vmul.f32 0.6931472, %v10842_v20  ;;  %10845 = vrcp.f32 %v9842_v50  ;;  %v9804_v6 = vsel %vm13203_vm2, %v9769_v44, %v9803_v31  ;;  %v10111_v39 = vand.u32 2147483647, %v9842_v50 }
 0x44d   : > { %v10597_v22 = vsel %vm13193_vm12, %v10566_v45, %v10596_v41  ;;  %v9805_v63 = vsel %vm13204_vm5, %v9770_v23, %v9804_v6  ;;  %vm10107_vm12 = vweird.f32 %v9842_v50 }
 0x44e   : > { %10502 = vperm.xlu2 %10784, %v10395_v62   ;;  %v10482_v10 = vpop.permute.xlu1 %10481  ;;  %v9806_v20 = vsel %vm13205_vm7, %v9771_v37, %v9805_v63 }
 0x44f   : > { %10505 = vperm.xlu1 %10783, %v10397_v3   ;;  %v10568_v26 = vperm.slane %v10482_v10, %v12251_v8  ;;  %v10491_v17 = vpop.permute.xlu0 %10490 }
 0x450   : > { %10508 = vperm.xlu0 %10782, %v10399_v55   ;;  %v10571_v33 = vperm.slane %v10491_v17, %v12251_v8 }
 0x451   : > { %v10844_v5 = vpop.eup %10843 }
 0x452   : > { %v10403_v38 = vmul.f32 0.6931472, %v10844_v5  ;;  %v10479_v58 = vpop.permute.xlu2 %10478  ;;  %v10846_v16 = vpop.eup %10845  ;;  %v10113_v5 = vand.u32 2147483648, %v9842_v50 }
 0x453   : > { %v10567_v14 = vperm.slane %v10479_v58, %v12251_v8  ;;  %v10103_v1 = vmul.f32 %v10846_v16, %v9842_v50  ;;  %vm10108_vm11 = vweird.f32 %v10846_v16 }
 0x454   : > { %v10114_v4 = vor.u32 1.1754944e-38, %v10113_v5 }
 0x455   : > { %v10598_v43 = vsel %vm13194_vm13, %v10567_v14, %v10597_v22  ;;  %v10104_v0 = vsub.f32 1.0, %v10103_v1  ;;  %vm10109_vm13 = vmor %vm10107_vm12, %vm10108_vm11 }
 0x456   : > { %v12735_v34 = vpop.xlane.xlu1 %9705  ;;  %v10599_v57 = vsel %vm13195_vm15, %v10568_v26, %v10598_v43  ;;  %vm10112_vm15 = vcmp.eq.f32.partialorder %v10111_v39, 8.507059e+37 }
 0x457   : > { %10514 = vperm.xlu1 %10783, %v10403_v38   ;;  %v9772_v27 = vperm.slane %v12735_v34, %v12251_v8  ;;  %v10105_v3 = vmul.f32 %v10846_v16, %v10104_v0 }
 0x459   : > { %v9807_v55 = vsel %vm13206_vm8, %v9772_v27, %v9806_v20  ;;  %v10106_v35 = vadd.f32 %v10846_v16, %v10105_v3 }
 0x45a   : > { %v10485_v56 = vpop.permute.xlu2 %10484  ;;  %v9821_v62 = vsel %vm13207_vm9, %v9807_v55, 0.0 }
 0x45b   : > { %v10569_v18 = vperm.slane %v10485_v56, %v12251_v8  ;;  %v10110_v38 = vsel %vm10109_vm13, %v10846_v16, %v10106_v35 }
 0x45c   : > { %v10115_v10 = vsel %vm10112_vm15, %v10114_v4, %v10110_v38 }
 0x45d   : > { %v10600_v54 = vsel %vm13196_vm10, %v10569_v18, %v10599_v57  ;;  %v10116_v49 = vmul.f32 %v10115_v10, %v12355_v2 }
 0x45f   : > { %10847 = vlog2.f32 %v10116_v49 }
 0x465   : > { %v10848_v58 = vpop.eup %10847 }
 0x466   : > { %v10401_v28 = vmul.f32 0.6931472, %v10848_v58 }
 0x46a   : > { %v10488_v52 = vpop.permute.xlu1 %10487 }
 0x46b   : > { %v10570_v13 = vperm.slane %v10488_v52, %v12251_v8 }
 0x46d   : > { %v10601_v12 = vsel %vm13197_vm14, %v10570_v13, %v10600_v54 }
 0x46e   : > { %v10602_v60 = vsel %vm13198_vm0, %v10571_v33, %v10601_v12 }
 0x46f   : > { %10628 = vst.msk [vmem:[%s12752_s19] sm:$0xff] %vm13200_vm4, %v10602_v60 }
 0x477   : > { %9822 = vadd.xlane.f32.xlu2 %v9821_v62 }
 0x48f   : > { %10511 = vperm.xlu2 %10784, %v10401_v28  }
 0x495   : > { %v9820_v41 = vpop.xlane.xlu1 %9819 }
 0x496   : > { %v12780_v45 = vperm.slane %v9820_v41, 0  ;;  %v12782_v22 = vperm.slane %v9820_v41, 1  ;;  %v12784_v14 = vperm.slane %v9820_v41, 2  ;;  %v12786_v43 = vperm.slane %v9820_v41, 3 }
 0x497   : > { %v12788_v50 = vperm.slane %v9820_v41, 4  ;;  %v12791_v26 = vperm.slane %v9820_v41, 5  ;;  %v12797_v16 = vperm.slane %v9820_v41, 6  ;;  %v12801_v57 = vperm.slane %v9820_v41, 7 }
 0x498   : > { %10849 = vrcp.f32 %v12780_v45  ;;  %v10143_v2 = vand.u32 2147483648, %v12780_v45  ;;  %v10173_v56 = vand.u32 2147483648, %v12784_v14  ;;  %v10141_v17 = vand.u32 2147483647, %v12780_v45 }
 0x499   : > { %10851 = vrcp.f32 %v12782_v22  ;;  %v10156_v18 = vand.u32 2147483647, %v12782_v22  ;;  %v10158_v52 = vand.u32 2147483648, %v12782_v22  ;;  %vm10137_vm10 = vweird.f32 %v12780_v45 }
 0x49a   : > { %10853 = vrcp.f32 %v12784_v14  ;;  %v10171_v42 = vand.u32 2147483647, %v12784_v14  ;;  %v10188_v13 = vand.u32 2147483648, %v12786_v43  ;;  %v10144_v33 = vor.u32 1.1754944e-38, %v10143_v2 }
 0x49b   : > { %10855 = vrcp.f32 %v12786_v43  ;;  %v12810_v54 = vor.u32 1.1754944e-38, %v10173_v56  ;;  %vm10152_vm14 = vweird.f32 %v12782_v22  ;;  %v10186_v1 = vand.u32 2147483647, %v12786_v43 }
 0x49c   : > { %10857 = vrcp.f32 %v12788_v50  ;;  %vm12816_vm0 = vcmp.eq.f32.partialorder %v10141_v17, 8.507059e+37  ;;  %vm10167_vm1 = vweird.f32 %v12784_v14  ;;  %v10159_v44 = vor.u32 1.1754944e-38, %v10158_v52 }
 0x49d   : > { %10859 = vrcp.f32 %v12791_v26  ;;  %v10216_v60 = vand.u32 2147483647, %v12791_v26  ;;  %vm12824_vm6 = vcmp.eq.f32.partialorder %v10156_v18, 8.507059e+37  ;;  %vm10182_vm3 = vweird.f32 %v12786_v43 }
 0x49e   : > { %v10850_v7 = vpop.eup %10849  ;;  %10861 = vrcp.f32 %v12797_v16  ;;  %v10189_v37 = vor.u32 1.1754944e-38, %v10188_v13  ;;  %vm12830_vm2 = vcmp.eq.f32.partialorder %v10171_v42, 8.507059e+37  ;;  %v10218_v63 = vand.u32 2147483648, %v12791_v26 }
 0x49f   : > { %v10852_v32 = vpop.eup %10851  ;;  %v10133_v40 = vmul.f32 %v10850_v7, %v12780_v45  ;;  %10863 = vrcp.f32 %v12801_v57  ;;  %vm10138_vm4 = vweird.f32 %v10850_v7  ;;  %vm12839_vm11 = vcmp.eq.f32.partialorder %v10186_v1, 8.507059e+37 }
 0x4a0   : > { %v10854_v24 = vpop.eup %10853  ;;  %v10148_v23 = vmul.f32 %v10852_v32, %v12782_v22  ;;  %vm10153_vm5 = vweird.f32 %v10852_v32  ;;  %vm12847_vm15 = vcmp.eq.f32.partialorder %v10216_v60, 8.507059e+37  ;;  %vm10139_vm12 = vmor %vm10137_vm10, %vm10138_vm4  ;;  %v10201_v13 = vand.u32 2147483647, %v12788_v50 }
 0x4a1   : > { %v10856_v0 = vpop.eup %10855  ;;  %v10134_v31 = vsub.f32 1.0, %v10133_v40  ;;  %v10163_v27 = vmul.f32 %v10854_v24, %v12784_v14  ;;  %vm10168_vm8 = vweird.f32 %v10854_v24  ;;  %vm10154_vm13 = vmor %vm10152_vm14, %vm10153_vm5  ;;  %vm10227_vm5 = vweird.f32 %v12797_v16 }
 0x4a2   : > { %v12836_v20 = vpop.eup %10857  ;;  %v10149_v3 = vsub.f32 1.0, %v10148_v23  ;;  %v10178_v55 = vmul.f32 %v10856_v0, %v12786_v43  ;;  %vm10183_vm9 = vweird.f32 %v10856_v0  ;;  %v10203_v23 = vand.u32 2147483648, %v12788_v50  ;;  %vm10169_vm10 = vmor %vm10167_vm1, %vm10168_vm8 }
 0x4a3   : > { %v10860_v35 = vpop.eup %10859  ;;  %v10135_v5 = vmul.f32 %v10850_v7, %v10134_v31  ;;  %v10164_v39 = vsub.f32 1.0, %v10163_v27  ;;  %v10193_v38 = vmul.f32 %v12836_v20, %v12788_v50  ;;  %vm10198_vm7 = vweird.f32 %v12836_v20  ;;  %vm10184_vm14 = vmor %vm10182_vm3, %vm10183_vm9 }
 0x4a4   : > { %v10150_v4 = vmul.f32 %v10852_v32, %v10149_v3  ;;  %v10179_v10 = vsub.f32 1.0, %v10178_v55  ;;  %v10208_v49 = vmul.f32 %v10860_v35, %v12791_v26  ;;  %v12851_v28 = vpop.eup %10861  ;;  %vm13219_vm1 = vweird.f32 %v12791_v26 }
 0x4a5   : > { %v10136_v41 = vadd.f32 %v10850_v7, %v10135_v5  ;;  %v10165_v2 = vmul.f32 %v10854_v24, %v10164_v39  ;;  %v10194_v56 = vsub.f32 1.0, %v10193_v38  ;;  %v12854_v17 = vpop.eup %10863  ;;  %v10223_v61 = vmul.f32 %v12851_v28, %v12797_v16 }
 0x4a6   : > { %v10151_v18 = vadd.f32 %v10852_v32, %v10150_v4  ;;  %v10180_v52 = vmul.f32 %v10856_v0, %v10179_v10  ;;  %v10209_v42 = vsub.f32 1.0, %v10208_v49  ;;  %v10233_v62 = vand.u32 2147483648, %v12797_v16 }
 0x4a7   : > { %v10140_v1 = vsel %vm10139_vm12, %v10850_v7, %v10136_v41  ;;  %v10166_v40 = vadd.f32 %v10854_v24, %v10165_v2  ;;  %v10195_v60 = vmul.f32 %v12836_v20, %v10194_v56  ;;  %v10224_v6 = vsub.f32 1.0, %v10223_v61 }
 0x4a8   : > { %v10145_v31 = vsel %vm12816_vm0, %v10144_v33, %v10140_v1  ;;  %v10155_v45 = vsel %vm10154_vm13, %v10852_v32, %v10151_v18  ;;  %v10181_v27 = vadd.f32 %v10856_v0, %v10180_v52  ;;  %v10210_v3 = vmul.f32 %v10860_v35, %v10209_v42 }
 0x4a9   : > { %v10146_v7 = vmul.f32 %v10145_v31, %v12555_v29  ;;  %v10170_v55 = vsel %vm10169_vm10, %v10854_v24, %v10166_v40  ;;  %v10160_v22 = vsel %vm12824_vm6, %v10159_v44, %v10155_v45  ;;  %v10196_v12 = vadd.f32 %v12836_v20, %v10195_v60 }
 0x4aa   : > { %v10175_v14 = vsel %vm12830_vm2, %v12810_v54, %v10170_v55  ;;  %v10161_v33 = vmul.f32 %v10160_v22, %v12358_v36  ;;  %v10185_v32 = vsel %vm10184_vm14, %v10856_v0, %v10181_v27  ;;  %v10211_v5 = vadd.f32 %v10860_v35, %v10210_v3 }
 0x4ab   : > { %vm13218_vm0 = vweird.f32 %v10860_v35  ;;  %10865 = vlog2.f32 %v10146_v7  ;;  %v10176_v29 = vmul.f32 %v10175_v14, %v12553_v25  ;;  %v10190_v43 = vsel %vm12839_vm11, %v10189_v37, %v10185_v32 }
 0x4ac   : > { %vm10214_vm4 = vmor %vm13219_vm1, %vm13218_vm0  ;;  %v10219_v44 = vor.u32 1.1754944e-38, %v10218_v63  ;;  %vm13220_vm6 = vweird.f32 %v12788_v50  ;;  %10867 = vlog2.f32 %v10161_v33  ;;  %v10191_v36 = vmul.f32 %v10190_v43, %v12559_v30 }
 0x4ad   : > { %vm10199_vm3 = vmor %vm13220_vm6, %vm10198_vm7  ;;  %v10215_v54 = vsel %vm10214_vm4, %v10860_v35, %v10211_v5  ;;  %10869 = vlog2.f32 %v10176_v29  ;;  %v10204_v25 = vor.u32 1.1754944e-38, %v10203_v23  ;;  %vm10202_vm2 = vcmp.eq.f32.partialorder %v10201_v13, 8.507059e+37 }
 0x4ae   : > { %v10200_v24 = vsel %vm10199_vm3, %v12836_v20, %v10196_v12  ;;  %v10220_v26 = vsel %vm12847_vm15, %v10219_v44, %v10215_v54  ;;  %10871 = vlog2.f32 %v10191_v36  ;;  %v10238_v30 = vmul.f32 %v12854_v17, %v12801_v57 }
 0x4af   : > { %v10221_v37 = vmul.f32 %v10220_v26, %v12557_v59  ;;  %v10205_v0 = vsel %vm10202_vm2, %v10204_v25, %v10200_v24  ;;  %vm10228_vm7 = vweird.f32 %v12851_v28  ;;  %v10231_v20 = vand.u32 2147483647, %v12797_v16 }
 0x4b0   : > { %v10206_v50 = vmul.f32 %v10205_v0, %v12561_v9  ;;  %v10225_v59 = vmul.f32 %v12851_v28, %v10224_v6  ;;  %v10239_v38 = vsub.f32 1.0, %v10238_v30  ;;  %vm10243_vm8 = vweird.f32 %v12854_v17  ;;  %vm10229_vm9 = vmor %vm10227_vm5, %vm10228_vm7 }
 0x4b1   : > { %v10866_v63 = vpop.eup %10865  ;;  %v10248_v10 = vand.u32 2147483648, %v12801_v57  ;;  %v10246_v2 = vand.u32 2147483647, %v12801_v57  ;;  %v10234_v56 = vor.u32 1.1754944e-38, %v10233_v62  ;;  %vm10232_vm11 = vcmp.eq.f32.partialorder %v10231_v20, 8.507059e+37 }
 0x4b2   : > { %v10868_v35 = vpop.eup %10867  ;;  %v10405_v39 = vmul.f32 0.6931472, %v10866_v63  ;;  %10873 = vlog2.f32 %v10206_v50  ;;  %v10226_v58 = vadd.f32 %v12851_v28, %v10225_v59  ;;  %v10240_v41 = vmul.f32 %v12854_v17, %v10239_v38 }
 0x4b3   : > { %v10870_v9 = vpop.eup %10869  ;;  %v10407_v4 = vmul.f32 0.6931472, %v10868_v35  ;;  %10875 = vlog2.f32 %v10221_v37  ;;  %vm10242_vm12 = vweird.f32 %v12801_v57  ;;  %v10249_v1 = vor.u32 1.1754944e-38, %v10248_v10 }
 0x4b4   : > { %10517 = vperm.xlu0 %10782, %v10405_v39   ;;  %v10409_v49 = vmul.f32 0.6931472, %v10870_v9  ;;  %v10872_v18 = vpop.eup %10871  ;;  %v10230_v52 = vsel %vm10229_vm9, %v12851_v28, %v10226_v58  ;;  %v10241_v42 = vadd.f32 %v12854_v17, %v10240_v41  ;;  %vm10244_vm13 = vmor %vm10242_vm12, %vm10243_vm8  ;;  %vm10247_vm15 = vcmp.eq.f32.partialorder %v10246_v2, 8.507059e+37 }
 0x4b5   : > { %10520 = vperm.xlu2 %10784, %v10407_v4   ;;  %v10235_v13 = vsel %vm10232_vm11, %v10234_v56, %v10230_v52  ;;  %v10411_v45 = vmul.f32 0.6931472, %v10872_v18  ;;  %vm13221_vm10 = vcmask 1041409   ;;  %vm13222_vm14 = vcmask 1042434  }
 0x4b6   : > { %10523 = vperm.xlu1 %10783, %v10409_v49   ;;  %v10236_v60 = vmul.f32 %v10235_v13, %v12573_v11  ;;  %v10245_v16 = vsel %vm10244_vm13, %v12854_v17, %v10241_v42  ;;  %v10494_v11 = vpop.permute.xlu2 %10493  ;;  %vm13223_vm0 = vcmask 1043459   ;;  %vm13224_vm1 = vcmask 1044484  }
 0x4b7   : > { %v10250_v31 = vsel %vm10247_vm15, %v10249_v1, %v10245_v16  ;;  %v10572_v33 = vperm.slane %v10494_v11, %v12251_v8  ;;  %vm13225_vm4 = vcmask 1045509   ;;  %vm13228_vm7 = vcmask 1046534  }
 0x4b8   : > { %v10874_v40 = vpop.eup %10873  ;;  %10877 = vlog2.f32 %v10236_v60  ;;  %v10251_v28 = vmul.f32 %v10250_v31, %v12577_v47  ;;  %vm13231_vm11 = vcmask 1047559   ;;  %vm13234_vm15 = vcmask 64512  }
 0x4b9   : > { %v10876_v23 = vpop.eup %10875  ;;  %v10413_v27 = vmul.f32 0.6931472, %v10874_v40  ;;  %v10497_v17 = vpop.permute.xlu1 %10496 }
 0x4ba   : > { %v10415_v57 = vmul.f32 0.6931472, %v10876_v23  ;;  %10879 = vlog2.f32 %v10251_v28  ;;  %v10500_v12 = vpop.permute.xlu0 %10499  ;;  %v10573_v14 = vperm.slane %v10497_v17, %v12251_v8 }
 0x4bb   : > { %v10574_v32 = vperm.slane %v10500_v12, %v12251_v8 }
 0x4bc   : > { %10526 = vperm.xlu0 %10782, %v10411_v45   ;;  %v10603_v29 = vsel %vm13221_vm10, %v10573_v14, %v10572_v33 }
 0x4bd   : > { %10529 = vperm.xlu2 %10784, %v10413_v27   ;;  %v10604_v43 = vsel %vm13222_vm14, %v10574_v32, %v10603_v29 }
 0x4be   : > { %10532 = vperm.xlu1 %10783, %v10415_v57   ;;  %v10878_v3 = vpop.eup %10877  ;;  %v10503_v47 = vpop.permute.xlu2 %10502 }
 0x4bf   : > { %v10417_v55 = vmul.f32 0.6931472, %v10878_v3  ;;  %v10575_v44 = vperm.slane %v10503_v47, %v12251_v8 }
 0x4c0   : > { %v10880_v7 = vpop.eup %10879 }
 0x4c1   : > { %v10419_v22 = vmul.f32 0.6931472, %v10880_v7  ;;  %v10506_v5 = vpop.permute.xlu1 %10505  ;;  %v10605_v24 = vsel %vm13223_vm0, %v10575_v44, %v10604_v43 }
 0x4c2   : > { %v10576_v36 = vperm.slane %v10506_v5, %v12251_v8  ;;  %v10509_v54 = vpop.permute.xlu0 %10508 }
 0x4c3   : > { %v10577_v25 = vperm.slane %v10509_v54, %v12251_v8 }
 0x4c4   : > { %10535 = vperm.xlu0 %10782, %v10417_v55   ;;  %v10606_v50 = vsel %vm13224_vm1, %v10576_v36, %v10605_v24 }
 0x4c5   : > { %10538 = vperm.xlu2 %10784, %v10419_v22   ;;  %v10607_v35 = vsel %vm13225_vm4, %v10577_v25, %v10606_v50 }
 0x4c9   : > { %v10515_v30 = vpop.permute.xlu1 %10514 }
 0x4ca   : > { %v10579_v38 = vperm.slane %v10515_v30, %v12251_v8 }
 0x4ea   : > { %v9823_v26 = vpop.xlane.xlu2 %9822 }
 0x4eb   : > { %v12932_v61 = vperm.slane %v9823_v26, 0  ;;  %v12934_v37 = vperm.slane %v9823_v26, 1  ;;  %v12936_v0 = vperm.slane %v9823_v26, 2  ;;  %v12939_v6 = vperm.slane %v9823_v26, 3 }
 0x4ec   : > { %v12941_v63 = vperm.slane %v9823_v26, 4  ;;  %v12944_v20 = vperm.slane %v9823_v26, 5  ;;  %v12949_v39 = vperm.slane %v9823_v26, 6  ;;  %v12954_v9 = vperm.slane %v9823_v26, 7 }
 0x4ed   : > { %10881 = vrcp.f32 %v12932_v61  ;;  %v10293_v62 = vand.u32 2147483648, %v12936_v0  ;;  %v10278_v59 = vand.u32 2147483648, %v12934_v37  ;;  %v10261_v4 = vand.u32 2147483647, %v12932_v61 }
 0x4ee   : > { %10883 = vrcp.f32 %v12934_v37  ;;  %v10291_v10 = vand.u32 2147483647, %v12936_v0  ;;  %v10276_v49 = vand.u32 2147483647, %v12934_v37  ;;  %v10263_v58 = vand.u32 2147483648, %v12932_v61 }
 0x4ef   : > { %10885 = vrcp.f32 %v12936_v0  ;;  %v12963_v2 = vor.u32 1.1754944e-38, %v10293_v62  ;;  %vm10257_vm6 = vweird.f32 %v12932_v61  ;;  %v10338_v56 = vand.u32 2147483648, %v12944_v20 }
 0x4f0   : > { %10887 = vrcp.f32 %v12939_v6  ;;  %vm10272_vm3 = vweird.f32 %v12934_v37  ;;  %v10279_v42 = vor.u32 1.1754944e-38, %v10278_v59  ;;  %v10336_v13 = vand.u32 2147483647, %v12944_v20 }
 0x4f1   : > { %10889 = vrcp.f32 %v12941_v63  ;;  %vm10287_vm2 = vweird.f32 %v12936_v0  ;;  %vm12974_vm5 = vcmp.eq.f32.partialorder %v10261_v4, 8.507059e+37  ;;  %v10264_v16 = vor.u32 1.1754944e-38, %v10263_v58 }
 0x4f2   : > { %10891 = vrcp.f32 %v12944_v20  ;;  %v10512_v41 = vpop.permute.xlu2 %10511  ;;  %vm12980_vm8 = vcmp.eq.f32.partialorder %v10276_v49, 8.507059e+37  ;;  %v10321_v27 = vand.u32 2147483647, %v12941_v63  ;;  %vm12989_vm12 = vcmp.eq.f32.partialorder %v10291_v10, 8.507059e+37 }
 0x4f3   : > { %v10882_v18 = vpop.eup %10881  ;;  %10893 = vrcp.f32 %v12949_v39  ;;  %v10578_v52 = vperm.slane %v10512_v41, %v12251_v8  ;;  %v10339_v11 = vor.u32 1.1754944e-38, %v10338_v56  ;;  %v10323_v14 = vand.u32 2147483648, %v12941_v63 }
 0x4f4   : > { %v10884_v1 = vpop.eup %10883  ;;  %10895 = vrcp.f32 %v12954_v9  ;;  %v10253_v40 = vmul.f32 %v10882_v18, %v12932_v61  ;;  %vm10258_vm9 = vweird.f32 %v10882_v18  ;;  %vm13004_vm1 = vcmp.eq.f32.partialorder %v10336_v13, 8.507059e+37 }
 0x4f5   : > { %v10886_v23 = vpop.eup %10885  ;;  %v10608_v31 = vsel %vm13228_vm7, %v10578_v52, %v10607_v35  ;;  %v10268_v45 = vmul.f32 %v10884_v1, %v12934_v37  ;;  %vm10273_vm10 = vweird.f32 %v10884_v1  ;;  %vm13008_vm7 = vcmp.eq.f32.partialorder %v10321_v27, 8.507059e+37 }
 0x4f6   : > { %v12985_v57 = vpop.eup %10887  ;;  %v10609_v3 = vsel %vm13231_vm11, %v10579_v38, %v10608_v31  ;;  %v10283_v7 = vmul.f32 %v10886_v23, %v12936_v0  ;;  %v10254_v22 = vsub.f32 1.0, %v10253_v40  ;;  %vm10288_vm0 = vweird.f32 %v10886_v23  ;;  %vm10259_vm11 = vmor %vm10257_vm6, %vm10258_vm9 }
 0x4f7   : > { %v10890_v17 = vpop.eup %10889  ;;  %10629 = vst.msk [vmem:[%s12752_s19 + $0x8] sm:$0xff] %vm13234_vm15, %v10609_v3  ;;  %v10269_v12 = vsub.f32 1.0, %v10268_v45  ;;  %v10298_v33 = vmul.f32 %v12985_v57, %v12939_v6  ;;  %v10324_v38 = vor.u32 1.1754944e-38, %v10323_v14  ;;  %vm10274_vm14 = vmor %vm10272_vm3, %vm10273_vm10  ;;  %vm10303_vm6 = vweird.f32 %v12985_v57 }
 0x4f8   : > { %v10892_v47 = vpop.eup %10891  ;;  %v10284_v32 = vsub.f32 1.0, %v10283_v7  ;;  %v10255_v5 = vmul.f32 %v10882_v18, %v10254_v22  ;;  %v10313_v29 = vmul.f32 %v10890_v17, %v12941_v63  ;;  %vm10318_vm4 = vweird.f32 %v10890_v17  ;;  %vm10289_vm13 = vmor %vm10287_vm2, %vm10288_vm0 }
 0x4f9   : > { %v13001_v43 = vpop.eup %10893  ;;  %v10270_v44 = vmul.f32 %v10884_v1, %v10269_v12  ;;  %v10328_v36 = vmul.f32 %v10892_v47, %v12944_v20  ;;  %v10299_v62 = vsub.f32 1.0, %v10298_v33  ;;  %vm10333_vm15 = vweird.f32 %v10892_v47 }
 0x4fa   : > { %v13012_v26 = vpop.eup %10895  ;;  %v10285_v25 = vmul.f32 %v10886_v23, %v10284_v32  ;;  %v10256_v50 = vadd.f32 %v10882_v18, %v10255_v5  ;;  %v10314_v30 = vsub.f32 1.0, %v10313_v29  ;;  %vm13239_vm3 = vweird.f32 %v12941_v63 }
 0x4fb   : > { %v10271_v35 = vadd.f32 %v10884_v1, %v10270_v44  ;;  %v10329_v59 = vsub.f32 1.0, %v10328_v36  ;;  %v10300_v58 = vmul.f32 %v12985_v57, %v10299_v62  ;;  %vm10319_vm2 = vmor %vm13239_vm3, %vm10318_vm4  ;;  %vm10302_vm9 = vweird.f32 %v12939_v6 }
 0x4fc   : > { %v10286_v4 = vadd.f32 %v10886_v23, %v10285_v25  ;;  %v10260_v10 = vsel %vm10259_vm11, %v10882_v18, %v10256_v50  ;;  %v10315_v49 = vmul.f32 %v10890_v17, %v10314_v30  ;;  %v10358_v45 = vmul.f32 %v13012_v26, %v12954_v9 }
 0x4fd   : > { %v10275_v41 = vsel %vm10274_vm14, %v10884_v1, %v10271_v35  ;;  %v10265_v61 = vsel %vm12974_vm5, %v10264_v16, %v10260_v10  ;;  %v10330_v56 = vmul.f32 %v10892_v47, %v10329_v59  ;;  %v10301_v60 = vadd.f32 %v12985_v57, %v10300_v58 }
 0x4fe   : > { %v10290_v52 = vsel %vm10289_vm13, %v10886_v23, %v10286_v4  ;;  %v10280_v37 = vsel %vm12980_vm8, %v10279_v42, %v10275_v41  ;;  %v10266_v18 = vmul.f32 %v10265_v61, %v12563_v19  ;;  %v10316_v13 = vadd.f32 %v10890_v17, %v10315_v49 }
 0x4ff   : > { %v10295_v40 = vsel %vm12989_vm12, %v12963_v2, %v10290_v52  ;;  %v10281_v0 = vmul.f32 %v10280_v37, %v12697_v51  ;;  %v10331_v1 = vadd.f32 %v10892_v47, %v10330_v56  ;;  %vm13240_vm5 = vweird.f32 %v12944_v20  ;;  %vm10304_vm12 = vmor %vm10302_vm9, %vm10303_vm6 }
 0x500   : > { %v10296_v16 = vmul.f32 %v10295_v40, %v12705_v46  ;;  %10897 = vlog2.f32 %v10266_v18  ;;  %vm10334_vm8 = vmor %vm13240_vm5, %vm10333_vm15  ;;  %v10320_v19 = vsel %vm10319_vm2, %v10890_v17, %v10316_v13  ;;  %v10306_v42 = vand.u32 2147483647, %v12939_v6 }
 0x501   : > { %10899 = vlog2.f32 %v10281_v0  ;;  %v10335_v2 = vsel %vm10334_vm8, %v10892_v47, %v10331_v1  ;;  %v10325_v51 = vsel %vm13008_vm7, %v10324_v38, %v10320_v19  ;;  %v10308_v20 = vand.u32 2147483648, %v12939_v6 }
 0x502   : > { %10901 = vlog2.f32 %v10296_v16  ;;  %v10340_v63 = vsel %vm13004_vm1, %v10339_v11, %v10335_v2  ;;  %v10326_v46 = vmul.f32 %v10325_v51, %v12720_v53  ;;  %v10305_v31 = vsel %vm10304_vm12, %v12985_v57, %v10301_v60 }
 0x503   : > { %v10341_v23 = vmul.f32 %v10340_v63, %v12724_v21  ;;  %vm10307_vm13 = vcmp.eq.f32.partialorder %v10306_v42, 8.507059e+37  ;;  %v10309_v28 = vor.u32 1.1754944e-38, %v10308_v20  ;;  %vm10362_vm10 = vweird.f32 %v12954_v9 }
 0x504   : > { %10903 = vlog2.f32 %v10326_v46  ;;  %v10359_v27 = vsub.f32 1.0, %v10358_v45  ;;  %vm10363_vm14 = vweird.f32 %v13012_v26  ;;  %v10343_v53 = vmul.f32 %v13001_v43, %v12949_v39 }
 0x505   : > { %10905 = vlog2.f32 %v10341_v23  ;;  %v10310_v6 = vsel %vm10307_vm13, %v10309_v28, %v10305_v31  ;;  %v10366_v21 = vand.u32 2147483647, %v12954_v9  ;;  %v10368_v57 = vand.u32 2147483648, %v12954_v9  ;;  %vm10364_vm1 = vmor %vm10362_vm10, %vm10363_vm14 }
 0x506   : > { %v10898_v3 = vpop.eup %10897  ;;  %v10311_v22 = vmul.f32 %v10310_v6, %v12579_v15  ;;  %v10360_v11 = vmul.f32 %v13012_v26, %v10359_v27  ;;  %v10344_v17 = vsub.f32 1.0, %v10343_v53  ;;  %vm10348_vm0 = vweird.f32 %v13001_v43 }
 0x507   : > { %v10900_v7 = vpop.eup %10899  ;;  %v10421_v55 = vmul.f32 0.6931472, %v10898_v3  ;;  %v10351_v33 = vand.u32 2147483647, %v12949_v39  ;;  %v10353_v47 = vand.u32 2147483648, %v12949_v39  ;;  %v10369_v15 = vor.u32 1.1754944e-38, %v10368_v57 }
 0x508   : > { %v10902_v12 = vpop.eup %10901  ;;  %v10423_v14 = vmul.f32 0.6931472, %v10900_v7  ;;  %10907 = vlog2.f32 %v10311_v22  ;;  %v10361_v5 = vadd.f32 %v13012_v26, %v10360_v11  ;;  %v10345_v29 = vmul.f32 %v13001_v43, %v10344_v17 }
 0x509   : > { %v10425_v32 = vmul.f32 0.6931472, %v10902_v12  ;;  %10541 = vperm.xlu1 %10783, %v10421_v55   ;;  %vm10367_vm4 = vcmp.eq.f32.partialorder %v10366_v21, 8.507059e+37  ;;  %vm10347_vm7 = vweird.f32 %v12949_v39  ;;  %v10354_v50 = vor.u32 1.1754944e-38, %v10353_v47 }
 0x50a   : > { %10544 = vperm.xlu0 %10782, %v10423_v14   ;;  %v10904_v44 = vpop.eup %10903  ;;  %v10365_v36 = vsel %vm10364_vm1, %v13012_v26, %v10361_v5  ;;  %v10346_v54 = vadd.f32 %v13001_v43, %v10345_v29  ;;  %vm10349_vm11 = vmor %vm10347_vm7, %vm10348_vm0  ;;  %vm10352_vm15 = vcmp.eq.f32.partialorder %v10351_v33, 8.507059e+37  ;;  %vm13241_vm6 = vcmask 1041409  }
 0x50b   : > { %10547 = vperm.xlu2 %10784, %v10425_v32   ;;  %v10906_v24 = vpop.eup %10905  ;;  %v10370_v25 = vsel %vm10367_vm4, %v10369_v15, %v10365_v36  ;;  %v10429_v59 = vmul.f32 0.6931472, %v10904_v44  ;;  %vm13242_vm3 = vcmask 1042434   ;;  %vm13243_vm2 = vcmask 1043459   ;;  %vm13249_vm10 = vmmov %vm13241_vm6 }
 0x50c   : > { %v10371_v30 = vmul.f32 %v10370_v25, %v12735_v34  ;;  %v10350_v9 = vsel %vm10349_vm11, %v13001_v43, %v10346_v54  ;;  %v10431_v4 = vmul.f32 0.6931472, %v10906_v24  ;;  %vm13244_vm5 = vcmask 1044484   ;;  %vm13250_vm14 = vmmov %vm13242_vm3 }
 0x50d   : > { %v10355_v62 = vsel %vm10352_vm15, %v10354_v50, %v10350_v9  ;;  %vm13245_vm8 = vcmask 1045509   ;;  %vm13246_vm9 = vcmask 1046534   ;;  %vm13247_vm12 = vcmask 1047559   ;;  %vm13251_vm0 = vmmov %vm13243_vm2 }
 0x50e   : > { %v10908_v35 = vpop.eup %10907  ;;  %10909 = vlog2.f32 %v10371_v30  ;;  %v10356_v26 = vmul.f32 %v10355_v62, %v12594_v48  ;;  %vm13248_vm13 = vcmask 64512   ;;  %vm13252_vm1 = vmmov %vm13244_vm5 }
 0x50f   : > { %v10427_v38 = vmul.f32 0.6931472, %v10908_v35  ;;  %v10521_v34 = vpop.permute.xlu2 %10520  ;;  %vm13253_vm4 = vmmov %vm13245_vm8 }
 0x510   : > { %10911 = vlog2.f32 %v10356_v26  ;;  %v10581_v48 = vperm.slane %v10521_v34, %v12251_v8  ;;  %vm13254_vm7 = vmmov %vm13246_vm9 }
 0x511   : > { %10550 = vperm.xlu1 %10783, %v10427_v38   ;;  %vm13255_vm11 = vmmov %vm13247_vm12 }
 0x512   : > { %10553 = vperm.xlu0 %10782, %v10429_v59   ;;  %vm13256_vm15 = vmmov %vm13248_vm13 }
 0x513   : > { %10556 = vperm.xlu2 %10784, %v10431_v4  }
 0x514   : > { %v10910_v39 = vpop.eup %10909 }
 0x515   : > { %v10435_v49 = vmul.f32 0.6931472, %v10910_v39 }
 0x516   : > { %v10912_v10 = vpop.eup %10911 }
 0x517   : > { %v10433_v58 = vmul.f32 0.6931472, %v10912_v10  ;;  %v10530_v56 = vpop.permute.xlu2 %10529 }
 0x518   : > { %v10584_v1 = vperm.slane %v10530_v56, %v12251_v8 }
 0x519   : > { %10559 = vperm.xlu1 %10783, %v10433_v58  }
 0x51a   : > { %10562 = vperm.xlu0 %10782, %v10435_v49  }
 0x51f   : > { %v10539_v16 = vpop.permute.xlu2 %10538 }
 0x520   : > { %v10587_v63 = vperm.slane %v10539_v16, %v12251_v8 }
 0x526   : > { %v10518_v43 = vpop.permute.xlu0 %10517 }
 0x527   : > { %v10580_v61 = vperm.slane %v10518_v43, %v12251_v8 }
 0x528   : > { %v10524_v41 = vpop.permute.xlu1 %10523 }
 0x529   : > { %v10582_v52 = vperm.slane %v10524_v41, %v12251_v8  ;;  %v10610_v37 = vsel %vm13241_vm6, %v10581_v48, %v10580_v61 }
 0x52b   : > { %v10611_v40 = vsel %vm13242_vm3, %v10582_v52, %v10610_v37 }
 0x52e   : > { %v10527_v18 = vpop.permute.xlu0 %10526 }
 0x52f   : > { %v10583_v13 = vperm.slane %v10527_v18, %v12251_v8 }
 0x530   : > { %v10533_v60 = vpop.permute.xlu1 %10532 }
 0x531   : > { %v10612_v0 = vsel %vm13243_vm2, %v10583_v13, %v10611_v40  ;;  %v10585_v42 = vperm.slane %v10533_v60, %v12251_v8 }
 0x532   : > { %v10613_v19 = vsel %vm13244_vm5, %v10584_v1, %v10612_v0 }
 0x533   : > { %v10614_v46 = vsel %vm13245_vm8, %v10585_v42, %v10613_v19 }
 0x536   : > { %v10536_v2 = vpop.permute.xlu0 %10535 }
 0x537   : > { %v10586_v51 = vperm.slane %v10536_v2, %v12251_v8 }
 0x539   : > { %v10615_v20 = vsel %vm13246_vm9, %v10586_v51, %v10614_v46 }
 0x53a   : > { %v10616_v23 = vsel %vm13247_vm12, %v10587_v63, %v10615_v20 }
 0x53b   : > { %10630 = vst.msk [vmem:[%s12752_s19 + $0x10] sm:$0xff] %vm13248_vm13, %v10616_v23 }
 0x565   : > { %v10548_v28 = vpop.permute.xlu2 %10547 }
 0x566   : > { %v10590_v57 = vperm.slane %v10548_v28, %v12251_v8 }
 0x56d   : > { %v10557_v17 = vpop.permute.xlu2 %10556 }
 0x56e   : > { %v10593_v14 = vperm.slane %v10557_v17, %v12251_v8 }
 0x57b   : > { %v10542_v31 = vpop.permute.xlu1 %10541 }
 0x57c   : > { %v10545_v45 = vpop.permute.xlu0 %10544  ;;  %v10588_v27 = vperm.slane %v10542_v31, %v12251_v8 }
 0x57d   : > { %v10589_v53 = vperm.slane %v10545_v45, %v12251_v8 }
 0x57f   : > { %v10617_v3 = vsel %vm13249_vm10, %v10589_v53, %v10588_v27 }
 0x580   : > { %v10618_v55 = vsel %vm13250_vm14, %v10590_v57, %v10617_v3 }
 0x583   : > { %v10551_v6 = vpop.permute.xlu1 %10550 }
 0x584   : > { %v10554_v21 = vpop.permute.xlu0 %10553  ;;  %v10591_v7 = vperm.slane %v10551_v6, %v12251_v8 }
 0x585   : > { %v10592_v22 = vperm.slane %v10554_v21, %v12251_v8 }
 0x586   : > { %v10619_v11 = vsel %vm13251_vm0, %v10591_v7, %v10618_v55 }
 0x587   : > { %v10620_v12 = vsel %vm13252_vm1, %v10592_v22, %v10619_v11 }
 0x588   : > { %v10621_v29 = vsel %vm13253_vm4, %v10593_v14, %v10620_v12 }
 0x58b   : > { %v10560_v33 = vpop.permute.xlu1 %10559 }
 0x58c   : > { %v10563_v47 = vpop.permute.xlu0 %10562  ;;  %v10594_v32 = vperm.slane %v10560_v33, %v12251_v8 }
 0x58d   : > { %v10595_v5 = vperm.slane %v10563_v47, %v12251_v8 }
 0x58e   : > { %v10622_v15 = vsel %vm13254_vm7, %v10594_v32, %v10621_v29 }
 0x58f   : > { %v10623_v44 = vsel %vm13255_vm11, %v10595_v5, %v10622_v15 }
 0x590   : > { %10631 = vst.msk [vmem:[%s12752_s19 + $0x18] sm:$0xff] %vm13256_vm15, %v10623_v44 }
 0x591 PF: > { %p13_p4 = scmp.ge.s32.totalorder %s11086_s22, 4   ;;  %s13257_s9 = smov %s11011_s10 }
 0x592   : > { %s13258_s10 = smov %s11015_s11  ;;  %s13259_s11 = smov %s11099_s27 }
 0x593   : > { %s13260_s12 = smov %s11086_s22  ;;  %15 = sbr.rel (!%p13_p4) target bundleno = 4 (0x4), region = 73 }
 0x598   :  { %10654 = vsyncpa [#allocation3], 1 }
 0x599   :  { %10656 = vsyncpa [#allocation3 + $0x1], 1 }
 0x59a   :  { %10657 = vsyncpa [#allocation5], 1 }
 0x59b   :  { %10659 = vsyncpa [#allocation5 + $0x1], 1 }

</bundles_post_ra>
